<compile_context>
chip_gen: v7x
topology: tpu7x:2x2x1
jax: 0.10.0
libtpu: 0.0.40
codegen_flags: <defaults>
</compile_context>

<pallas_src>
import math

import jax
import jax.numpy as jnp
from jax import lax
from jax.experimental import pallas as pl
from jax.experimental.pallas import tpu as pltpu

# ---------------- model hyper-parameters (small, synthetic) ----------------
BATCH = 2
IN_CH = 3
IMG = 16
PATCH = 8
HIDDEN = 32            # E
HEADS = 4              # H -> head dim 8
DH = HIDDEN // HEADS
MLP_DIM = 64
NUM_LAYERS = 1         # single pre-LN encoder block (hard-wired in the kernel)
NUM_CLASSES = 10
N_PATCHES = (IMG // PATCH) ** 2
SEQ = N_PATCHES + 1    # +1 class token (= 5)
SEQP = 8               # sequence padded to a sublane multiple
TOKP = BATCH * SEQP    # 16 padded token rows
CPP = IN_CH * PATCH * PATCH
LN_EPS = 1e-6          # torchvision ViT uses nn.LayerNorm(eps=1e-6)
NEG = -1e30            # additive mask value for invalid keys


# ========================= in-kernel math helpers ===========================
def _dot(a, b):
    return jnp.dot(a, b, preferred_element_type=jnp.float32)


def _dot_nt(a, b):
    # a @ b.T without materialising a transpose (MXU handles the NT form).
    return lax.dot_general(a, b, (((1,), (1,)), ((), ())),
                           preferred_element_type=jnp.float32)


def _layer_norm(x, g, b):
    mu = jnp.mean(x, axis=-1, keepdims=True)
    xc = x - mu
    var = jnp.mean(xc * xc, axis=-1, keepdims=True)
    return xc * lax.rsqrt(var + LN_EPS) * g + b


def _erf(x):
    # Abramowitz & Stegun 7.1.26 polynomial (|err| < 1.5e-7); exp/mul/add only,
    # so it always lowers in Mosaic -> exact-erf GELU in-kernel.
    p = 0.3275911
    a1, a2, a3, a4, a5 = (0.254829592, -0.284496736, 1.421413741,
                          -1.453152027, 1.061405429)
    sgn = jnp.where(x >= 0.0, 1.0, -1.0)
    ax = jnp.abs(x)
    t = 1.0 / (1.0 + p * ax)
    poly = ((((a5 * t + a4) * t + a3) * t + a2) * t + a1) * t
    return sgn * (1.0 - poly * jnp.exp(-ax * ax))


def _gelu_exact(x):
    return 0.5 * x * (1.0 + _erf(x * (1.0 / math.sqrt(2.0))))


def _mha(q, kv, mask):
    """Multi-head attention, batched over the (padded) batch dimension.

    q    : (Sq, E)   queries, pre-scaled by 1/sqrt(DH) (folded into wq/bq)
    kv   : (Sk, 2E)  packed [keys | values]
    mask : (Sq, Sk)  additive mask: 0 for valid same-batch keys, -1e30 otherwise
    Everything stays in registers; head outputs are concatenated along lanes.
    """
    outs = []
    for h in range(HEADS):
        c = h * DH
        s = _dot_nt(q[:, c:c + DH], kv[:, c:c + DH]) + mask
        m = jnp.max(s, axis=-1, keepdims=True)
        e = jnp.exp(s - m)
        p = e / jnp.sum(e, axis=-1, keepdims=True)          # exact normalization
        outs.append(_dot(p, kv[:, HIDDEN + c:HIDDEN + c + DH]))
    return jnp.concatenate(outs, axis=-1)


# ============================ fused Pallas kernel ===========================
def _polar_vit_kernel(
    patches_ref,
    pw_ref, tokadd_ref, ln1g_ref, ln1b_ref, qkvw_ref, qkvb_ref, wo_ref, bo_ref,
    ln2g_ref, ln2b_ref, w1_ref, b1_ref, w2_ref, b2_ref, lnfg_ref, lnfb_ref,
    mask_self_ref, mask_dec2_ref,
    wq1_ref, bq1_ref, wkv1_ref, bkv1_ref, wo1_ref, bo1_ref,
    wq2_ref, bq2_ref, wkv2_ref, bkv2_ref, wo2_ref, bo2_ref,
    hw_ref, hb_ref,
    out_ref):
    """Both ViT branches + decoder_1 + decoder_2 + fusion + head, fully fused."""
    mask_self = mask_self_ref[...]                           # (TOKP, TOKP)

    # TODO(synk): encoder/attention/MLP dropout omitted (p=0 at inference).
    feats = []
    for br in range(2):                                      # two independent ViT branches
        # patch embed + class-token / positional-embedding / conv-bias (one add)
        x = _dot(patches_ref[br], pw_ref[br]) + tokadd_ref[br]       # (TOKP, E)

        # pre-LN multi-head self-attention (packed QKV, q pre-scaled)
        y = _layer_norm(x, ln1g_ref[br], ln1b_ref[br])
        qkv = _dot(y, qkvw_ref[br]) + qkvb_ref[br]                   # (TOKP, 3E)
        attn = _mha(qkv[:, :HIDDEN], qkv[:, HIDDEN:], mask_self)
        x = x + _dot(attn, wo_ref[br]) + bo_ref[br]

        # MLP with in-kernel exact-erf GELU
        z = _layer_norm(x, ln2g_ref[br], ln2b_ref[br])
        h = _gelu_exact(_dot(z, w1_ref[br]) + b1_ref[br])
        x = x + _dot(h, w2_ref[br]) + b2_ref[br]

        feats.append(_layer_norm(x, lnfg_ref[br], lnfb_ref[br]))     # final encoder LN
    f1, f2 = feats

    # ---- decoder_1: query = features1 (full padded seq), key/value = features2
    q1 = _dot(f1, wq1_ref[...]) + bq1_ref[...]                        # (TOKP, E)
    kv1 = _dot(f2, wkv1_ref[...]) + bkv1_ref[...]                     # (TOKP, 2E)
    f1_new = _dot(_mha(q1, kv1, mask_self), wo1_ref[...]) + bo1_ref[...]

    # ---- decoder_2: only the class-token query rows feed the final output
    q2_full = _dot(f2, wq2_ref[...]) + bq2_ref[...]                   # (TOKP, E)
    q2 = jnp.concatenate([q2_full[0:1, :], q2_full[SEQP:SEQP + 1, :]], axis=0)  # (B, E)
    kv2 = _dot(f1_new, wkv2_ref[...]) + bkv2_ref[...]                 # (TOKP, 2E)
    c2 = _dot(_mha(q2, kv2, mask_dec2_ref[...]), wo2_ref[...]) + bo2_ref[...]   # (B, E)

    # ---- sigmoid(alpha) fusion folded into the head weights at pack time:
    #      logits = [c1 | c2] @ [[a*W], [(1-a)*W]] + b
    c1 = jnp.concatenate([f1_new[0:1, :], f1_new[SEQP:SEQP + 1, :]], axis=0)    # (B, E)
    comb = jnp.concatenate([c1, c2], axis=-1)                                   # (B, 2E)
    out_ref[...] = _dot(comb, hw_ref[...]) + hb_ref[...]


# ============================ kernel wrapper ================================
_VMEM = pl.BlockSpec(memory_space=pltpu.MemorySpace.VMEM)

_ENC_KEYS = ("pw", "tokadd", "ln1g", "ln1b", "qkvw", "qkvb", "wo", "bo",
             "ln2g", "ln2b", "w1", "b1", "w2", "b2", "lnfg", "lnfb")


def polar_vit_pallas(patches, packed):
    enc, d1, d2 = packed["enc"], packed["dec1"], packed["dec2"]
    inputs = ([patches] + [enc[k] for k in _ENC_KEYS]
              + [packed["mask_self"], packed["mask_dec2"]]
              + [d1["wq"], d1["bq"], d1["wkv"], d1["bkv"], d1["wo"], d1["bo"]]
              + [d2["wq"], d2["bq"], d2["wkv"], d2["bkv"], d2["wo"], d2["bo"]]
              + [packed["head_w"], packed["head_b"]])
    return pl.pallas_call(
        _polar_vit_kernel,
        out_shape=jax.ShapeDtypeStruct((BATCH, NUM_CLASSES), jnp.float32),
        in_specs=[_VMEM] * len(inputs),
        out_specs=_VMEM,
    )(*inputs)


# ============================ forward & packing =============================
def _extract_patches(x):
    # torchvision ViT._process_input (conv stride=patch) as an im2col layout.
    b, c, h, w = x.shape
    nh, nw = h // PATCH, w // PATCH
    return (x.reshape(b, c, nh, PATCH, nw, PATCH)
             .transpose(0, 2, 4, 1, 3, 5)
             .reshape(b, nh * nw, c * PATCH * PATCH))            # (B, NP, CPP)


def _extract_patches_padded(x):
    # Padded token layout per batch: [cls slot (zeros), NP patch rows, pad rows].
    p = _extract_patches(x)
    cls_slot = jnp.zeros((BATCH, 1, CPP), p.dtype)
    tail = jnp.zeros((BATCH, SEQP - 1 - N_PATCHES, CPP), p.dtype)
    return jnp.concatenate([cls_slot, p, tail], axis=1).reshape(BATCH * SEQP, CPP)


def polar_vit_forward(packed, x1, x2):
    patches = jnp.stack([_extract_patches_padded(x1),
                         _extract_patches_padded(x2)])           # (2, TOKP, CPP)
    return polar_vit_pallas(patches, packed)


def pack_params(p):
    """Repack torch-style parameters into the fused-kernel layout (done once)."""
    assert NUM_LAYERS == 1  # the fused kernel hard-wires one encoder block
    scale = 1.0 / math.sqrt(DH)

    def branch(v):
        layer = v["layers"][0]
        a = layer["attn"]
        # tokens = patches @ pw + tokadd  (class token+pos, conv bias+pos, zeros pad)
        cls_row = v["class_token"].reshape(1, HIDDEN) + v["pos_embedding"][0, 0:1, :]
        patch_rows = v["conv_b"].reshape(1, HIDDEN) + v["pos_embedding"][0, 1:, :]
        pad_rows = jnp.zeros((SEQP - 1 - N_PATCHES, HIDDEN), jnp.float32)
        tokadd = jnp.tile(jnp.concatenate([cls_row, patch_rows, pad_rows], axis=0),
                          (BATCH, 1))                            # (TOKP, E)
        return dict(
            pw=v["conv_w"].reshape(HIDDEN, CPP).T,               # (CPP, E)
            tokadd=tokadd,
            ln1g=layer["ln1_g"].reshape(1, HIDDEN),
            ln1b=layer["ln1_b"].reshape(1, HIDDEN),
            qkvw=jnp.concatenate([a["wq"] * scale, a["wk"], a["wv"]], axis=1),
            qkvb=jnp.concatenate([a["bq"] * scale, a["bk"], a["bv"]]).reshape(1, 3 * HIDDEN),
            wo=a["wo"], bo=a["bo"].reshape(1, HIDDEN),
            ln2g=layer["ln2_g"].reshape(1, HIDDEN),
            ln2b=layer["ln2_b"].reshape(1, HIDDEN),
            w1=layer["mlp_w1"], b1=layer["mlp_b1"].reshape(1, MLP_DIM),
            w2=layer["mlp_w2"], b2=layer["mlp_b2"].reshape(1, HIDDEN),
            lnfg=v["ln_g"].reshape(1, HIDDEN),
            lnfb=v["ln_b"].reshape(1, HIDDEN),
        )

    b1p, b2p = branch(p["vit1"]), branch(p["vit2"])
    enc = {k: jnp.stack([b1p[k], b2p[k]]) for k in _ENC_KEYS}

    def dec(d):
        return dict(
            wq=d["wq"] * scale, bq=(d["bq"] * scale).reshape(1, HIDDEN),
            wkv=jnp.concatenate([d["wk"], d["wv"]], axis=1),
            bkv=jnp.concatenate([d["bk"], d["bv"]]).reshape(1, 2 * HIDDEN),
            wo=d["wo"], bo=d["bo"].reshape(1, HIDDEN),
        )

    # Additive attention masks for the padded layout (valid same-batch keys only).
    rows = jnp.arange(TOKP)
    valid_key = (rows % SEQP) < SEQ
    same_batch = (rows[:, None] // SEQP) == (rows[None, :] // SEQP)
    mask_self = jnp.where(same_batch & valid_key[None, :], 0.0, NEG).astype(jnp.float32)
    qb = jnp.arange(BATCH)
    mask_dec2 = jnp.where((qb[:, None] == (rows[None, :] // SEQP)) & valid_key[None, :],
                          0.0, NEG).astype(jnp.float32)

    # sigmoid(alpha) fusion folded into the classification head weights.
    a = jax.nn.sigmoid(p["alpha"]).astype(jnp.float32)
    head_w = jnp.concatenate([a * p["head_w"], (1.0 - a) * p["head_w"]], axis=0)

    return dict(enc=enc, dec1=dec(p["decoder1"]), dec2=dec(p["decoder2"]),
                mask_self=mask_self, mask_dec2=mask_dec2,
                head_w=head_w, head_b=p["head_b"].reshape(1, NUM_CLASSES))


# ======================== pure-JAX reference (check) ========================
def reference_forward(params, x1, x2):
    def ln(x, g, b):
        mu = x.mean(-1, keepdims=True)
        var = ((x - mu) ** 2).mean(-1, keepdims=True)
        return (x - mu) / jnp.sqrt(var + LN_EPS) * g + b

    def mha(xq, xkv, p):
        b, sq, e = xq.shape
        skv = xkv.shape[1]
        dh = e // HEADS
        q = (xq @ p["wq"] + p["bq"]).reshape(b, sq, HEADS, dh).transpose(0, 2, 1, 3)
        k = (xkv @ p["wk"] + p["bk"]).reshape(b, skv, HEADS, dh).transpose(0, 2, 1, 3)
        v = (xkv @ p["wv"] + p["bv"]).reshape(b, skv, HEADS, dh).transpose(0, 2, 1, 3)
        s = jnp.einsum("bhqd,bhkd->bhqk", q * (1.0 / math.sqrt(dh)), k)
        w = jax.nn.softmax(s, axis=-1)
        o = jnp.einsum("bhqk,bhkd->bhqd", w, v).transpose(0, 2, 1, 3).reshape(b, sq, e)
        return o @ p["wo"] + p["bo"]

    def encoder(x, vp):
        x = x + vp["pos_embedding"]
        for layer in vp["layers"]:
            y = ln(x, layer["ln1_g"], layer["ln1_b"])
            x = x + mha(y, y, layer["attn"])
            z = ln(x, layer["ln2_g"], layer["ln2_b"])
            h = jax.nn.gelu(z @ layer["mlp_w1"] + layer["mlp_b1"], approximate=False)
            x = x + (h @ layer["mlp_w2"] + layer["mlp_b2"])
        return ln(x, vp["ln_g"], vp["ln_b"])

    def tokens(x, vp):
        emb = _extract_patches(x) @ vp["conv_w"].reshape(HIDDEN, CPP).T + vp["conv_b"]
        cls = jnp.broadcast_to(vp["class_token"], (BATCH, 1, HIDDEN))
        return jnp.concatenate([cls, emb], axis=1)

    f1 = encoder(tokens(x1, params["vit1"]), params["vit1"])
    f2 = encoder(tokens(x2, params["vit2"]), params["vit2"])
    f1 = mha(f1, f2, params["decoder1"])
    f2 = mha(f2, f1, params["decoder2"])
    a = jax.nn.sigmoid(params["alpha"])
    cls_tok = (a * f1 + (1.0 - a) * f2)[:, 0]
    return cls_tok @ params["head_w"] + params["head_b"]


# ============================ deterministic init ============================
def init_params(key):
    keys = iter(jax.random.split(key, 64))

    def nrm(shape, s=0.05):
        return (s * jax.random.normal(next(keys), shape)).astype(jnp.float32)

    def attn_params(e):
        return dict(
            wq=nrm((e, e)), bq=jnp.zeros((e,), jnp.float32),
            wk=nrm((e, e)), bk=jnp.zeros((e,), jnp.float32),
            wv=nrm((e, e)), bv=jnp.zeros((e,), jnp.float32),
            wo=nrm((e, e)), bo=jnp.zeros((e,), jnp.float32),
        )

    def encoder_layer(e, m):
        return dict(
            ln1_g=jnp.ones((e,), jnp.float32), ln1_b=jnp.zeros((e,), jnp.float32),
            attn=attn_params(e),
            ln2_g=jnp.ones((e,), jnp.float32), ln2_b=jnp.zeros((e,), jnp.float32),
            mlp_w1=nrm((e, m)), mlp_b1=jnp.zeros((m,), jnp.float32),
            mlp_w2=nrm((m, e)), mlp_b2=jnp.zeros((e,), jnp.float32),
        )

    def vit():
        return dict(
            conv_w=nrm((HIDDEN, IN_CH, PATCH, PATCH)),
            conv_b=jnp.zeros((HIDDEN,), jnp.float32),
            class_token=nrm((1, 1, HIDDEN), 0.02),
            pos_embedding=nrm((1, SEQ, HIDDEN), 0.02),
            layers=[encoder_layer(HIDDEN, MLP_DIM) for _ in range(NUM_LAYERS)],
            ln_g=jnp.ones((HIDDEN,), jnp.float32),
            ln_b=jnp.zeros((HIDDEN,), jnp.float32),
        )

    return dict(
        vit1=vit(),
        vit2=vit(),
        decoder1=attn_params(HIDDEN),
        decoder2=attn_params(HIDDEN),
        alpha=jnp.float32(0.0),            # nn.Parameter(torch.tensor(0.0))
        head_w=nrm((HIDDEN, NUM_CLASSES)),
        head_b=jnp.zeros((NUM_CLASSES,), jnp.float32),
    )


# ==================================== main ==================================
if __name__ == "__main__":
    key = jax.random.PRNGKey(0)
    k_params, k_x1, k_x2 = jax.random.split(key, 3)
    params = init_params(k_params)
    packed = pack_params(params)

    x1 = jax.random.normal(k_x1, (BATCH, IN_CH, IMG, IMG), dtype=jnp.float32)
    x2 = jax.random.normal(k_x2, (BATCH, IN_CH, IMG, IMG), dtype=jnp.float32)

    # Kernel runs its matmuls at DEFAULT precision (single-pass bf16 MXU).
    logits = jax.jit(polar_vit_forward)(packed, x1, x2)
    jax.block_until_ready(logits)
    assert logits.shape == (BATCH, NUM_CLASSES)

    # Reference at 'highest' matmul precision for an accurate ground truth.
    with jax.default_matmul_precision("highest"):
        ref = jax.jit(reference_forward)(params, x1, x2)
    jax.block_until_ready(ref)

    err = float(jnp.max(jnp.abs(logits - ref)))
    assert err < 5e-3, f"Pallas vs reference mismatch: max |diff| = {err}"

    print("KERNEL_OK")
</pallas_src>

<mosaic_0001>
module attributes {stable_mosaic.version = 11 : i64} {
  func.func @_polar_vit_kernel(%arg0: memref<2x16x192xf32, #tpu.memory_space<vmem>>, %arg1: memref<2x192x32xf32, #tpu.memory_space<vmem>>, %arg2: memref<2x16x32xf32, #tpu.memory_space<vmem>>, %arg3: memref<2x1x32xf32, #tpu.memory_space<vmem>>, %arg4: memref<2x1x32xf32, #tpu.memory_space<vmem>>, %arg5: memref<2x32x96xf32, #tpu.memory_space<vmem>>, %arg6: memref<2x1x96xf32, #tpu.memory_space<vmem>>, %arg7: memref<2x32x32xf32, #tpu.memory_space<vmem>>, %arg8: memref<2x1x32xf32, #tpu.memory_space<vmem>>, %arg9: memref<2x1x32xf32, #tpu.memory_space<vmem>>, %arg10: memref<2x1x32xf32, #tpu.memory_space<vmem>>, %arg11: memref<2x32x64xf32, #tpu.memory_space<vmem>>, %arg12: memref<2x1x64xf32, #tpu.memory_space<vmem>>, %arg13: memref<2x64x32xf32, #tpu.memory_space<vmem>>, %arg14: memref<2x1x32xf32, #tpu.memory_space<vmem>>, %arg15: memref<2x1x32xf32, #tpu.memory_space<vmem>>, %arg16: memref<2x1x32xf32, #tpu.memory_space<vmem>>, %arg17: memref<16x16xf32, #tpu.memory_space<vmem>>, %arg18: memref<2x16xf32, #tpu.memory_space<vmem>>, %arg19: memref<32x32xf32, #tpu.memory_space<vmem>>, %arg20: memref<1x32xf32, #tpu.memory_space<vmem>>, %arg21: memref<32x64xf32, #tpu.memory_space<vmem>>, %arg22: memref<1x64xf32, #tpu.memory_space<vmem>>, %arg23: memref<32x32xf32, #tpu.memory_space<vmem>>, %arg24: memref<1x32xf32, #tpu.memory_space<vmem>>, %arg25: memref<32x32xf32, #tpu.memory_space<vmem>>, %arg26: memref<1x32xf32, #tpu.memory_space<vmem>>, %arg27: memref<32x64xf32, #tpu.memory_space<vmem>>, %arg28: memref<1x64xf32, #tpu.memory_space<vmem>>, %arg29: memref<32x32xf32, #tpu.memory_space<vmem>>, %arg30: memref<1x32xf32, #tpu.memory_space<vmem>>, %arg31: memref<64x10xf32, #tpu.memory_space<vmem>>, %arg32: memref<1x10xf32, #tpu.memory_space<vmem>>, %arg33: memref<2x10xf32, #tpu.memory_space<vmem>>) attributes {dimension_semantics = [], scalar_prefetch = 0 : i64, scratch_operands = 0 : i64, tpu.core_type = #tpu.core_type<tc>} {
    %c0 = arith.constant 0 : index
    %c0_0 = arith.constant 0 : index
    %0 = vector.load %arg17[%c0, %c0_0] : memref<16x16xf32, #tpu.memory_space<vmem>>, vector<16x16xf32>
    %c0_1 = arith.constant 0 : index
    %c0_2 = arith.constant 0 : index
    %c0_3 = arith.constant 0 : index
    %1 = vector.load %arg0[%c0_1, %c0_2, %c0_3] : memref<2x16x192xf32, #tpu.memory_space<vmem>>, vector<1x16x192xf32>
    %2 = vector.shape_cast %1 : vector<1x16x192xf32> to vector<16x192xf32>
    %c0_4 = arith.constant 0 : index
    %c0_5 = arith.constant 0 : index
    %c0_6 = arith.constant 0 : index
    %3 = vector.load %arg1[%c0_4, %c0_5, %c0_6] : memref<2x192x32xf32, #tpu.memory_space<vmem>>, vector<1x192x32xf32>
    %4 = vector.shape_cast %3 : vector<1x192x32xf32> to vector<192x32xf32>
    %cst = arith.constant dense<0.000000e+00> : vector<16x32xf32>
    %5 = tpu.matmul %2, %4, %cst {dimension_numbers = #tpu.dot_dimension_numbers<[1], [0], [0], [1], [0, 0, 1, 1], [], []>} : vector<16x192xf32>, vector<192x32xf32>, vector<16x32xf32> -> vector<16x32xf32>
    %c0_7 = arith.constant 0 : index
    %c0_8 = arith.constant 0 : index
    %c0_9 = arith.constant 0 : index
    %6 = vector.load %arg2[%c0_7, %c0_8, %c0_9] : memref<2x16x32xf32, #tpu.memory_space<vmem>>, vector<1x16x32xf32>
    %7 = vector.shape_cast %6 : vector<1x16x32xf32> to vector<16x32xf32>
    %8 = arith.addf %5, %7 : vector<16x32xf32>
    %c0_10 = arith.constant 0 : index
    %c0_11 = arith.constant 0 : index
    %c0_12 = arith.constant 0 : index
    %9 = vector.load %arg3[%c0_10, %c0_11, %c0_12] : memref<2x1x32xf32, #tpu.memory_space<vmem>>, vector<1x1x32xf32>
    %10 = vector.shape_cast %9 : vector<1x1x32xf32> to vector<1x32xf32>
    %c0_13 = arith.constant 0 : index
    %c0_14 = arith.constant 0 : index
    %c0_15 = arith.constant 0 : index
    %11 = vector.load %arg4[%c0_13, %c0_14, %c0_15] : memref<2x1x32xf32, #tpu.memory_space<vmem>>, vector<1x1x32xf32>
    %12 = vector.shape_cast %11 : vector<1x1x32xf32> to vector<1x32xf32>
    %cst_16 = arith.constant dense<0.000000e+00> : vector<16xf32>
    %13 = vector.multi_reduction <add>, %8, %cst_16 [1] : vector<16x32xf32> to vector<16xf32>
    %14 = vector.shape_cast %13 : vector<16xf32> to vector<16x1xf32>
    %cst_17 = arith.constant 3.200000e+01 : f32
    %15 = vector.broadcast %cst_17 : f32 to vector<16x1xf32>
    %16 = arith.divf %14, %15 : vector<16x1xf32>
    %17 = vector.broadcast %16 : vector<16x1xf32> to vector<16x32xf32>
    %18 = arith.subf %8, %17 : vector<16x32xf32>
    %19 = arith.mulf %18, %18 : vector<16x32xf32>
    %cst_18 = arith.constant dense<0.000000e+00> : vector<16xf32>
    %20 = vector.multi_reduction <add>, %19, %cst_18 [1] : vector<16x32xf32> to vector<16xf32>
    %21 = vector.shape_cast %20 : vector<16xf32> to vector<16x1xf32>
    %cst_19 = arith.constant 3.200000e+01 : f32
    %22 = vector.broadcast %cst_19 : f32 to vector<16x1xf32>
    %23 = arith.divf %21, %22 : vector<16x1xf32>
    %cst_20 = arith.constant 9.99999997E-7 : f32
    %24 = vector.broadcast %cst_20 : f32 to vector<16x1xf32>
    %25 = arith.addf %23, %24 : vector<16x1xf32>
    %26 = math.rsqrt %25 : vector<16x1xf32>
    %27 = vector.broadcast %26 : vector<16x1xf32> to vector<16x32xf32>
    %28 = arith.mulf %18, %27 : vector<16x32xf32>
    %29 = vector.broadcast %10 : vector<1x32xf32> to vector<16x32xf32>
    %30 = arith.mulf %28, %29 : vector<16x32xf32>
    %31 = vector.broadcast %12 : vector<1x32xf32> to vector<16x32xf32>
    %32 = arith.addf %30, %31 : vector<16x32xf32>
    %c0_21 = arith.constant 0 : index
    %c0_22 = arith.constant 0 : index
    %c0_23 = arith.constant 0 : index
    %33 = vector.load %arg5[%c0_21, %c0_22, %c0_23] : memref<2x32x96xf32, #tpu.memory_space<vmem>>, vector<1x32x96xf32>
    %34 = vector.shape_cast %33 : vector<1x32x96xf32> to vector<32x96xf32>
    %cst_24 = arith.constant dense<0.000000e+00> : vector<16x96xf32>
    %35 = tpu.matmul %32, %34, %cst_24 {dimension_numbers = #tpu.dot_dimension_numbers<[1], [0], [0], [1], [0, 0, 1, 1], [], []>} : vector<16x32xf32>, vector<32x96xf32>, vector<16x96xf32> -> vector<16x96xf32>
    %c0_25 = arith.constant 0 : index
    %c0_26 = arith.constant 0 : index
    %c0_27 = arith.constant 0 : index
    %36 = vector.load %arg6[%c0_25, %c0_26, %c0_27] : memref<2x1x96xf32, #tpu.memory_space<vmem>>, vector<1x1x96xf32>
    %37 = vector.shape_cast %36 : vector<1x1x96xf32> to vector<1x96xf32>
    %38 = vector.broadcast %37 : vector<1x96xf32> to vector<16x96xf32>
    %39 = arith.addf %35, %38 : vector<16x96xf32>
    %40 = vector.extract_strided_slice %39 {offsets = [0, 0], sizes = [16, 32], strides = [1, 1]} : vector<16x96xf32> to vector<16x32xf32>
    %41 = vector.extract_strided_slice %39 {offsets = [0, 32], sizes = [16, 64], strides = [1, 1]} : vector<16x96xf32> to vector<16x64xf32>
    %42 = vector.extract_strided_slice %40 {offsets = [0, 0], sizes = [16, 8], strides = [1, 1]} : vector<16x32xf32> to vector<16x8xf32>
    %43 = vector.extract_strided_slice %41 {offsets = [0, 0], sizes = [16, 8], strides = [1, 1]} : vector<16x64xf32> to vector<16x8xf32>
    %cst_28 = arith.constant dense<0.000000e+00> : vector<16x16xf32>
    %44 = tpu.matmul %42, %43, %cst_28 {dimension_numbers = #tpu.dot_dimension_numbers<[1], [1], [0], [0], [0, 0, 1, 0], [], []>} : vector<16x8xf32>, vector<16x8xf32>, vector<16x16xf32> -> vector<16x16xf32>
    %45 = arith.addf %44, %0 : vector<16x16xf32>
    %cst_29 = arith.constant dense<0xFF800000> : vector<16xf32>
    %46 = vector.multi_reduction <maximumf>, %45, %cst_29 [1] : vector<16x16xf32> to vector<16xf32>
    %47 = vector.shape_cast %46 : vector<16xf32> to vector<16x1xf32>
    %48 = vector.broadcast %47 : vector<16x1xf32> to vector<16x16xf32>
    %49 = arith.subf %45, %48 : vector<16x16xf32>
    %50 = math.exp %49 : vector<16x16xf32>
    %cst_30 = arith.constant dense<0.000000e+00> : vector<16xf32>
    %51 = vector.multi_reduction <add>, %50, %cst_30 [1] : vector<16x16xf32> to vector<16xf32>
    %52 = vector.shape_cast %51 : vector<16xf32> to vector<16x1xf32>
    %53 = vector.broadcast %52 : vector<16x1xf32> to vector<16x16xf32>
    %54 = arith.divf %50, %53 : vector<16x16xf32>
    %55 = vector.extract_strided_slice %41 {offsets = [0, 32], sizes = [16, 8], strides = [1, 1]} : vector<16x64xf32> to vector<16x8xf32>
    %cst_31 = arith.constant dense<0.000000e+00> : vector<16x8xf32>
    %56 = tpu.matmul %54, %55, %cst_31 {dimension_numbers = #tpu.dot_dimension_numbers<[1], [0], [0], [1], [0, 0, 1, 1], [], []>} : vector<16x16xf32>, vector<16x8xf32>, vector<16x8xf32> -> vector<16x8xf32>
    %57 = vector.extract_strided_slice %40 {offsets = [0, 8], sizes = [16, 8], strides = [1, 1]} : vector<16x32xf32> to vector<16x8xf32>
    %58 = vector.extract_strided_slice %41 {offsets = [0, 8], sizes = [16, 8], strides = [1, 1]} : vector<16x64xf32> to vector<16x8xf32>
    %cst_32 = arith.constant dense<0.000000e+00> : vector<16x16xf32>
    %59 = tpu.matmul %57, %58, %cst_32 {dimension_numbers = #tpu.dot_dimension_numbers<[1], [1], [0], [0], [0, 0, 1, 0], [], []>} : vector<16x8xf32>, vector<16x8xf32>, vector<16x16xf32> -> vector<16x16xf32>
    %60 = arith.addf %59, %0 : vector<16x16xf32>
    %cst_33 = arith.constant dense<0xFF800000> : vector<16xf32>
    %61 = vector.multi_reduction <maximumf>, %60, %cst_33 [1] : vector<16x16xf32> to vector<16xf32>
    %62 = vector.shape_cast %61 : vector<16xf32> to vector<16x1xf32>
    %63 = vector.broadcast %62 : vector<16x1xf32> to vector<16x16xf32>
    %64 = arith.subf %60, %63 : vector<16x16xf32>
    %65 = math.exp %64 : vector<16x16xf32>
    %cst_34 = arith.constant dense<0.000000e+00> : vector<16xf32>
    %66 = vector.multi_reduction <add>, %65, %cst_34 [1] : vector<16x16xf32> to vector<16xf32>
    %67 = vector.shape_cast %66 : vector<16xf32> to vector<16x1xf32>
    %68 = vector.broadcast %67 : vector<16x1xf32> to vector<16x16xf32>
    %69 = arith.divf %65, %68 : vector<16x16xf32>
    %70 = vector.extract_strided_slice %41 {offsets = [0, 40], sizes = [16, 8], strides = [1, 1]} : vector<16x64xf32> to vector<16x8xf32>
    %cst_35 = arith.constant dense<0.000000e+00> : vector<16x8xf32>
    %71 = tpu.matmul %69, %70, %cst_35 {dimension_numbers = #tpu.dot_dimension_numbers<[1], [0], [0], [1], [0, 0, 1, 1], [], []>} : vector<16x16xf32>, vector<16x8xf32>, vector<16x8xf32> -> vector<16x8xf32>
    %72 = vector.extract_strided_slice %40 {offsets = [0, 16], sizes = [16, 8], strides = [1, 1]} : vector<16x32xf32> to vector<16x8xf32>
    %73 = vector.extract_strided_slice %41 {offsets = [0, 16], sizes = [16, 8], strides = [1, 1]} : vector<16x64xf32> to vector<16x8xf32>
    %cst_36 = arith.constant dense<0.000000e+00> : vector<16x16xf32>
    %74 = tpu.matmul %72, %73, %cst_36 {dimension_numbers = #tpu.dot_dimension_numbers<[1], [1], [0], [0], [0, 0, 1, 0], [], []>} : vector<16x8xf32>, vector<16x8xf32>, vector<16x16xf32> -> vector<16x16xf32>
    %75 = arith.addf %74, %0 : vector<16x16xf32>
    %cst_37 = arith.constant dense<0xFF800000> : vector<16xf32>
    %76 = vector.multi_reduction <maximumf>, %75, %cst_37 [1] : vector<16x16xf32> to vector<16xf32>
    %77 = vector.shape_cast %76 : vector<16xf32> to vector<16x1xf32>
    %78 = vector.broadcast %77 : vector<16x1xf32> to vector<16x16xf32>
    %79 = arith.subf %75, %78 : vector<16x16xf32>
    %80 = math.exp %79 : vector<16x16xf32>
    %cst_38 = arith.constant dense<0.000000e+00> : vector<16xf32>
    %81 = vector.multi_reduction <add>, %80, %cst_38 [1] : vector<16x16xf32> to vector<16xf32>
    %82 = vector.shape_cast %81 : vector<16xf32> to vector<16x1xf32>
    %83 = vector.broadcast %82 : vector<16x1xf32> to vector<16x16xf32>
    %84 = arith.divf %80, %83 : vector<16x16xf32>
    %85 = vector.extract_strided_slice %41 {offsets = [0, 48], sizes = [16, 8], strides = [1, 1]} : vector<16x64xf32> to vector<16x8xf32>
    %cst_39 = arith.constant dense<0.000000e+00> : vector<16x8xf32>
    %86 = tpu.matmul %84, %85, %cst_39 {dimension_numbers = #tpu.dot_dimension_numbers<[1], [0], [0], [1], [0, 0, 1, 1], [], []>} : vector<16x16xf32>, vector<16x8xf32>, vector<16x8xf32> -> vector<16x8xf32>
    %87 = vector.extract_strided_slice %40 {offsets = [0, 24], sizes = [16, 8], strides = [1, 1]} : vector<16x32xf32> to vector<16x8xf32>
    %88 = vector.extract_strided_slice %41 {offsets = [0, 24], sizes = [16, 8], strides = [1, 1]} : vector<16x64xf32> to vector<16x8xf32>
    %cst_40 = arith.constant dense<0.000000e+00> : vector<16x16xf32>
    %89 = tpu.matmul %87, %88, %cst_40 {dimension_numbers = #tpu.dot_dimension_numbers<[1], [1], [0], [0], [0, 0, 1, 0], [], []>} : vector<16x8xf32>, vector<16x8xf32>, vector<16x16xf32> -> vector<16x16xf32>
    %90 = arith.addf %89, %0 : vector<16x16xf32>
    %cst_41 = arith.constant dense<0xFF800000> : vector<16xf32>
    %91 = vector.multi_reduction <maximumf>, %90, %cst_41 [1] : vector<16x16xf32> to vector<16xf32>
    %92 = vector.shape_cast %91 : vector<16xf32> to vector<16x1xf32>
    %93 = vector.broadcast %92 : vector<16x1xf32> to vector<16x16xf32>
    %94 = arith.subf %90, %93 : vector<16x16xf32>
    %95 = math.exp %94 : vector<16x16xf32>
    %cst_42 = arith.constant dense<0.000000e+00> : vector<16xf32>
    %96 = vector.multi_reduction <add>, %95, %cst_42 [1] : vector<16x16xf32> to vector<16xf32>
    %97 = vector.shape_cast %96 : vector<16xf32> to vector<16x1xf32>
    %98 = vector.broadcast %97 : vector<16x1xf32> to vector<16x16xf32>
    %99 = arith.divf %95, %98 : vector<16x16xf32>
    %100 = vector.extract_strided_slice %41 {offsets = [0, 56], sizes = [16, 8], strides = [1, 1]} : vector<16x64xf32> to vector<16x8xf32>
    %cst_43 = arith.constant dense<0.000000e+00> : vector<16x8xf32>
    %101 = tpu.matmul %99, %100, %cst_43 {dimension_numbers = #tpu.dot_dimension_numbers<[1], [0], [0], [1], [0, 0, 1, 1], [], []>} : vector<16x16xf32>, vector<16x8xf32>, vector<16x8xf32> -> vector<16x8xf32>
    %102 = tpu.concatenate %56, %71, %86, %101 in 1 : vector<16x8xf32>, vector<16x8xf32>, vector<16x8xf32>, vector<16x8xf32> -> vector<16x32xf32>
    %c0_44 = arith.constant 0 : index
    %c0_45 = arith.constant 0 : index
    %c0_46 = arith.constant 0 : index
    %103 = vector.load %arg7[%c0_44, %c0_45, %c0_46] : memref<2x32x32xf32, #tpu.memory_space<vmem>>, vector<1x32x32xf32>
    %104 = vector.shape_cast %103 : vector<1x32x32xf32> to vector<32x32xf32>
    %cst_47 = arith.constant dense<0.000000e+00> : vector<16x32xf32>
    %105 = tpu.matmul %102, %104, %cst_47 {dimension_numbers = #tpu.dot_dimension_numbers<[1], [0], [0], [1], [0, 0, 1, 1], [], []>} : vector<16x32xf32>, vector<32x32xf32>, vector<16x32xf32> -> vector<16x32xf32>
    %106 = arith.addf %8, %105 : vector<16x32xf32>
    %c0_48 = arith.constant 0 : index
    %c0_49 = arith.constant 0 : index
    %c0_50 = arith.constant 0 : index
    %107 = vector.load %arg8[%c0_48, %c0_49, %c0_50] : memref<2x1x32xf32, #tpu.memory_space<vmem>>, vector<1x1x32xf32>
    %108 = vector.shape_cast %107 : vector<1x1x32xf32> to vector<1x32xf32>
    %109 = vector.broadcast %108 : vector<1x32xf32> to vector<16x32xf32>
    %110 = arith.addf %106, %109 : vector<16x32xf32>
    %c0_51 = arith.constant 0 : index
    %c0_52 = arith.constant 0 : index
    %c0_53 = arith.constant 0 : index
    %111 = vector.load %arg9[%c0_51, %c0_52, %c0_53] : memref<2x1x32xf32, #tpu.memory_space<vmem>>, vector<1x1x32xf32>
    %112 = vector.shape_cast %111 : vector<1x1x32xf32> to vector<1x32xf32>
    %c0_54 = arith.constant 0 : index
    %c0_55 = arith.constant 0 : index
    %c0_56 = arith.constant 0 : index
    %113 = vector.load %arg10[%c0_54, %c0_55, %c0_56] : memref<2x1x32xf32, #tpu.memory_space<vmem>>, vector<1x1x32xf32>
    %114 = vector.shape_cast %113 : vector<1x1x32xf32> to vector<1x32xf32>
    %cst_57 = arith.constant dense<0.000000e+00> : vector<16xf32>
    %115 = vector.multi_reduction <add>, %110, %cst_57 [1] : vector<16x32xf32> to vector<16xf32>
    %116 = vector.shape_cast %115 : vector<16xf32> to vector<16x1xf32>
    %cst_58 = arith.constant 3.200000e+01 : f32
    %117 = vector.broadcast %cst_58 : f32 to vector<16x1xf32>
    %118 = arith.divf %116, %117 : vector<16x1xf32>
    %119 = vector.broadcast %118 : vector<16x1xf32> to vector<16x32xf32>
    %120 = arith.subf %110, %119 : vector<16x32xf32>
    %121 = arith.mulf %120, %120 : vector<16x32xf32>
    %cst_59 = arith.constant dense<0.000000e+00> : vector<16xf32>
    %122 = vector.multi_reduction <add>, %121, %cst_59 [1] : vector<16x32xf32> to vector<16xf32>
    %123 = vector.shape_cast %122 : vector<16xf32> to vector<16x1xf32>
    %cst_60 = arith.constant 3.200000e+01 : f32
    %124 = vector.broadcast %cst_60 : f32 to vector<16x1xf32>
    %125 = arith.divf %123, %124 : vector<16x1xf32>
    %cst_61 = arith.constant 9.99999997E-7 : f32
    %126 = vector.broadcast %cst_61 : f32 to vector<16x1xf32>
    %127 = arith.addf %125, %126 : vector<16x1xf32>
    %128 = math.rsqrt %127 : vector<16x1xf32>
    %129 = vector.broadcast %128 : vector<16x1xf32> to vector<16x32xf32>
    %130 = arith.mulf %120, %129 : vector<16x32xf32>
    %131 = vector.broadcast %112 : vector<1x32xf32> to vector<16x32xf32>
    %132 = arith.mulf %130, %131 : vector<16x32xf32>
    %133 = vector.broadcast %114 : vector<1x32xf32> to vector<16x32xf32>
    %134 = arith.addf %132, %133 : vector<16x32xf32>
    %c0_62 = arith.constant 0 : index
    %c0_63 = arith.constant 0 : index
    %c0_64 = arith.constant 0 : index
    %135 = vector.load %arg11[%c0_62, %c0_63, %c0_64] : memref<2x32x64xf32, #tpu.memory_space<vmem>>, vector<1x32x64xf32>
    %136 = vector.shape_cast %135 : vector<1x32x64xf32> to vector<32x64xf32>
    %cst_65 = arith.constant dense<0.000000e+00> : vector<16x64xf32>
    %137 = tpu.matmul %134, %136, %cst_65 {dimension_numbers = #tpu.dot_dimension_numbers<[1], [0], [0], [1], [0, 0, 1, 1], [], []>} : vector<16x32xf32>, vector<32x64xf32>, vector<16x64xf32> -> vector<16x64xf32>
    %c0_66 = arith.constant 0 : index
    %c0_67 = arith.constant 0 : index
    %c0_68 = arith.constant 0 : index
    %138 = vector.load %arg12[%c0_66, %c0_67, %c0_68] : memref<2x1x64xf32, #tpu.memory_space<vmem>>, vector<1x1x64xf32>
    %139 = vector.shape_cast %138 : vector<1x1x64xf32> to vector<1x64xf32>
    %140 = vector.broadcast %139 : vector<1x64xf32> to vector<16x64xf32>
    %141 = arith.addf %137, %140 : vector<16x64xf32>
    %cst_69 = arith.constant 5.000000e-01 : f32
    %142 = vector.broadcast %cst_69 : f32 to vector<16x64xf32>
    %143 = arith.mulf %142, %141 : vector<16x64xf32>
    %cst_70 = arith.constant 0.707106769 : f32
    %144 = vector.broadcast %cst_70 : f32 to vector<16x64xf32>
    %145 = arith.mulf %141, %144 : vector<16x64xf32>
    %cst_71 = arith.constant 0.000000e+00 : f32
    %146 = vector.broadcast %cst_71 : f32 to vector<16x64xf32>
    %147 = arith.cmpf oge, %145, %146 : vector<16x64xf32>
    %cst_72 = arith.constant 1.000000e+00 : f32
    %cst_73 = arith.constant -1.000000e+00 : f32
    %148 = vector.broadcast %cst_72 : f32 to vector<16x64xf32>
    %149 = vector.broadcast %cst_73 : f32 to vector<16x64xf32>
    %150 = arith.select %147, %148, %149 : vector<16x64xi1>, vector<16x64xf32>
    %151 = math.absf %145 : vector<16x64xf32>
    %cst_74 = arith.constant 0.327591091 : f32
    %152 = vector.broadcast %cst_74 : f32 to vector<16x64xf32>
    %153 = arith.mulf %152, %151 : vector<16x64xf32>
    %cst_75 = arith.constant 1.000000e+00 : f32
    %154 = vector.broadcast %cst_75 : f32 to vector<16x64xf32>
    %155 = arith.addf %154, %153 : vector<16x64xf32>
    %cst_76 = arith.constant 1.000000e+00 : f32
    %156 = vector.broadcast %cst_76 : f32 to vector<16x64xf32>
    %157 = arith.divf %156, %155 : vector<16x64xf32>
    %cst_77 = arith.constant 1.06140542 : f32
    %158 = vector.broadcast %cst_77 : f32 to vector<16x64xf32>
    %159 = arith.mulf %158, %157 : vector<16x64xf32>
    %cst_78 = arith.constant -1.45315206 : f32
    %160 = vector.broadcast %cst_78 : f32 to vector<16x64xf32>
    %161 = arith.addf %159, %160 : vector<16x64xf32>
    %162 = arith.mulf %161, %157 : vector<16x64xf32>
    %cst_79 = arith.constant 1.42141378 : f32
    %163 = vector.broadcast %cst_79 : f32 to vector<16x64xf32>
    %164 = arith.addf %162, %163 : vector<16x64xf32>
    %165 = arith.mulf %164, %157 : vector<16x64xf32>
    %cst_80 = arith.constant -0.284496725 : f32
    %166 = vector.broadcast %cst_80 : f32 to vector<16x64xf32>
    %167 = arith.addf %165, %166 : vector<16x64xf32>
    %168 = arith.mulf %167, %157 : vector<16x64xf32>
    %cst_81 = arith.constant 0.254829586 : f32
    %169 = vector.broadcast %cst_81 : f32 to vector<16x64xf32>
    %170 = arith.addf %168, %169 : vector<16x64xf32>
    %171 = arith.mulf %170, %157 : vector<16x64xf32>
    %cst_82 = arith.constant 0.000000e+00 : f32
    %172 = vector.broadcast %cst_82 : f32 to vector<16x64xf32>
    %173 = arith.subf %172, %151 : vector<16x64xf32>
    %174 = arith.mulf %173, %151 : vector<16x64xf32>
    %175 = math.exp %174 : vector<16x64xf32>
    %176 = arith.mulf %171, %175 : vector<16x64xf32>
    %cst_83 = arith.constant 1.000000e+00 : f32
    %177 = vector.broadcast %cst_83 : f32 to vector<16x64xf32>
    %178 = arith.subf %177, %176 : vector<16x64xf32>
    %179 = arith.mulf %150, %178 : vector<16x64xf32>
    %cst_84 = arith.constant 1.000000e+00 : f32
    %180 = vector.broadcast %cst_84 : f32 to vector<16x64xf32>
    %181 = arith.addf %180, %179 : vector<16x64xf32>
    %182 = arith.mulf %143, %181 : vector<16x64xf32>
    %c0_85 = arith.constant 0 : index
    %c0_86 = arith.constant 0 : index
    %c0_87 = arith.constant 0 : index
    %183 = vector.load %arg13[%c0_85, %c0_86, %c0_87] : memref<2x64x32xf32, #tpu.memory_space<vmem>>, vector<1x64x32xf32>
    %184 = vector.shape_cast %183 : vector<1x64x32xf32> to vector<64x32xf32>
    %cst_88 = arith.constant dense<0.000000e+00> : vector<16x32xf32>
    %185 = tpu.matmul %182, %184, %cst_88 {dimension_numbers = #tpu.dot_dimension_numbers<[1], [0], [0], [1], [0, 0, 1, 1], [], []>} : vector<16x64xf32>, vector<64x32xf32>, vector<16x32xf32> -> vector<16x32xf32>
    %186 = arith.addf %110, %185 : vector<16x32xf32>
    %c0_89 = arith.constant 0 : index
    %c0_90 = arith.constant 0 : index
    %c0_91 = arith.constant 0 : index
    %187 = vector.load %arg14[%c0_89, %c0_90, %c0_91] : memref<2x1x32xf32, #tpu.memory_space<vmem>>, vector<1x1x32xf32>
    %188 = vector.shape_cast %187 : vector<1x1x32xf32> to vector<1x32xf32>
    %189 = vector.broadcast %188 : vector<1x32xf32> to vector<16x32xf32>
    %190 = arith.addf %186, %189 : vector<16x32xf32>
    %c0_92 = arith.constant 0 : index
    %c0_93 = arith.constant 0 : index
    %c0_94 = arith.constant 0 : index
    %191 = vector.load %arg15[%c0_92, %c0_93, %c0_94] : memref<2x1x32xf32, #tpu.memory_space<vmem>>, vector<1x1x32xf32>
    %192 = vector.shape_cast %191 : vector<1x1x32xf32> to vector<1x32xf32>
    %c0_95 = arith.constant 0 : index
    %c0_96 = arith.constant 0 : index
    %c0_97 = arith.constant 0 : index
    %193 = vector.load %arg16[%c0_95, %c0_96, %c0_97] : memref<2x1x32xf32, #tpu.memory_space<vmem>>, vector<1x1x32xf32>
    %194 = vector.shape_cast %193 : vector<1x1x32xf32> to vector<1x32xf32>
    %cst_98 = arith.constant dense<0.000000e+00> : vector<16xf32>
    %195 = vector.multi_reduction <add>, %190, %cst_98 [1] : vector<16x32xf32> to vector<16xf32>
    %196 = vector.shape_cast %195 : vector<16xf32> to vector<16x1xf32>
    %cst_99 = arith.constant 3.200000e+01 : f32
    %197 = vector.broadcast %cst_99 : f32 to vector<16x1xf32>
    %198 = arith.divf %196, %197 : vector<16x1xf32>
    %199 = vector.broadcast %198 : vector<16x1xf32> to vector<16x32xf32>
    %200 = arith.subf %190, %199 : vector<16x32xf32>
    %201 = arith.mulf %200, %200 : vector<16x32xf32>
    %cst_100 = arith.constant dense<0.000000e+00> : vector<16xf32>
    %202 = vector.multi_reduction <add>, %201, %cst_100 [1] : vector<16x32xf32> to vector<16xf32>
    %203 = vector.shape_cast %202 : vector<16xf32> to vector<16x1xf32>
    %cst_101 = arith.constant 3.200000e+01 : f32
    %204 = vector.broadcast %cst_101 : f32 to vector<16x1xf32>
    %205 = arith.divf %203, %204 : vector<16x1xf32>
    %cst_102 = arith.constant 9.99999997E-7 : f32
    %206 = vector.broadcast %cst_102 : f32 to vector<16x1xf32>
    %207 = arith.addf %205, %206 : vector<16x1xf32>
    %208 = math.rsqrt %207 : vector<16x1xf32>
    %209 = vector.broadcast %208 : vector<16x1xf32> to vector<16x32xf32>
    %210 = arith.mulf %200, %209 : vector<16x32xf32>
    %211 = vector.broadcast %192 : vector<1x32xf32> to vector<16x32xf32>
    %212 = arith.mulf %210, %211 : vector<16x32xf32>
    %213 = vector.broadcast %194 : vector<1x32xf32> to vector<16x32xf32>
    %214 = arith.addf %212, %213 : vector<16x32xf32>
    %c1 = arith.constant 1 : index
    %c0_103 = arith.constant 0 : index
    %c0_104 = arith.constant 0 : index
    %215 = vector.load %arg0[%c1, %c0_103, %c0_104] : memref<2x16x192xf32, #tpu.memory_space<vmem>>, vector<1x16x192xf32>
    %216 = vector.shape_cast %215 : vector<1x16x192xf32> to vector<16x192xf32>
    %c1_105 = arith.constant 1 : index
    %c0_106 = arith.constant 0 : index
    %c0_107 = arith.constant 0 : index
    %217 = vector.load %arg1[%c1_105, %c0_106, %c0_107] : memref<2x192x32xf32, #tpu.memory_space<vmem>>, vector<1x192x32xf32>
    %218 = vector.shape_cast %217 : vector<1x192x32xf32> to vector<192x32xf32>
    %cst_108 = arith.constant dense<0.000000e+00> : vector<16x32xf32>
    %219 = tpu.matmul %216, %218, %cst_108 {dimension_numbers = #tpu.dot_dimension_numbers<[1], [0], [0], [1], [0, 0, 1, 1], [], []>} : vector<16x192xf32>, vector<192x32xf32>, vector<16x32xf32> -> vector<16x32xf32>
    %c1_109 = arith.constant 1 : index
    %c0_110 = arith.constant 0 : index
    %c0_111 = arith.constant 0 : index
    %220 = vector.load %arg2[%c1_109, %c0_110, %c0_111] : memref<2x16x32xf32, #tpu.memory_space<vmem>>, vector<1x16x32xf32>
    %221 = vector.shape_cast %220 : vector<1x16x32xf32> to vector<16x32xf32>
    %222 = arith.addf %219, %221 : vector<16x32xf32>
    %c1_112 = arith.constant 1 : index
    %c0_113 = arith.constant 0 : index
    %c0_114 = arith.constant 0 : index
    %223 = vector.load %arg3[%c1_112, %c0_113, %c0_114] : memref<2x1x32xf32, #tpu.memory_space<vmem>>, vector<1x1x32xf32>
    %224 = vector.shape_cast %223 : vector<1x1x32xf32> to vector<1x32xf32>
    %c1_115 = arith.constant 1 : index
    %c0_116 = arith.constant 0 : index
    %c0_117 = arith.constant 0 : index
    %225 = vector.load %arg4[%c1_115, %c0_116, %c0_117] : memref<2x1x32xf32, #tpu.memory_space<vmem>>, vector<1x1x32xf32>
    %226 = vector.shape_cast %225 : vector<1x1x32xf32> to vector<1x32xf32>
    %cst_118 = arith.constant dense<0.000000e+00> : vector<16xf32>
    %227 = vector.multi_reduction <add>, %222, %cst_118 [1] : vector<16x32xf32> to vector<16xf32>
    %228 = vector.shape_cast %227 : vector<16xf32> to vector<16x1xf32>
    %cst_119 = arith.constant 3.200000e+01 : f32
    %229 = vector.broadcast %cst_119 : f32 to vector<16x1xf32>
    %230 = arith.divf %228, %229 : vector<16x1xf32>
    %231 = vector.broadcast %230 : vector<16x1xf32> to vector<16x32xf32>
    %232 = arith.subf %222, %231 : vector<16x32xf32>
    %233 = arith.mulf %232, %232 : vector<16x32xf32>
    %cst_120 = arith.constant dense<0.000000e+00> : vector<16xf32>
    %234 = vector.multi_reduction <add>, %233, %cst_120 [1] : vector<16x32xf32> to vector<16xf32>
    %235 = vector.shape_cast %234 : vector<16xf32> to vector<16x1xf32>
    %cst_121 = arith.constant 3.200000e+01 : f32
    %236 = vector.broadcast %cst_121 : f32 to vector<16x1xf32>
    %237 = arith.divf %235, %236 : vector<16x1xf32>
    %cst_122 = arith.constant 9.99999997E-7 : f32
    %238 = vector.broadcast %cst_122 : f32 to vector<16x1xf32>
    %239 = arith.addf %237, %238 : vector<16x1xf32>
    %240 = math.rsqrt %239 : vector<16x1xf32>
    %241 = vector.broadcast %240 : vector<16x1xf32> to vector<16x32xf32>
    %242 = arith.mulf %232, %241 : vector<16x32xf32>
    %243 = vector.broadcast %224 : vector<1x32xf32> to vector<16x32xf32>
    %244 = arith.mulf %242, %243 : vector<16x32xf32>
    %245 = vector.broadcast %226 : vector<1x32xf32> to vector<16x32xf32>
    %246 = arith.addf %244, %245 : vector<16x32xf32>
    %c1_123 = arith.constant 1 : index
    %c0_124 = arith.constant 0 : index
    %c0_125 = arith.constant 0 : index
    %247 = vector.load %arg5[%c1_123, %c0_124, %c0_125] : memref<2x32x96xf32, #tpu.memory_space<vmem>>, vector<1x32x96xf32>
    %248 = vector.shape_cast %247 : vector<1x32x96xf32> to vector<32x96xf32>
    %cst_126 = arith.constant dense<0.000000e+00> : vector<16x96xf32>
    %249 = tpu.matmul %246, %248, %cst_126 {dimension_numbers = #tpu.dot_dimension_numbers<[1], [0], [0], [1], [0, 0, 1, 1], [], []>} : vector<16x32xf32>, vector<32x96xf32>, vector<16x96xf32> -> vector<16x96xf32>
    %c1_127 = arith.constant 1 : index
    %c0_128 = arith.constant 0 : index
    %c0_129 = arith.constant 0 : index
    %250 = vector.load %arg6[%c1_127, %c0_128, %c0_129] : memref<2x1x96xf32, #tpu.memory_space<vmem>>, vector<1x1x96xf32>
    %251 = vector.shape_cast %250 : vector<1x1x96xf32> to vector<1x96xf32>
    %252 = vector.broadcast %251 : vector<1x96xf32> to vector<16x96xf32>
    %253 = arith.addf %249, %252 : vector<16x96xf32>
    %254 = vector.extract_strided_slice %253 {offsets = [0, 0], sizes = [16, 32], strides = [1, 1]} : vector<16x96xf32> to vector<16x32xf32>
    %255 = vector.extract_strided_slice %253 {offsets = [0, 32], sizes = [16, 64], strides = [1, 1]} : vector<16x96xf32> to vector<16x64xf32>
    %256 = vector.extract_strided_slice %254 {offsets = [0, 0], sizes = [16, 8], strides = [1, 1]} : vector<16x32xf32> to vector<16x8xf32>
    %257 = vector.extract_strided_slice %255 {offsets = [0, 0], sizes = [16, 8], strides = [1, 1]} : vector<16x64xf32> to vector<16x8xf32>
    %cst_130 = arith.constant dense<0.000000e+00> : vector<16x16xf32>
    %258 = tpu.matmul %256, %257, %cst_130 {dimension_numbers = #tpu.dot_dimension_numbers<[1], [1], [0], [0], [0, 0, 1, 0], [], []>} : vector<16x8xf32>, vector<16x8xf32>, vector<16x16xf32> -> vector<16x16xf32>
    %259 = arith.addf %258, %0 : vector<16x16xf32>
    %cst_131 = arith.constant dense<0xFF800000> : vector<16xf32>
    %260 = vector.multi_reduction <maximumf>, %259, %cst_131 [1] : vector<16x16xf32> to vector<16xf32>
    %261 = vector.shape_cast %260 : vector<16xf32> to vector<16x1xf32>
    %262 = vector.broadcast %261 : vector<16x1xf32> to vector<16x16xf32>
    %263 = arith.subf %259, %262 : vector<16x16xf32>
    %264 = math.exp %263 : vector<16x16xf32>
    %cst_132 = arith.constant dense<0.000000e+00> : vector<16xf32>
    %265 = vector.multi_reduction <add>, %264, %cst_132 [1] : vector<16x16xf32> to vector<16xf32>
    %266 = vector.shape_cast %265 : vector<16xf32> to vector<16x1xf32>
    %267 = vector.broadcast %266 : vector<16x1xf32> to vector<16x16xf32>
    %268 = arith.divf %264, %267 : vector<16x16xf32>
    %269 = vector.extract_strided_slice %255 {offsets = [0, 32], sizes = [16, 8], strides = [1, 1]} : vector<16x64xf32> to vector<16x8xf32>
    %cst_133 = arith.constant dense<0.000000e+00> : vector<16x8xf32>
    %270 = tpu.matmul %268, %269, %cst_133 {dimension_numbers = #tpu.dot_dimension_numbers<[1], [0], [0], [1], [0, 0, 1, 1], [], []>} : vector<16x16xf32>, vector<16x8xf32>, vector<16x8xf32> -> vector<16x8xf32>
    %271 = vector.extract_strided_slice %254 {offsets = [0, 8], sizes = [16, 8], strides = [1, 1]} : vector<16x32xf32> to vector<16x8xf32>
    %272 = vector.extract_strided_slice %255 {offsets = [0, 8], sizes = [16, 8], strides = [1, 1]} : vector<16x64xf32> to vector<16x8xf32>
    %cst_134 = arith.constant dense<0.000000e+00> : vector<16x16xf32>
    %273 = tpu.matmul %271, %272, %cst_134 {dimension_numbers = #tpu.dot_dimension_numbers<[1], [1], [0], [0], [0, 0, 1, 0], [], []>} : vector<16x8xf32>, vector<16x8xf32>, vector<16x16xf32> -> vector<16x16xf32>
    %274 = arith.addf %273, %0 : vector<16x16xf32>
    %cst_135 = arith.constant dense<0xFF800000> : vector<16xf32>
    %275 = vector.multi_reduction <maximumf>, %274, %cst_135 [1] : vector<16x16xf32> to vector<16xf32>
    %276 = vector.shape_cast %275 : vector<16xf32> to vector<16x1xf32>
    %277 = vector.broadcast %276 : vector<16x1xf32> to vector<16x16xf32>
    %278 = arith.subf %274, %277 : vector<16x16xf32>
    %279 = math.exp %278 : vector<16x16xf32>
    %cst_136 = arith.constant dense<0.000000e+00> : vector<16xf32>
    %280 = vector.multi_reduction <add>, %279, %cst_136 [1] : vector<16x16xf32> to vector<16xf32>
    %281 = vector.shape_cast %280 : vector<16xf32> to vector<16x1xf32>
    %282 = vector.broadcast %281 : vector<16x1xf32> to vector<16x16xf32>
    %283 = arith.divf %279, %282 : vector<16x16xf32>
    %284 = vector.extract_strided_slice %255 {offsets = [0, 40], sizes = [16, 8], strides = [1, 1]} : vector<16x64xf32> to vector<16x8xf32>
    %cst_137 = arith.constant dense<0.000000e+00> : vector<16x8xf32>
    %285 = tpu.matmul %283, %284, %cst_137 {dimension_numbers = #tpu.dot_dimension_numbers<[1], [0], [0], [1], [0, 0, 1, 1], [], []>} : vector<16x16xf32>, vector<16x8xf32>, vector<16x8xf32> -> vector<16x8xf32>
    %286 = vector.extract_strided_slice %254 {offsets = [0, 16], sizes = [16, 8], strides = [1, 1]} : vector<16x32xf32> to vector<16x8xf32>
    %287 = vector.extract_strided_slice %255 {offsets = [0, 16], sizes = [16, 8], strides = [1, 1]} : vector<16x64xf32> to vector<16x8xf32>
    %cst_138 = arith.constant dense<0.000000e+00> : vector<16x16xf32>
    %288 = tpu.matmul %286, %287, %cst_138 {dimension_numbers = #tpu.dot_dimension_numbers<[1], [1], [0], [0], [0, 0, 1, 0], [], []>} : vector<16x8xf32>, vector<16x8xf32>, vector<16x16xf32> -> vector<16x16xf32>
    %289 = arith.addf %288, %0 : vector<16x16xf32>
    %cst_139 = arith.constant dense<0xFF800000> : vector<16xf32>
    %290 = vector.multi_reduction <maximumf>, %289, %cst_139 [1] : vector<16x16xf32> to vector<16xf32>
    %291 = vector.shape_cast %290 : vector<16xf32> to vector<16x1xf32>
    %292 = vector.broadcast %291 : vector<16x1xf32> to vector<16x16xf32>
    %293 = arith.subf %289, %292 : vector<16x16xf32>
    %294 = math.exp %293 : vector<16x16xf32>
    %cst_140 = arith.constant dense<0.000000e+00> : vector<16xf32>
    %295 = vector.multi_reduction <add>, %294, %cst_140 [1] : vector<16x16xf32> to vector<16xf32>
    %296 = vector.shape_cast %295 : vector<16xf32> to vector<16x1xf32>
    %297 = vector.broadcast %296 : vector<16x1xf32> to vector<16x16xf32>
    %298 = arith.divf %294, %297 : vector<16x16xf32>
    %299 = vector.extract_strided_slice %255 {offsets = [0, 48], sizes = [16, 8], strides = [1, 1]} : vector<16x64xf32> to vector<16x8xf32>
    %cst_141 = arith.constant dense<0.000000e+00> : vector<16x8xf32>
    %300 = tpu.matmul %298, %299, %cst_141 {dimension_numbers = #tpu.dot_dimension_numbers<[1], [0], [0], [1], [0, 0, 1, 1], [], []>} : vector<16x16xf32>, vector<16x8xf32>, vector<16x8xf32> -> vector<16x8xf32>
    %301 = vector.extract_strided_slice %254 {offsets = [0, 24], sizes = [16, 8], strides = [1, 1]} : vector<16x32xf32> to vector<16x8xf32>
    %302 = vector.extract_strided_slice %255 {offsets = [0, 24], sizes = [16, 8], strides = [1, 1]} : vector<16x64xf32> to vector<16x8xf32>
    %cst_142 = arith.constant dense<0.000000e+00> : vector<16x16xf32>
    %303 = tpu.matmul %301, %302, %cst_142 {dimension_numbers = #tpu.dot_dimension_numbers<[1], [1], [0], [0], [0, 0, 1, 0], [], []>} : vector<16x8xf32>, vector<16x8xf32>, vector<16x16xf32> -> vector<16x16xf32>
    %304 = arith.addf %303, %0 : vector<16x16xf32>
    %cst_143 = arith.constant dense<0xFF800000> : vector<16xf32>
    %305 = vector.multi_reduction <maximumf>, %304, %cst_143 [1] : vector<16x16xf32> to vector<16xf32>
    %306 = vector.shape_cast %305 : vector<16xf32> to vector<16x1xf32>
    %307 = vector.broadcast %306 : vector<16x1xf32> to vector<16x16xf32>
    %308 = arith.subf %304, %307 : vector<16x16xf32>
    %309 = math.exp %308 : vector<16x16xf32>
    %cst_144 = arith.constant dense<0.000000e+00> : vector<16xf32>
    %310 = vector.multi_reduction <add>, %309, %cst_144 [1] : vector<16x16xf32> to vector<16xf32>
    %311 = vector.shape_cast %310 : vector<16xf32> to vector<16x1xf32>
    %312 = vector.broadcast %311 : vector<16x1xf32> to vector<16x16xf32>
    %313 = arith.divf %309, %312 : vector<16x16xf32>
    %314 = vector.extract_strided_slice %255 {offsets = [0, 56], sizes = [16, 8], strides = [1, 1]} : vector<16x64xf32> to vector<16x8xf32>
    %cst_145 = arith.constant dense<0.000000e+00> : vector<16x8xf32>
    %315 = tpu.matmul %313, %314, %cst_145 {dimension_numbers = #tpu.dot_dimension_numbers<[1], [0], [0], [1], [0, 0, 1, 1], [], []>} : vector<16x16xf32>, vector<16x8xf32>, vector<16x8xf32> -> vector<16x8xf32>
    %316 = tpu.concatenate %270, %285, %300, %315 in 1 : vector<16x8xf32>, vector<16x8xf32>, vector<16x8xf32>, vector<16x8xf32> -> vector<16x32xf32>
    %c1_146 = arith.constant 1 : index
    %c0_147 = arith.constant 0 : index
    %c0_148 = arith.constant 0 : index
    %317 = vector.load %arg7[%c1_146, %c0_147, %c0_148] : memref<2x32x32xf32, #tpu.memory_space<vmem>>, vector<1x32x32xf32>
    %318 = vector.shape_cast %317 : vector<1x32x32xf32> to vector<32x32xf32>
    %cst_149 = arith.constant dense<0.000000e+00> : vector<16x32xf32>
    %319 = tpu.matmul %316, %318, %cst_149 {dimension_numbers = #tpu.dot_dimension_numbers<[1], [0], [0], [1], [0, 0, 1, 1], [], []>} : vector<16x32xf32>, vector<32x32xf32>, vector<16x32xf32> -> vector<16x32xf32>
    %320 = arith.addf %222, %319 : vector<16x32xf32>
    %c1_150 = arith.constant 1 : index
    %c0_151 = arith.constant 0 : index
    %c0_152 = arith.constant 0 : index
    %321 = vector.load %arg8[%c1_150, %c0_151, %c0_152] : memref<2x1x32xf32, #tpu.memory_space<vmem>>, vector<1x1x32xf32>
    %322 = vector.shape_cast %321 : vector<1x1x32xf32> to vector<1x32xf32>
    %323 = vector.broadcast %322 : vector<1x32xf32> to vector<16x32xf32>
    %324 = arith.addf %320, %323 : vector<16x32xf32>
    %c1_153 = arith.constant 1 : index
    %c0_154 = arith.constant 0 : index
    %c0_155 = arith.constant 0 : index
    %325 = vector.load %arg9[%c1_153, %c0_154, %c0_155] : memref<2x1x32xf32, #tpu.memory_space<vmem>>, vector<1x1x32xf32>
    %326 = vector.shape_cast %325 : vector<1x1x32xf32> to vector<1x32xf32>
    %c1_156 = arith.constant 1 : index
    %c0_157 = arith.constant 0 : index
    %c0_158 = arith.constant 0 : index
    %327 = vector.load %arg10[%c1_156, %c0_157, %c0_158] : memref<2x1x32xf32, #tpu.memory_space<vmem>>, vector<1x1x32xf32>
    %328 = vector.shape_cast %327 : vector<1x1x32xf32> to vector<1x32xf32>
    %cst_159 = arith.constant dense<0.000000e+00> : vector<16xf32>
    %329 = vector.multi_reduction <add>, %324, %cst_159 [1] : vector<16x32xf32> to vector<16xf32>
    %330 = vector.shape_cast %329 : vector<16xf32> to vector<16x1xf32>
    %cst_160 = arith.constant 3.200000e+01 : f32
    %331 = vector.broadcast %cst_160 : f32 to vector<16x1xf32>
    %332 = arith.divf %330, %331 : vector<16x1xf32>
    %333 = vector.broadcast %332 : vector<16x1xf32> to vector<16x32xf32>
    %334 = arith.subf %324, %333 : vector<16x32xf32>
    %335 = arith.mulf %334, %334 : vector<16x32xf32>
    %cst_161 = arith.constant dense<0.000000e+00> : vector<16xf32>
    %336 = vector.multi_reduction <add>, %335, %cst_161 [1] : vector<16x32xf32> to vector<16xf32>
    %337 = vector.shape_cast %336 : vector<16xf32> to vector<16x1xf32>
    %cst_162 = arith.constant 3.200000e+01 : f32
    %338 = vector.broadcast %cst_162 : f32 to vector<16x1xf32>
    %339 = arith.divf %337, %338 : vector<16x1xf32>
    %cst_163 = arith.constant 9.99999997E-7 : f32
    %340 = vector.broadcast %cst_163 : f32 to vector<16x1xf32>
    %341 = arith.addf %339, %340 : vector<16x1xf32>
    %342 = math.rsqrt %341 : vector<16x1xf32>
    %343 = vector.broadcast %342 : vector<16x1xf32> to vector<16x32xf32>
    %344 = arith.mulf %334, %343 : vector<16x32xf32>
    %345 = vector.broadcast %326 : vector<1x32xf32> to vector<16x32xf32>
    %346 = arith.mulf %344, %345 : vector<16x32xf32>
    %347 = vector.broadcast %328 : vector<1x32xf32> to vector<16x32xf32>
    %348 = arith.addf %346, %347 : vector<16x32xf32>
    %c1_164 = arith.constant 1 : index
    %c0_165 = arith.constant 0 : index
    %c0_166 = arith.constant 0 : index
    %349 = vector.load %arg11[%c1_164, %c0_165, %c0_166] : memref<2x32x64xf32, #tpu.memory_space<vmem>>, vector<1x32x64xf32>
    %350 = vector.shape_cast %349 : vector<1x32x64xf32> to vector<32x64xf32>
    %cst_167 = arith.constant dense<0.000000e+00> : vector<16x64xf32>
    %351 = tpu.matmul %348, %350, %cst_167 {dimension_numbers = #tpu.dot_dimension_numbers<[1], [0], [0], [1], [0, 0, 1, 1], [], []>} : vector<16x32xf32>, vector<32x64xf32>, vector<16x64xf32> -> vector<16x64xf32>
    %c1_168 = arith.constant 1 : index
    %c0_169 = arith.constant 0 : index
    %c0_170 = arith.constant 0 : index
    %352 = vector.load %arg12[%c1_168, %c0_169, %c0_170] : memref<2x1x64xf32, #tpu.memory_space<vmem>>, vector<1x1x64xf32>
    %353 = vector.shape_cast %352 : vector<1x1x64xf32> to vector<1x64xf32>
    %354 = vector.broadcast %353 : vector<1x64xf32> to vector<16x64xf32>
    %355 = arith.addf %351, %354 : vector<16x64xf32>
    %cst_171 = arith.constant 5.000000e-01 : f32
    %356 = vector.broadcast %cst_171 : f32 to vector<16x64xf32>
    %357 = arith.mulf %356, %355 : vector<16x64xf32>
    %cst_172 = arith.constant 0.707106769 : f32
    %358 = vector.broadcast %cst_172 : f32 to vector<16x64xf32>
    %359 = arith.mulf %355, %358 : vector<16x64xf32>
    %cst_173 = arith.constant 0.000000e+00 : f32
    %360 = vector.broadcast %cst_173 : f32 to vector<16x64xf32>
    %361 = arith.cmpf oge, %359, %360 : vector<16x64xf32>
    %cst_174 = arith.constant 1.000000e+00 : f32
    %cst_175 = arith.constant -1.000000e+00 : f32
    %362 = vector.broadcast %cst_174 : f32 to vector<16x64xf32>
    %363 = vector.broadcast %cst_175 : f32 to vector<16x64xf32>
    %364 = arith.select %361, %362, %363 : vector<16x64xi1>, vector<16x64xf32>
    %365 = math.absf %359 : vector<16x64xf32>
    %cst_176 = arith.constant 0.327591091 : f32
    %366 = vector.broadcast %cst_176 : f32 to vector<16x64xf32>
    %367 = arith.mulf %366, %365 : vector<16x64xf32>
    %cst_177 = arith.constant 1.000000e+00 : f32
    %368 = vector.broadcast %cst_177 : f32 to vector<16x64xf32>
    %369 = arith.addf %368, %367 : vector<16x64xf32>
    %cst_178 = arith.constant 1.000000e+00 : f32
    %370 = vector.broadcast %cst_178 : f32 to vector<16x64xf32>
    %371 = arith.divf %370, %369 : vector<16x64xf32>
    %cst_179 = arith.constant 1.06140542 : f32
    %372 = vector.broadcast %cst_179 : f32 to vector<16x64xf32>
    %373 = arith.mulf %372, %371 : vector<16x64xf32>
    %cst_180 = arith.constant -1.45315206 : f32
    %374 = vector.broadcast %cst_180 : f32 to vector<16x64xf32>
    %375 = arith.addf %373, %374 : vector<16x64xf32>
    %376 = arith.mulf %375, %371 : vector<16x64xf32>
    %cst_181 = arith.constant 1.42141378 : f32
    %377 = vector.broadcast %cst_181 : f32 to vector<16x64xf32>
    %378 = arith.addf %376, %377 : vector<16x64xf32>
    %379 = arith.mulf %378, %371 : vector<16x64xf32>
    %cst_182 = arith.constant -0.284496725 : f32
    %380 = vector.broadcast %cst_182 : f32 to vector<16x64xf32>
    %381 = arith.addf %379, %380 : vector<16x64xf32>
    %382 = arith.mulf %381, %371 : vector<16x64xf32>
    %cst_183 = arith.constant 0.254829586 : f32
    %383 = vector.broadcast %cst_183 : f32 to vector<16x64xf32>
    %384 = arith.addf %382, %383 : vector<16x64xf32>
    %385 = arith.mulf %384, %371 : vector<16x64xf32>
    %cst_184 = arith.constant 0.000000e+00 : f32
    %386 = vector.broadcast %cst_184 : f32 to vector<16x64xf32>
    %387 = arith.subf %386, %365 : vector<16x64xf32>
    %388 = arith.mulf %387, %365 : vector<16x64xf32>
    %389 = math.exp %388 : vector<16x64xf32>
    %390 = arith.mulf %385, %389 : vector<16x64xf32>
    %cst_185 = arith.constant 1.000000e+00 : f32
    %391 = vector.broadcast %cst_185 : f32 to vector<16x64xf32>
    %392 = arith.subf %391, %390 : vector<16x64xf32>
    %393 = arith.mulf %364, %392 : vector<16x64xf32>
    %cst_186 = arith.constant 1.000000e+00 : f32
    %394 = vector.broadcast %cst_186 : f32 to vector<16x64xf32>
    %395 = arith.addf %394, %393 : vector<16x64xf32>
    %396 = arith.mulf %357, %395 : vector<16x64xf32>
    %c1_187 = arith.constant 1 : index
    %c0_188 = arith.constant 0 : index
    %c0_189 = arith.constant 0 : index
    %397 = vector.load %arg13[%c1_187, %c0_188, %c0_189] : memref<2x64x32xf32, #tpu.memory_space<vmem>>, vector<1x64x32xf32>
    %398 = vector.shape_cast %397 : vector<1x64x32xf32> to vector<64x32xf32>
    %cst_190 = arith.constant dense<0.000000e+00> : vector<16x32xf32>
    %399 = tpu.matmul %396, %398, %cst_190 {dimension_numbers = #tpu.dot_dimension_numbers<[1], [0], [0], [1], [0, 0, 1, 1], [], []>} : vector<16x64xf32>, vector<64x32xf32>, vector<16x32xf32> -> vector<16x32xf32>
    %400 = arith.addf %324, %399 : vector<16x32xf32>
    %c1_191 = arith.constant 1 : index
    %c0_192 = arith.constant 0 : index
    %c0_193 = arith.constant 0 : index
    %401 = vector.load %arg14[%c1_191, %c0_192, %c0_193] : memref<2x1x32xf32, #tpu.memory_space<vmem>>, vector<1x1x32xf32>
    %402 = vector.shape_cast %401 : vector<1x1x32xf32> to vector<1x32xf32>
    %403 = vector.broadcast %402 : vector<1x32xf32> to vector<16x32xf32>
    %404 = arith.addf %400, %403 : vector<16x32xf32>
    %c1_194 = arith.constant 1 : index
    %c0_195 = arith.constant 0 : index
    %c0_196 = arith.constant 0 : index
    %405 = vector.load %arg15[%c1_194, %c0_195, %c0_196] : memref<2x1x32xf32, #tpu.memory_space<vmem>>, vector<1x1x32xf32>
    %406 = vector.shape_cast %405 : vector<1x1x32xf32> to vector<1x32xf32>
    %c1_197 = arith.constant 1 : index
    %c0_198 = arith.constant 0 : index
    %c0_199 = arith.constant 0 : index
    %407 = vector.load %arg16[%c1_197, %c0_198, %c0_199] : memref<2x1x32xf32, #tpu.memory_space<vmem>>, vector<1x1x32xf32>
    %408 = vector.shape_cast %407 : vector<1x1x32xf32> to vector<1x32xf32>
    %cst_200 = arith.constant dense<0.000000e+00> : vector<16xf32>
    %409 = vector.multi_reduction <add>, %404, %cst_200 [1] : vector<16x32xf32> to vector<16xf32>
    %410 = vector.shape_cast %409 : vector<16xf32> to vector<16x1xf32>
    %cst_201 = arith.constant 3.200000e+01 : f32
    %411 = vector.broadcast %cst_201 : f32 to vector<16x1xf32>
    %412 = arith.divf %410, %411 : vector<16x1xf32>
    %413 = vector.broadcast %412 : vector<16x1xf32> to vector<16x32xf32>
    %414 = arith.subf %404, %413 : vector<16x32xf32>
    %415 = arith.mulf %414, %414 : vector<16x32xf32>
    %cst_202 = arith.constant dense<0.000000e+00> : vector<16xf32>
    %416 = vector.multi_reduction <add>, %415, %cst_202 [1] : vector<16x32xf32> to vector<16xf32>
    %417 = vector.shape_cast %416 : vector<16xf32> to vector<16x1xf32>
    %cst_203 = arith.constant 3.200000e+01 : f32
    %418 = vector.broadcast %cst_203 : f32 to vector<16x1xf32>
    %419 = arith.divf %417, %418 : vector<16x1xf32>
    %cst_204 = arith.constant 9.99999997E-7 : f32
    %420 = vector.broadcast %cst_204 : f32 to vector<16x1xf32>
    %421 = arith.addf %419, %420 : vector<16x1xf32>
    %422 = math.rsqrt %421 : vector<16x1xf32>
    %423 = vector.broadcast %422 : vector<16x1xf32> to vector<16x32xf32>
    %424 = arith.mulf %414, %423 : vector<16x32xf32>
    %425 = vector.broadcast %406 : vector<1x32xf32> to vector<16x32xf32>
    %426 = arith.mulf %424, %425 : vector<16x32xf32>
    %427 = vector.broadcast %408 : vector<1x32xf32> to vector<16x32xf32>
    %428 = arith.addf %426, %427 : vector<16x32xf32>
    %c0_205 = arith.constant 0 : index
    %c0_206 = arith.constant 0 : index
    %429 = vector.load %arg19[%c0_205, %c0_206] : memref<32x32xf32, #tpu.memory_space<vmem>>, vector<32x32xf32>
    %cst_207 = arith.constant dense<0.000000e+00> : vector<16x32xf32>
    %430 = tpu.matmul %214, %429, %cst_207 {dimension_numbers = #tpu.dot_dimension_numbers<[1], [0], [0], [1], [0, 0, 1, 1], [], []>} : vector<16x32xf32>, vector<32x32xf32>, vector<16x32xf32> -> vector<16x32xf32>
    %c0_208 = arith.constant 0 : index
    %c0_209 = arith.constant 0 : index
    %431 = vector.load %arg20[%c0_208, %c0_209] : memref<1x32xf32, #tpu.memory_space<vmem>>, vector<1x32xf32>
    %432 = vector.broadcast %431 : vector<1x32xf32> to vector<16x32xf32>
    %433 = arith.addf %430, %432 : vector<16x32xf32>
    %c0_210 = arith.constant 0 : index
    %c0_211 = arith.constant 0 : index
    %434 = vector.load %arg21[%c0_210, %c0_211] : memref<32x64xf32, #tpu.memory_space<vmem>>, vector<32x64xf32>
    %cst_212 = arith.constant dense<0.000000e+00> : vector<16x64xf32>
    %435 = tpu.matmul %428, %434, %cst_212 {dimension_numbers = #tpu.dot_dimension_numbers<[1], [0], [0], [1], [0, 0, 1, 1], [], []>} : vector<16x32xf32>, vector<32x64xf32>, vector<16x64xf32> -> vector<16x64xf32>
    %c0_213 = arith.constant 0 : index
    %c0_214 = arith.constant 0 : index
    %436 = vector.load %arg22[%c0_213, %c0_214] : memref<1x64xf32, #tpu.memory_space<vmem>>, vector<1x64xf32>
    %437 = vector.broadcast %436 : vector<1x64xf32> to vector<16x64xf32>
    %438 = arith.addf %435, %437 : vector<16x64xf32>
    %439 = vector.extract_strided_slice %433 {offsets = [0, 0], sizes = [16, 8], strides = [1, 1]} : vector<16x32xf32> to vector<16x8xf32>
    %440 = vector.extract_strided_slice %438 {offsets = [0, 0], sizes = [16, 8], strides = [1, 1]} : vector<16x64xf32> to vector<16x8xf32>
    %cst_215 = arith.constant dense<0.000000e+00> : vector<16x16xf32>
    %441 = tpu.matmul %439, %440, %cst_215 {dimension_numbers = #tpu.dot_dimension_numbers<[1], [1], [0], [0], [0, 0, 1, 0], [], []>} : vector<16x8xf32>, vector<16x8xf32>, vector<16x16xf32> -> vector<16x16xf32>
    %442 = arith.addf %441, %0 : vector<16x16xf32>
    %cst_216 = arith.constant dense<0xFF800000> : vector<16xf32>
    %443 = vector.multi_reduction <maximumf>, %442, %cst_216 [1] : vector<16x16xf32> to vector<16xf32>
    %444 = vector.shape_cast %443 : vector<16xf32> to vector<16x1xf32>
    %445 = vector.broadcast %444 : vector<16x1xf32> to vector<16x16xf32>
    %446 = arith.subf %442, %445 : vector<16x16xf32>
    %447 = math.exp %446 : vector<16x16xf32>
    %cst_217 = arith.constant dense<0.000000e+00> : vector<16xf32>
    %448 = vector.multi_reduction <add>, %447, %cst_217 [1] : vector<16x16xf32> to vector<16xf32>
    %449 = vector.shape_cast %448 : vector<16xf32> to vector<16x1xf32>
    %450 = vector.broadcast %449 : vector<16x1xf32> to vector<16x16xf32>
    %451 = arith.divf %447, %450 : vector<16x16xf32>
    %452 = vector.extract_strided_slice %438 {offsets = [0, 32], sizes = [16, 8], strides = [1, 1]} : vector<16x64xf32> to vector<16x8xf32>
    %cst_218 = arith.constant dense<0.000000e+00> : vector<16x8xf32>
    %453 = tpu.matmul %451, %452, %cst_218 {dimension_numbers = #tpu.dot_dimension_numbers<[1], [0], [0], [1], [0, 0, 1, 1], [], []>} : vector<16x16xf32>, vector<16x8xf32>, vector<16x8xf32> -> vector<16x8xf32>
    %454 = vector.extract_strided_slice %433 {offsets = [0, 8], sizes = [16, 8], strides = [1, 1]} : vector<16x32xf32> to vector<16x8xf32>
    %455 = vector.extract_strided_slice %438 {offsets = [0, 8], sizes = [16, 8], strides = [1, 1]} : vector<16x64xf32> to vector<16x8xf32>
    %cst_219 = arith.constant dense<0.000000e+00> : vector<16x16xf32>
    %456 = tpu.matmul %454, %455, %cst_219 {dimension_numbers = #tpu.dot_dimension_numbers<[1], [1], [0], [0], [0, 0, 1, 0], [], []>} : vector<16x8xf32>, vector<16x8xf32>, vector<16x16xf32> -> vector<16x16xf32>
    %457 = arith.addf %456, %0 : vector<16x16xf32>
    %cst_220 = arith.constant dense<0xFF800000> : vector<16xf32>
    %458 = vector.multi_reduction <maximumf>, %457, %cst_220 [1] : vector<16x16xf32> to vector<16xf32>
    %459 = vector.shape_cast %458 : vector<16xf32> to vector<16x1xf32>
    %460 = vector.broadcast %459 : vector<16x1xf32> to vector<16x16xf32>
    %461 = arith.subf %457, %460 : vector<16x16xf32>
    %462 = math.exp %461 : vector<16x16xf32>
    %cst_221 = arith.constant dense<0.000000e+00> : vector<16xf32>
    %463 = vector.multi_reduction <add>, %462, %cst_221 [1] : vector<16x16xf32> to vector<16xf32>
    %464 = vector.shape_cast %463 : vector<16xf32> to vector<16x1xf32>
    %465 = vector.broadcast %464 : vector<16x1xf32> to vector<16x16xf32>
    %466 = arith.divf %462, %465 : vector<16x16xf32>
    %467 = vector.extract_strided_slice %438 {offsets = [0, 40], sizes = [16, 8], strides = [1, 1]} : vector<16x64xf32> to vector<16x8xf32>
    %cst_222 = arith.constant dense<0.000000e+00> : vector<16x8xf32>
    %468 = tpu.matmul %466, %467, %cst_222 {dimension_numbers = #tpu.dot_dimension_numbers<[1], [0], [0], [1], [0, 0, 1, 1], [], []>} : vector<16x16xf32>, vector<16x8xf32>, vector<16x8xf32> -> vector<16x8xf32>
    %469 = vector.extract_strided_slice %433 {offsets = [0, 16], sizes = [16, 8], strides = [1, 1]} : vector<16x32xf32> to vector<16x8xf32>
    %470 = vector.extract_strided_slice %438 {offsets = [0, 16], sizes = [16, 8], strides = [1, 1]} : vector<16x64xf32> to vector<16x8xf32>
    %cst_223 = arith.constant dense<0.000000e+00> : vector<16x16xf32>
    %471 = tpu.matmul %469, %470, %cst_223 {dimension_numbers = #tpu.dot_dimension_numbers<[1], [1], [0], [0], [0, 0, 1, 0], [], []>} : vector<16x8xf32>, vector<16x8xf32>, vector<16x16xf32> -> vector<16x16xf32>
    %472 = arith.addf %471, %0 : vector<16x16xf32>
    %cst_224 = arith.constant dense<0xFF800000> : vector<16xf32>
    %473 = vector.multi_reduction <maximumf>, %472, %cst_224 [1] : vector<16x16xf32> to vector<16xf32>
    %474 = vector.shape_cast %473 : vector<16xf32> to vector<16x1xf32>
    %475 = vector.broadcast %474 : vector<16x1xf32> to vector<16x16xf32>
    %476 = arith.subf %472, %475 : vector<16x16xf32>
    %477 = math.exp %476 : vector<16x16xf32>
    %cst_225 = arith.constant dense<0.000000e+00> : vector<16xf32>
    %478 = vector.multi_reduction <add>, %477, %cst_225 [1] : vector<16x16xf32> to vector<16xf32>
    %479 = vector.shape_cast %478 : vector<16xf32> to vector<16x1xf32>
    %480 = vector.broadcast %479 : vector<16x1xf32> to vector<16x16xf32>
    %481 = arith.divf %477, %480 : vector<16x16xf32>
    %482 = vector.extract_strided_slice %438 {offsets = [0, 48], sizes = [16, 8], strides = [1, 1]} : vector<16x64xf32> to vector<16x8xf32>
    %cst_226 = arith.constant dense<0.000000e+00> : vector<16x8xf32>
    %483 = tpu.matmul %481, %482, %cst_226 {dimension_numbers = #tpu.dot_dimension_numbers<[1], [0], [0], [1], [0, 0, 1, 1], [], []>} : vector<16x16xf32>, vector<16x8xf32>, vector<16x8xf32> -> vector<16x8xf32>
    %484 = vector.extract_strided_slice %433 {offsets = [0, 24], sizes = [16, 8], strides = [1, 1]} : vector<16x32xf32> to vector<16x8xf32>
    %485 = vector.extract_strided_slice %438 {offsets = [0, 24], sizes = [16, 8], strides = [1, 1]} : vector<16x64xf32> to vector<16x8xf32>
    %cst_227 = arith.constant dense<0.000000e+00> : vector<16x16xf32>
    %486 = tpu.matmul %484, %485, %cst_227 {dimension_numbers = #tpu.dot_dimension_numbers<[1], [1], [0], [0], [0, 0, 1, 0], [], []>} : vector<16x8xf32>, vector<16x8xf32>, vector<16x16xf32> -> vector<16x16xf32>
    %487 = arith.addf %486, %0 : vector<16x16xf32>
    %cst_228 = arith.constant dense<0xFF800000> : vector<16xf32>
    %488 = vector.multi_reduction <maximumf>, %487, %cst_228 [1] : vector<16x16xf32> to vector<16xf32>
    %489 = vector.shape_cast %488 : vector<16xf32> to vector<16x1xf32>
    %490 = vector.broadcast %489 : vector<16x1xf32> to vector<16x16xf32>
    %491 = arith.subf %487, %490 : vector<16x16xf32>
    %492 = math.exp %491 : vector<16x16xf32>
    %cst_229 = arith.constant dense<0.000000e+00> : vector<16xf32>
    %493 = vector.multi_reduction <add>, %492, %cst_229 [1] : vector<16x16xf32> to vector<16xf32>
    %494 = vector.shape_cast %493 : vector<16xf32> to vector<16x1xf32>
    %495 = vector.broadcast %494 : vector<16x1xf32> to vector<16x16xf32>
    %496 = arith.divf %492, %495 : vector<16x16xf32>
    %497 = vector.extract_strided_slice %438 {offsets = [0, 56], sizes = [16, 8], strides = [1, 1]} : vector<16x64xf32> to vector<16x8xf32>
    %cst_230 = arith.constant dense<0.000000e+00> : vector<16x8xf32>
    %498 = tpu.matmul %496, %497, %cst_230 {dimension_numbers = #tpu.dot_dimension_numbers<[1], [0], [0], [1], [0, 0, 1, 1], [], []>} : vector<16x16xf32>, vector<16x8xf32>, vector<16x8xf32> -> vector<16x8xf32>
    %499 = tpu.concatenate %453, %468, %483, %498 in 1 : vector<16x8xf32>, vector<16x8xf32>, vector<16x8xf32>, vector<16x8xf32> -> vector<16x32xf32>
    %c0_231 = arith.constant 0 : index
    %c0_232 = arith.constant 0 : index
    %500 = vector.load %arg23[%c0_231, %c0_232] : memref<32x32xf32, #tpu.memory_space<vmem>>, vector<32x32xf32>
    %cst_233 = arith.constant dense<0.000000e+00> : vector<16x32xf32>
    %501 = tpu.matmul %499, %500, %cst_233 {dimension_numbers = #tpu.dot_dimension_numbers<[1], [0], [0], [1], [0, 0, 1, 1], [], []>} : vector<16x32xf32>, vector<32x32xf32>, vector<16x32xf32> -> vector<16x32xf32>
    %c0_234 = arith.constant 0 : index
    %c0_235 = arith.constant 0 : index
    %502 = vector.load %arg24[%c0_234, %c0_235] : memref<1x32xf32, #tpu.memory_space<vmem>>, vector<1x32xf32>
    %503 = vector.broadcast %502 : vector<1x32xf32> to vector<16x32xf32>
    %504 = arith.addf %501, %503 : vector<16x32xf32>
    %c0_236 = arith.constant 0 : index
    %c0_237 = arith.constant 0 : index
    %505 = vector.load %arg25[%c0_236, %c0_237] : memref<32x32xf32, #tpu.memory_space<vmem>>, vector<32x32xf32>
    %cst_238 = arith.constant dense<0.000000e+00> : vector<16x32xf32>
    %506 = tpu.matmul %428, %505, %cst_238 {dimension_numbers = #tpu.dot_dimension_numbers<[1], [0], [0], [1], [0, 0, 1, 1], [], []>} : vector<16x32xf32>, vector<32x32xf32>, vector<16x32xf32> -> vector<16x32xf32>
    %c0_239 = arith.constant 0 : index
    %c0_240 = arith.constant 0 : index
    %507 = vector.load %arg26[%c0_239, %c0_240] : memref<1x32xf32, #tpu.memory_space<vmem>>, vector<1x32xf32>
    %508 = vector.broadcast %507 : vector<1x32xf32> to vector<16x32xf32>
    %509 = arith.addf %506, %508 : vector<16x32xf32>
    %510 = vector.extract_strided_slice %509 {offsets = [0, 0], sizes = [1, 32], strides = [1, 1]} : vector<16x32xf32> to vector<1x32xf32>
    %511 = vector.extract_strided_slice %509 {offsets = [8, 0], sizes = [1, 32], strides = [1, 1]} : vector<16x32xf32> to vector<1x32xf32>
    %512 = tpu.concatenate %510, %511 in 0 : vector<1x32xf32>, vector<1x32xf32> -> vector<2x32xf32>
    %c0_241 = arith.constant 0 : index
    %c0_242 = arith.constant 0 : index
    %513 = vector.load %arg27[%c0_241, %c0_242] : memref<32x64xf32, #tpu.memory_space<vmem>>, vector<32x64xf32>
    %cst_243 = arith.constant dense<0.000000e+00> : vector<16x64xf32>
    %514 = tpu.matmul %504, %513, %cst_243 {dimension_numbers = #tpu.dot_dimension_numbers<[1], [0], [0], [1], [0, 0, 1, 1], [], []>} : vector<16x32xf32>, vector<32x64xf32>, vector<16x64xf32> -> vector<16x64xf32>
    %c0_244 = arith.constant 0 : index
    %c0_245 = arith.constant 0 : index
    %515 = vector.load %arg28[%c0_244, %c0_245] : memref<1x64xf32, #tpu.memory_space<vmem>>, vector<1x64xf32>
    %516 = vector.broadcast %515 : vector<1x64xf32> to vector<16x64xf32>
    %517 = arith.addf %514, %516 : vector<16x64xf32>
    %c0_246 = arith.constant 0 : index
    %c0_247 = arith.constant 0 : index
    %518 = vector.load %arg18[%c0_246, %c0_247] : memref<2x16xf32, #tpu.memory_space<vmem>>, vector<2x16xf32>
    %519 = vector.extract_strided_slice %512 {offsets = [0, 0], sizes = [2, 8], strides = [1, 1]} : vector<2x32xf32> to vector<2x8xf32>
    %520 = vector.extract_strided_slice %517 {offsets = [0, 0], sizes = [16, 8], strides = [1, 1]} : vector<16x64xf32> to vector<16x8xf32>
    %cst_248 = arith.constant dense<0.000000e+00> : vector<2x16xf32>
    %521 = tpu.matmul %519, %520, %cst_248 {dimension_numbers = #tpu.dot_dimension_numbers<[1], [1], [0], [0], [0, 0, 1, 0], [], []>} : vector<2x8xf32>, vector<16x8xf32>, vector<2x16xf32> -> vector<2x16xf32>
    %522 = arith.addf %521, %518 : vector<2x16xf32>
    %cst_249 = arith.constant dense<0xFF800000> : vector<2xf32>
    %523 = vector.multi_reduction <maximumf>, %522, %cst_249 [1] : vector<2x16xf32> to vector<2xf32>
    %524 = vector.shape_cast %523 : vector<2xf32> to vector<2x1xf32>
    %525 = vector.broadcast %524 : vector<2x1xf32> to vector<2x16xf32>
    %526 = arith.subf %522, %525 : vector<2x16xf32>
    %527 = math.exp %526 : vector<2x16xf32>
    %cst_250 = arith.constant dense<0.000000e+00> : vector<2xf32>
    %528 = vector.multi_reduction <add>, %527, %cst_250 [1] : vector<2x16xf32> to vector<2xf32>
    %529 = vector.shape_cast %528 : vector<2xf32> to vector<2x1xf32>
    %530 = vector.broadcast %529 : vector<2x1xf32> to vector<2x16xf32>
    %531 = arith.divf %527, %530 : vector<2x16xf32>
    %532 = vector.extract_strided_slice %517 {offsets = [0, 32], sizes = [16, 8], strides = [1, 1]} : vector<16x64xf32> to vector<16x8xf32>
    %cst_251 = arith.constant dense<0.000000e+00> : vector<2x8xf32>
    %533 = tpu.matmul %531, %532, %cst_251 {dimension_numbers = #tpu.dot_dimension_numbers<[1], [0], [0], [1], [0, 0, 1, 1], [], []>} : vector<2x16xf32>, vector<16x8xf32>, vector<2x8xf32> -> vector<2x8xf32>
    %534 = vector.extract_strided_slice %512 {offsets = [0, 8], sizes = [2, 8], strides = [1, 1]} : vector<2x32xf32> to vector<2x8xf32>
    %535 = vector.extract_strided_slice %517 {offsets = [0, 8], sizes = [16, 8], strides = [1, 1]} : vector<16x64xf32> to vector<16x8xf32>
    %cst_252 = arith.constant dense<0.000000e+00> : vector<2x16xf32>
    %536 = tpu.matmul %534, %535, %cst_252 {dimension_numbers = #tpu.dot_dimension_numbers<[1], [1], [0], [0], [0, 0, 1, 0], [], []>} : vector<2x8xf32>, vector<16x8xf32>, vector<2x16xf32> -> vector<2x16xf32>
    %537 = arith.addf %536, %518 : vector<2x16xf32>
    %cst_253 = arith.constant dense<0xFF800000> : vector<2xf32>
    %538 = vector.multi_reduction <maximumf>, %537, %cst_253 [1] : vector<2x16xf32> to vector<2xf32>
    %539 = vector.shape_cast %538 : vector<2xf32> to vector<2x1xf32>
    %540 = vector.broadcast %539 : vector<2x1xf32> to vector<2x16xf32>
    %541 = arith.subf %537, %540 : vector<2x16xf32>
    %542 = math.exp %541 : vector<2x16xf32>
    %cst_254 = arith.constant dense<0.000000e+00> : vector<2xf32>
    %543 = vector.multi_reduction <add>, %542, %cst_254 [1] : vector<2x16xf32> to vector<2xf32>
    %544 = vector.shape_cast %543 : vector<2xf32> to vector<2x1xf32>
    %545 = vector.broadcast %544 : vector<2x1xf32> to vector<2x16xf32>
    %546 = arith.divf %542, %545 : vector<2x16xf32>
    %547 = vector.extract_strided_slice %517 {offsets = [0, 40], sizes = [16, 8], strides = [1, 1]} : vector<16x64xf32> to vector<16x8xf32>
    %cst_255 = arith.constant dense<0.000000e+00> : vector<2x8xf32>
    %548 = tpu.matmul %546, %547, %cst_255 {dimension_numbers = #tpu.dot_dimension_numbers<[1], [0], [0], [1], [0, 0, 1, 1], [], []>} : vector<2x16xf32>, vector<16x8xf32>, vector<2x8xf32> -> vector<2x8xf32>
    %549 = vector.extract_strided_slice %512 {offsets = [0, 16], sizes = [2, 8], strides = [1, 1]} : vector<2x32xf32> to vector<2x8xf32>
    %550 = vector.extract_strided_slice %517 {offsets = [0, 16], sizes = [16, 8], strides = [1, 1]} : vector<16x64xf32> to vector<16x8xf32>
    %cst_256 = arith.constant dense<0.000000e+00> : vector<2x16xf32>
    %551 = tpu.matmul %549, %550, %cst_256 {dimension_numbers = #tpu.dot_dimension_numbers<[1], [1], [0], [0], [0, 0, 1, 0], [], []>} : vector<2x8xf32>, vector<16x8xf32>, vector<2x16xf32> -> vector<2x16xf32>
    %552 = arith.addf %551, %518 : vector<2x16xf32>
    %cst_257 = arith.constant dense<0xFF800000> : vector<2xf32>
    %553 = vector.multi_reduction <maximumf>, %552, %cst_257 [1] : vector<2x16xf32> to vector<2xf32>
    %554 = vector.shape_cast %553 : vector<2xf32> to vector<2x1xf32>
    %555 = vector.broadcast %554 : vector<2x1xf32> to vector<2x16xf32>
    %556 = arith.subf %552, %555 : vector<2x16xf32>
    %557 = math.exp %556 : vector<2x16xf32>
    %cst_258 = arith.constant dense<0.000000e+00> : vector<2xf32>
    %558 = vector.multi_reduction <add>, %557, %cst_258 [1] : vector<2x16xf32> to vector<2xf32>
    %559 = vector.shape_cast %558 : vector<2xf32> to vector<2x1xf32>
    %560 = vector.broadcast %559 : vector<2x1xf32> to vector<2x16xf32>
    %561 = arith.divf %557, %560 : vector<2x16xf32>
    %562 = vector.extract_strided_slice %517 {offsets = [0, 48], sizes = [16, 8], strides = [1, 1]} : vector<16x64xf32> to vector<16x8xf32>
    %cst_259 = arith.constant dense<0.000000e+00> : vector<2x8xf32>
    %563 = tpu.matmul %561, %562, %cst_259 {dimension_numbers = #tpu.dot_dimension_numbers<[1], [0], [0], [1], [0, 0, 1, 1], [], []>} : vector<2x16xf32>, vector<16x8xf32>, vector<2x8xf32> -> vector<2x8xf32>
    %564 = vector.extract_strided_slice %512 {offsets = [0, 24], sizes = [2, 8], strides = [1, 1]} : vector<2x32xf32> to vector<2x8xf32>
    %565 = vector.extract_strided_slice %517 {offsets = [0, 24], sizes = [16, 8], strides = [1, 1]} : vector<16x64xf32> to vector<16x8xf32>
    %cst_260 = arith.constant dense<0.000000e+00> : vector<2x16xf32>
    %566 = tpu.matmul %564, %565, %cst_260 {dimension_numbers = #tpu.dot_dimension_numbers<[1], [1], [0], [0], [0, 0, 1, 0], [], []>} : vector<2x8xf32>, vector<16x8xf32>, vector<2x16xf32> -> vector<2x16xf32>
    %567 = arith.addf %566, %518 : vector<2x16xf32>
    %cst_261 = arith.constant dense<0xFF800000> : vector<2xf32>
    %568 = vector.multi_reduction <maximumf>, %567, %cst_261 [1] : vector<2x16xf32> to vector<2xf32>
    %569 = vector.shape_cast %568 : vector<2xf32> to vector<2x1xf32>
    %570 = vector.broadcast %569 : vector<2x1xf32> to vector<2x16xf32>
    %571 = arith.subf %567, %570 : vector<2x16xf32>
    %572 = math.exp %571 : vector<2x16xf32>
    %cst_262 = arith.constant dense<0.000000e+00> : vector<2xf32>
    %573 = vector.multi_reduction <add>, %572, %cst_262 [1] : vector<2x16xf32> to vector<2xf32>
    %574 = vector.shape_cast %573 : vector<2xf32> to vector<2x1xf32>
    %575 = vector.broadcast %574 : vector<2x1xf32> to vector<2x16xf32>
    %576 = arith.divf %572, %575 : vector<2x16xf32>
    %577 = vector.extract_strided_slice %517 {offsets = [0, 56], sizes = [16, 8], strides = [1, 1]} : vector<16x64xf32> to vector<16x8xf32>
    %cst_263 = arith.constant dense<0.000000e+00> : vector<2x8xf32>
    %578 = tpu.matmul %576, %577, %cst_263 {dimension_numbers = #tpu.dot_dimension_numbers<[1], [0], [0], [1], [0, 0, 1, 1], [], []>} : vector<2x16xf32>, vector<16x8xf32>, vector<2x8xf32> -> vector<2x8xf32>
    %579 = tpu.concatenate %533, %548, %563, %578 in 1 : vector<2x8xf32>, vector<2x8xf32>, vector<2x8xf32>, vector<2x8xf32> -> vector<2x32xf32>
    %c0_264 = arith.constant 0 : index
    %c0_265 = arith.constant 0 : index
    %580 = vector.load %arg29[%c0_264, %c0_265] : memref<32x32xf32, #tpu.memory_space<vmem>>, vector<32x32xf32>
    %cst_266 = arith.constant dense<0.000000e+00> : vector<2x32xf32>
    %581 = tpu.matmul %579, %580, %cst_266 {dimension_numbers = #tpu.dot_dimension_numbers<[1], [0], [0], [1], [0, 0, 1, 1], [], []>} : vector<2x32xf32>, vector<32x32xf32>, vector<2x32xf32> -> vector<2x32xf32>
    %c0_267 = arith.constant 0 : index
    %c0_268 = arith.constant 0 : index
    %582 = vector.load %arg30[%c0_267, %c0_268] : memref<1x32xf32, #tpu.memory_space<vmem>>, vector<1x32xf32>
    %583 = vector.broadcast %582 : vector<1x32xf32> to vector<2x32xf32>
    %584 = arith.addf %581, %583 : vector<2x32xf32>
    %585 = vector.extract_strided_slice %504 {offsets = [0, 0], sizes = [1, 32], strides = [1, 1]} : vector<16x32xf32> to vector<1x32xf32>
    %586 = vector.extract_strided_slice %504 {offsets = [8, 0], sizes = [1, 32], strides = [1, 1]} : vector<16x32xf32> to vector<1x32xf32>
    %587 = tpu.concatenate %585, %586 in 0 : vector<1x32xf32>, vector<1x32xf32> -> vector<2x32xf32>
    %588 = tpu.concatenate %587, %584 in 1 : vector<2x32xf32>, vector<2x32xf32> -> vector<2x64xf32>
    %c0_269 = arith.constant 0 : index
    %c0_270 = arith.constant 0 : index
    %589 = vector.load %arg31[%c0_269, %c0_270] : memref<64x10xf32, #tpu.memory_space<vmem>>, vector<64x10xf32>
    %cst_271 = arith.constant dense<0.000000e+00> : vector<2x10xf32>
    %590 = tpu.matmul %588, %589, %cst_271 {dimension_numbers = #tpu.dot_dimension_numbers<[1], [0], [0], [1], [0, 0, 1, 1], [], []>} : vector<2x64xf32>, vector<64x10xf32>, vector<2x10xf32> -> vector<2x10xf32>
    %c0_272 = arith.constant 0 : index
    %c0_273 = arith.constant 0 : index
    %591 = vector.load %arg32[%c0_272, %c0_273] : memref<1x10xf32, #tpu.memory_space<vmem>>, vector<1x10xf32>
    %592 = vector.broadcast %591 : vector<1x10xf32> to vector<2x10xf32>
    %593 = arith.addf %590, %592 : vector<2x10xf32>
    %c0_274 = arith.constant 0 : index
    %c0_275 = arith.constant 0 : index
    %594 = vector.load %arg33[%c0_274, %c0_275] : memref<2x10xf32, #tpu.memory_space<vmem>>, vector<2x10xf32>
    tpu.vector_store %arg33[%c0_274, %c0_275], %593 {strides = array<i32>} : memref<2x10xf32, #tpu.memory_space<vmem>>, vector<2x10xf32>,
    return
  }
}

</mosaic_0001>

<bundles_post_ra>
// kernel: polar_vit_forward.1
= control target key start
LH: loop header
LB: loop body
LE: loop exit
PB: predicated region body
PF: predicated region fallthrough
CT: control target
= control target key end

     0   :  { %s6971_s6 = smov 1   ;;  %s6972_s10 = smov 2   ;;  %s7982_s0 = inlined_call_operand.smem [shape: u32[34], index: -1, kind: input, shape index: {}] }
   0x1   :  { %s7032_s5 = sld [smem:[%s7982_s0]]   ;;  %s6973_s14 = smov 3  }
   0x2   :  { %s7037_s9 = sld [smem:[%s7982_s0 + %s6971_s6]]   ;;  %s6974_s18 = smov 4  }
   0x3   :  { %s7042_s13 = sld [smem:[%s7982_s0 + %s6972_s10]]   ;;  %s6975_s22 = smov 5  }
   0x4   :  { %s7047_s17 = sld [smem:[%s7982_s0 + %s6973_s14]]   ;;  %s6976_s26 = smov 6  }
   0x5   :  { %s7052_s21 = sld [smem:[%s7982_s0 + %s6974_s18]]   ;;  %s6977_s30 = smov 7  }
   0x6   :  { %s7057_s25 = sld [smem:[%s7982_s0 + %s6975_s22]]   ;;  %s6978_s4 = smov 8  }
   0x7   :  { %s7062_s29 = sld [smem:[%s7982_s0 + %s6976_s26]]   ;;  %s6979_s10 = smov 9  }
   0x8   :  { %s7067_s3 = sld [smem:[%s7982_s0 + %s6977_s30]]   ;;  %s6980_s15 = smov 10  }
   0x9   :  { %s7072_s8 = sld [smem:[%s7982_s0 + %s6978_s4]]   ;;  %s6981_s20 = smov 11  }
   0xa   :  { %s7077_s14 = sld [smem:[%s7982_s0 + %s6979_s10]]   ;;  %s6982_s26 = smov 12  }
   0xb   :  { %s7082_s19 = sld [smem:[%s7982_s0 + %s6980_s15]]   ;;  %s6983_s1 = smov 13  }
   0xc   :  { %s7087_s24 = sld [smem:[%s7982_s0 + %s6981_s20]]   ;;  %s6984_s7 = smov 14  }
   0xd   :  { %s7092_s30 = sld [smem:[%s7982_s0 + %s6982_s26]]   ;;  %s6985_s15 = smov 15  }
   0xe   :  { %s7097_s6 = sld [smem:[%s7982_s0 + %s6983_s1]]   ;;  %s6986_s22 = smov 16  }
   0xf   :  { %s7102_s12 = sld [smem:[%s7982_s0 + %s6984_s7]]   ;;  %s6987_s28 = smov 17  }
  0x10   :  { %s7107_s20 = sld [smem:[%s7982_s0 + %s6985_s15]]   ;;  %s6988_s7 = smov 18  }
  0x11   :  { %s7112_s27 = sld [smem:[%s7982_s0 + %s6986_s22]]   ;;  %s6989_s15 = smov 19  }
  0x12   :  { %s7117_s4 = sld [smem:[%s7982_s0 + %s6987_s28]]   ;;  %s6990_s22 = smov 20  }
  0x13   :  { %7995 = sst [smem:[#allocation5_spill]] %s7092_s30  ;;  %s6991_s28 = smov 21  }
  0x14   :  { %s7137_s30 = sld [smem:[%s7982_s0 + %s6991_s28]]   ;;  %s6995_s28 = smov 25  }
  0x15   :  { %7996 = sst [smem:[#allocation6_spill]] %s7102_s12 }
  0x16   :  { %7997 = sst [smem:[#allocation7_spill]] %s7107_s20 }
  0x17   :  { %7998 = sst [smem:[#allocation8_spill]] %s7112_s27 }
  0x18   :  { %s7122_s12 = sld [smem:[%s7982_s0 + %s6988_s7]]   ;;  %s6992_s7 = smov 22  }
  0x19   :  { %s7127_s20 = sld [smem:[%s7982_s0 + %s6989_s15]]   ;;  %s6993_s15 = smov 23  }
  0x1a   :  { %s7132_s27 = sld [smem:[%s7982_s0 + %s6990_s22]]   ;;  %s6994_s22 = smov 24  }
  0x1b   :  { %8002 = sst [smem:[#allocation12_spill]] %s7137_s30 }
  0x1c   :  { %s7157_s30 = sld [smem:[%s7982_s0 + %s6995_s28]]   ;;  %s6999_s28 = smov 29  }
  0x1e   :  { %7999 = sst [smem:[#allocation9_spill]] %s7122_s12 }
  0x1f   :  { %8000 = sst [smem:[#allocation10_spill]] %s7127_s20 }
  0x20   :  { %8001 = sst [smem:[#allocation11_spill]] %s7132_s27 }
  0x21   :  { %s7142_s12 = sld [smem:[%s7982_s0 + %s6992_s7]]   ;;  %s6996_s7 = smov 26  }
  0x22   :  { %s7147_s20 = sld [smem:[%s7982_s0 + %s6993_s15]]   ;;  %s6997_s15 = smov 27  }
  0x23   :  { %s7152_s27 = sld [smem:[%s7982_s0 + %s6994_s22]]   ;;  %s6998_s22 = smov 28  }
  0x24   :  { %8006 = sst [smem:[#allocation16_spill]] %s7157_s30 }
  0x25   :  { %s7177_s30 = sld [smem:[%s7982_s0 + %s6999_s28]]   ;;  %s7003_s28 = smov 33  }
  0x27   :  { %8003 = sst [smem:[#allocation13_spill]] %s7142_s12 }
  0x28   :  { %8004 = sst [smem:[#allocation14_spill]] %s7147_s20 }
  0x29   :  { %8005 = sst [smem:[#allocation15_spill]] %s7152_s27 }
  0x2a   :  { %s7162_s12 = sld [smem:[%s7982_s0 + %s6996_s7]]   ;;  %s7000_s7 = smov 30  }
  0x2b   :  { %s7167_s20 = sld [smem:[%s7982_s0 + %s6997_s15]]   ;;  %s7001_s15 = smov 31  }
  0x2c   :  { %s7172_s27 = sld [smem:[%s7982_s0 + %s6998_s22]]   ;;  %s7002_s22 = smov 32  }
  0x2d   :  { %8010 = sst [smem:[#allocation20_spill]] %s7177_s30 }
  0x2e   :  { %s7197_s30 = sld [smem:[%s7982_s0 + %s7003_s28]]  }
  0x30   :  { %8007 = sst [smem:[#allocation17_spill]] %s7162_s12 }
  0x31   :  { %8008 = sst [smem:[#allocation18_spill]] %s7167_s20 }
  0x32   :  { %8009 = sst [smem:[#allocation19_spill]] %s7172_s27 }
  0x33   :  { %s7182_s12 = sld [smem:[%s7982_s0 + %s7000_s7]]  }
  0x34   :  { %s7187_s20 = sld [smem:[%s7982_s0 + %s7001_s15]]  }
  0x35   :  { %s7192_s27 = sld [smem:[%s7982_s0 + %s7002_s22]]  }
  0x36   :  { %v145_v0 = vld [vmem:[%s7037_s9] sm:$0xff]  ;;  %v146_v1 = vld [vmem:[%s7037_s9 + $0x8] sm:$0xff]  ;;  %v147_v2 = vld [vmem:[%s7037_s9 + $0x10] sm:$0xff]  ;;  %v7004_v3 = vmov 0.0|0.0   ;;  %vm171_vm0 = vcmask 523264  }
  0x37   :  { %6230 = vmatprep.subr.bf16.mxu0 %v7004_v3  ;;  %v6231_v4 = vpack.c.bf16 %v146_v1, %v145_v0  ;;  %v148_v5 = vld [vmem:[%s7037_s9 + $0x18] sm:$0xff]  ;;  %v149_v7 = vld [vmem:[%s7037_s9 + $0x20] sm:$0xff]  ;;  %v150_v8 = vld [vmem:[%s7037_s9 + $0x28] sm:$0xff] }
  0x38   :  { %v6234_v6 = vpack.c.bf16 %v148_v5, %v147_v2  ;;  %v6237_v9 = vpack.c.bf16 %v150_v8, %v149_v7  ;;  %v151_v10 = vld [vmem:[%s7037_s9 + $0x30] sm:$0xff]  ;;  %v152_v11 = vld [vmem:[%s7037_s9 + $0x38] sm:$0xff]  ;;  %v142_v12 = vld [vmem:[%s7032_s5 + $0x8] sm:$0xff] }
  0x39   :  { %6232 = vmatpush1.bf16.msra.mxu0 %v6231_v4  ;;  %5390 = vmatprep.mubr.msk.f32.mxu0 %vm171_vm0, %v142_v12 }
  0x3a   :  { %6233 = vmatprep.subr.bf16.mxu0 %v7004_v3 }
  0x3d   :  { %6235 = vmatpush1.bf16.msra.mxu0 %v6234_v6 }
  0x3e   :  { %6236 = vmatprep.subr.bf16.mxu0 %v7004_v3 }
  0x3f   :  { %72 = vsyncpa [#allocation3], 0  ;;  %v6240_v13 = vpack.c.bf16 %v152_v11, %v151_v10  ;;  %v153_v14 = vld [vmem:[%s7037_s9 + $0x40] sm:$0xff]  ;;  %v154_v15 = vld [vmem:[%s7037_s9 + $0x48] sm:$0xff]  ;;  %vm255_vm1 = vcmask 261120   ;;  %vm397_vm2 = vcmask 64512  }
  0x40   :  { %v6243_v16 = vpack.c.bf16 %v154_v15, %v153_v14  ;;  %v155_v17 = vld [vmem:[%s7037_s9 + $0x50] sm:$0xff]  ;;  %v156_v18 = vld [vmem:[%s7037_s9 + $0x58] sm:$0xff]  ;;  %v157_v20 = vld [vmem:[%s7037_s9 + $0x60] sm:$0xff]  ;;  %s7005_s0 = smov 96   ;;  %s7006_s7 = smov 88   ;;  %vm481_vm4 = vcmask 130048  }
  0x41   :  { %6238 = vmatpush1.bf16.msra.mxu0 %v6237_v9  ;;  %v6246_v19 = vpack.c.bf16 %v156_v18, %v155_v17  ;;  %v158_v21 = vld [vmem:[%s7037_s9 + $0x68] sm:$0xff]  ;;  %v159_v23 = vld [vmem:[%s7037_s9 + $0x70] sm:$0xff]  ;;  %v160_v24 = vld [vmem:[%s7037_s9 + $0x78] sm:$0xff]  ;;  %s7007_s10 = smov 120   ;;  %s7008_s11 = smov 64   ;;  %vm1219_vm5 = vcmask 195584  }
  0x42   :  { %6239 = vmatprep.subr.bf16.mxu0 %v7004_v3  ;;  %v6249_v22 = vpack.c.bf16 %v158_v21, %v157_v20  ;;  %v6252_v25 = vpack.c.bf16 %v160_v24, %v159_v23  ;;  %v161_v26 = vld [vmem:[%s7037_s9 + $0x80] sm:$0xff]  ;;  %v162_v27 = vld [vmem:[%s7037_s9 + $0x88] sm:$0xff]  ;;  %v163_v29 = vld [vmem:[%s7037_s9 + $0x90] sm:$0xff]  ;;  %s7009_s15 = smov 56   ;;  %s7010_s16 = smov 112   ;;  %vm4365_vm10 = vcmask 1040384  }
  0x43   :  { %v6255_v28 = vpack.c.bf16 %v162_v27, %v161_v26  ;;  %v164_v30 = vld [vmem:[%s7037_s9 + $0x98] sm:$0xff]  ;;  %v165_v32 = vld [vmem:[%s7037_s9 + $0xa0] sm:$0xff]  ;;  %v166_v33 = vld [vmem:[%s7037_s9 + $0xa8] sm:$0xff]  ;;  %s7011_s18 = smov 80   ;;  %s7012_s22 = smov 48   ;;  %vm7020_vm11 = vmmov 0  }
  0x44   :  { %v6258_v31 = vpack.c.bf16 %v164_v30, %v163_v29  ;;  %v6261_v34 = vpack.c.bf16 %v166_v33, %v165_v32  ;;  %v167_v35 = vld [vmem:[%s7037_s9 + $0xb0] sm:$0xff]  ;;  %v168_v36 = vld [vmem:[%s7037_s9 + $0xb8] sm:$0xff]  ;;  %v141_v38 = vld [vmem:[%s7032_s5] sm:$0xff]  ;;  %s7013_s23 = smov 104   ;;  %s7014_s26 = smov 72   ;;  %vm4539_vm12 = vcmask 123904  }
  0x45   :  { %6241 = vmatpush1.bf16.msra.mxu0 %v6240_v13  ;;  %v6264_v37 = vpack.c.bf16 %v168_v36, %v167_v35  ;;  %v144_v39 = vld [vmem:[%s7032_s5 + $0x18] sm:$0xff]  ;;  %v143_v40 = vld [vmem:[%s7032_s5 + $0x10] sm:$0xff]  ;;  %v169_v41 = vld [vmem:[%s7042_s13] sm:$0xff]  ;;  %s7015_s28 = smov 40   ;;  %s7016_s1 = smov 8   ;;  %vm5341_vm13 = vcmask 74752  }
  0x46   :  { %6242 = vmatprep.subr.bf16.mxu0 %v7004_v3  ;;  %v170_v45 = vld [vmem:[%s7042_s13 + $0x8] sm:$0xff]  ;;  %v299_v61 = vld [vmem:[%s7057_s25] sm:$0xff]  ;;  %v301_v63 = vld [vmem:[%s7057_s25 + $0x10] sm:$0xff]  ;;  %s7993_s2 = smov 16  }
  0x47   :  { %v300_v62 = vld [vmem:[%s7057_s25 + $0x8] sm:$0xff]  ;;  %v302_v1 = vld [vmem:[%s7057_s25 + $0x18] sm:$0xff]  ;;  %v5392_v11 = vld [vmem:[%s7047_s17] ss:$0 sm:$0xff] }
  0x48   :  { %v6266_v0 = vpack.c.bf16 %v300_v62, %v299_v61  ;;  %v6270_v2 = vpack.c.bf16 %v302_v1, %v301_v63  ;;  %v5393_v13 = vld [vmem:[%s7052_s21] ss:$0 sm:$0xff]  ;;  %vm7284_vm3 = vmpackc.low %vm397_vm2, %vm397_vm2  ;;  %v7298_v33 = vld [vmem:[%s7117_s4 + $0x8] sm:$0xff] }
  0x49   :  { %6244 = vmatpush1.bf16.msra.mxu0 %v6243_v16  ;;  %v5394_v20 = vld [vmem:[%s7062_s29] ss:$0 sm:$0xff] }
  0x4a   :  { %6245 = vmatprep.subr.bf16.mxu0 %v7004_v3 }
  0x4d   :  { %6247 = vmatpush1.bf16.msra.mxu0 %v6246_v19 }
  0x4e   :  { %6248 = vmatprep.subr.bf16.mxu0 %v7004_v3 }
  0x51   :  { %6250 = vmatpush1.bf16.msra.mxu0 %v6249_v22 }
  0x52   :  { %6251 = vmatprep.subr.bf16.mxu0 %v7004_v3 }
  0x55   :  { %6253 = vmatpush1.bf16.msra.mxu0 %v6252_v25 }
  0x56   :  { %6254 = vmatprep.subr.bf16.mxu0 %v7004_v3 }
  0x59   :  { %6256 = vmatpush1.bf16.msra.mxu0 %v6255_v28 }
  0x5a   :  { %6257 = vmatprep.subr.bf16.mxu0 %v7004_v3 }
  0x5d   :  { %6259 = vmatpush1.bf16.msra.mxu0 %v6258_v31  ;;  %v7295_v31 = vld [vmem:[%s7117_s4] sm:$0xff] }
  0x5e   :  { %6260 = vmatprep.subr.bf16.mxu0 %v7004_v3 }
  0x61   :  { %6262 = vmatpush1.bf16.msra.mxu0 %v6261_v34 }
  0x62   :  { %6263 = vmatprep.subr.bf16.mxu0 %v7004_v3 }
  0x65   :  { %6265 = vmatpush1.bf16.msra.mxu0 %v6264_v37 }
  0x66   :  { %6267 = vmatprep.subr.bf16.mxu0 %v6266_v0 }
  0x68   :  { %243 = vmatmul.mubr.f32.vlgmr.msra.gmra.mrb[0].mxu0 %v141_v38 }
  0x69   :  { %5391 = vmatprep.mubr.msk.f32.mxu0 %vm171_vm0, %v144_v39  ;;  %6269 = vmatpush3.bf16.msra.mxu0 %v6266_v0 }
  0x6a   :  { %6271 = vmatprep.subr.bf16.mxu0 %v6270_v2 }
  0x6c   :  { %248 = vmatmul.mubr.f32.gmra.mrb[2].mxu0 %v143_v40 }
  0x6d   :  { %6273 = vmatpush3.bf16.msra.mxu0 %v6270_v2 }
 0x13b   :  { %v244_v42 = vpop.f32.mrb[0].mxu0 }
 0x13c   :  { %v7242_v43 = vadd.f32 %v244_v42, %v169_v41  ;;  %v246_v44 = vpop.f32.mrb[1].mxu0 }
 0x13e   :  { %v256_v46 = vsel %vm255_vm1, %v7242_v43, 0.0 }
 0x13f   :  { %v249_v47 = vpop.f32.mrb[2].mxu0  ;;  %257 = vadd.xlane.f32.xlu0 %v256_v46 }
 0x140   :  { %v7247_v48 = vadd.f32 %v249_v47, %v170_v45  ;;  %v251_v49 = vpop.f32.mrb[3].mxu0 }
 0x142   :  { %v259_v50 = vsel %vm255_vm1, %v7247_v48, 0.0 }
 0x143   :  { %260 = vadd.xlane.f32.xlu0 %v259_v50 }
 0x1cc   :  { %v258_v51 = vpop.xlane.xlu0 %257 }
 0x1cd   :  { %v263_v52 = vmul.f32 0.03125, %v258_v51 }
 0x1cf   :  { %v265_v53 = vsub.f32 %v7242_v43, %v263_v52 }
 0x1d0   :  { %v261_v54 = vpop.xlane.xlu0 %260 }
 0x1d1   :  { %v264_v55 = vmul.f32 0.03125, %v261_v54  ;;  %v267_v56 = vmul.f32 %v265_v53, %v265_v53 }
 0x1d3   :  { %v266_v57 = vsub.f32 %v7247_v48, %v264_v55  ;;  %v269_v58 = vsel %vm255_vm1, %v267_v56, 0.0 }
 0x1d4   :  { %270 = vadd.xlane.f32.xlu1 %v269_v58 }
 0x1d5   :  { %v268_v59 = vmul.f32 %v266_v57, %v266_v57 }
 0x1d7   :  { %v272_v60 = vsel %vm255_vm1, %v268_v59, 0.0 }
 0x1d8   :  { %273 = vadd.xlane.f32.xlu1 %v272_v60 }
 0x261   :  { %v271_v4 = vpop.xlane.xlu1 %270 }
 0x262   :  { %v275_v5 = vmul.f32 0.03125, %v271_v4 }
 0x264   :  { %v277_v6 = vadd.f32 1e-06, %v275_v5 }
 0x265   :  { %v274_v7 = vpop.xlane.xlu1 %273 }
 0x266   :  { %6791 = vrsqrt.f32 %v277_v6  ;;  %v276_v8 = vmul.f32 0.03125, %v274_v7 }
 0x268   :  { %v278_v9 = vadd.f32 1e-06, %v276_v8 }
 0x26a   :  { %6793 = vrsqrt.f32 %v278_v9 }
 0x270   :  { %v6792_v10 = vpop.eup %6791 }
 0x271   :  { %v281_v12 = vmul.f32 %v6792_v10, %v265_v53 }
 0x273   :  { %v289_v14 = vmul.f32 %v5392_v11, %v281_v12 }
 0x274   :  { %v6794_v15 = vpop.eup %6793 }
 0x275   :  { %v282_v16 = vmul.f32 %v6794_v15, %v266_v57  ;;  %v297_v17 = vadd.f32 %v5393_v13, %v289_v14 }
 0x277   :  { %v290_v18 = vmul.f32 %v5392_v11, %v282_v16  ;;  %5825 = vmatprep.mubr.msk.f32.mxu0 %vm255_vm1, %v297_v17 }
 0x279   :  { %v298_v19 = vadd.f32 %v5393_v13, %v290_v18 }
 0x27b   :  { %5826 = vmatmul.mubr.msk.f32.vlgmr.msra.gmra.mrb[4].mxu0 %vm255_vm1, %v298_v19 }
 0x34e   :  { %v5827_v21 = vpop.f32.mrb[4].mxu0 }
 0x34f   :  { %v7264_v22 = vadd.f32 %v5827_v21, %v5394_v20  ;;  %v382_v23 = vpop.f32.mrb[5].mxu0 }
 0x350   :  { %v7266_v24 = vadd.f32 %v5394_v20, %v382_v23 }
 0x352   :  { %5832 = vmatprep.mubr.msk.f32.mxu1 %vm397_vm2, %v7266_v24  ;;  %v7272_v25 = vpack.i.bf16 %v7264_v22, %v7266_v24 }
 0x354   :  { %6642 = vrot.lane.b32.xlu0 %v7272_v25, %s7005_s0 }
 0x358   :  { %6652 = vrot.lane.b32.xlu0 %v7272_v25, %s7006_s7 }
 0x35c   :  { %591 = vrot.lane.b32.xlu0 %v7266_v24, %s7007_s10 }
 0x360   :  { %593 = vrot.lane.b32.xlu0 %v7264_v22, %s7007_s10 }
 0x3c6   :  { %v6643_v26 = vpop.permute.xlu0 %6642 }
 0x3c7   :  { %v6645_v27 = vunpack.i.h.bf16 %v6643_v26  ;;  %v6644_v28 = vunpack.i.l.bf16 %v6643_v26 }
 0x3c9   :  { %v6274_v30 = vpack.c.bf16 %v6645_v27, %v6644_v28 }
 0x3ca   :  { %v6653_v53 = vpop.permute.xlu0 %6652 }
 0x3cb   :  { %6276 = vmatprep.subr.msk.bf16.mxu1 %vm7284_vm3, %v6274_v30  ;;  %v6655_v55 = vunpack.i.h.bf16 %v6653_v53  ;;  %v6654_v56 = vunpack.i.l.bf16 %v6653_v53 }
 0x3cc   :  { %6279 = vmatpush3.bf16.xpose.msk.msra.mxu1 %vm7284_vm3, %v6274_v30 }
 0x3cd   :  { %v6284_v60 = vpack.c.bf16 %v6655_v55, %v6654_v56 }
 0x3ce   :  { %v592_v1 = vpop.permute.xlu0 %591 }
 0x3d2   :  { %v594_v2 = vpop.permute.xlu0 %593 }
 0x3d3   :  { %5833 = vmatmul.mubr.msk.f32.vlgmr.msra.gmra.mrb[0].mxu1 %vm397_vm2, %v7264_v22 }
 0x4a6   :  { %v5834_v32 = vpop.f32.mrb[0].mxu1 }
 0x4a7   :  { %v472_v34 = vpop.f32.mrb[1].mxu1  ;;  %v478_v36 = vadd.f32 %v5834_v32, %v7298_v33 }
 0x4a8   :  { %v473_v35 = vadd.f32 %v472_v34, %v7295_v31 }
 0x4a9   :  { %v485_v38 = vsel %vm481_vm4, %v478_v36, -inf }
 0x4aa   :  { %v482_v37 = vsel %vm481_vm4, %v473_v35, -inf }
 0x4ab   :  { %483 = vmax.xlane.f32.xlu1 %v482_v37 }
 0x4af   :  { %486 = vmax.xlane.f32.xlu1 %v485_v38 }
 0x538   :  { %v484_v39 = vpop.xlane.xlu1 %483 }
 0x539   :  { %v488_v40 = vsub.f32 %v473_v35, %v484_v39 }
 0x53b   :  { %v490_v44 = vmul.f32 1.442695, %v488_v40 }
 0x53c   :  { %v487_v41 = vpop.xlane.xlu1 %486 }
 0x53d   :  { %v489_v42 = vsub.f32 %v478_v36, %v487_v41 }
 0x53f   :  { %v492_v45 = vmul.f32 1.442695, %v489_v42 }
 0x541   :  { %6795 = vpow2.f32 %v492_v45 }
 0x542   :  { %6797 = vpow2.f32 %v490_v44 }
 0x54b   :  { %v6796_v46 = vpop.eup %6795 }
 0x54c   :  { %v497_v47 = vsel %vm481_vm4, %v6796_v46, 0.0  ;;  %v6798_v49 = vpop.eup %6797 }
 0x54d   :  { %498 = vadd.xlane.f32.xlu1 %v497_v47  ;;  %v494_v50 = vsel %vm481_vm4, %v6798_v49, 0.0 }
 0x551   :  { %495 = vadd.xlane.f32.xlu1 %v494_v50 }
 0x562   :  { %6647 = vrot.lane.b32.xlu1 %v7272_v25, %s7008_s11 }
 0x5da   :  { %v499_v51 = vpop.xlane.xlu1 %498 }
 0x5db   :  { %6799 = vrcp.f32 %v499_v51 }
 0x5de   :  { %v496_v52 = vpop.xlane.xlu1 %495 }
 0x5df   :  { %6801 = vrcp.f32 %v496_v52 }
 0x5e2   :  { %v6648_v54 = vpop.permute.xlu1 %6647 }
 0x5e3   :  { %v6650_v57 = vunpack.i.h.bf16 %v6648_v54  ;;  %v6649_v58 = vunpack.i.l.bf16 %v6648_v54 }
 0x5e5   :  { %v6280_v59 = vpack.c.bf16 %v6650_v57, %v6649_v58  ;;  %v6800_v61 = vpop.eup %6799 }
 0x5e6   :  { %v503_v0 = vmul.f32 %v6800_v61, %v6796_v46 }
 0x5e7   :  { %6281 = vmatprep.subr.bf16.mxu1 %v6280_v59 }
 0x5e8   :  { %6283 = vmatpush3.bf16.msra.mxu1 %v6280_v59 }
 0x5e9   :  { %v6802_v62 = vpop.eup %6801  ;;  %6286 = vmatprep.subr.msk.bf16.mxu1 %vm7284_vm3, %v6284_v60 }
 0x5ea   :  { %v501_v63 = vmul.f32 %v6802_v62, %v6798_v49 }
 0x5ec   :  { %5839 = vmatprep.mubr.msk.f32.mxu1 %vm481_vm4, %v501_v63 }
 0x5ed   :  { %5840 = vmatmul.mubr.msk.f32.vlgmr.msra.gmra.mrb[2].mxu1 %vm481_vm4, %v503_v0 }
 0x5ee   :  { %5846 = vmatprep.mubr.msk.f32.mxu1 %vm397_vm2, %v592_v1 }
 0x5f1   :  { %6289 = vmatpush3.bf16.xpose.msk.msra.mxu1 %vm7284_vm3, %v6284_v60 }
 0x5f8   :  { %5847 = vmatmul.mubr.msk.f32.vlgmr.msra.gmra.mrb[4].mxu1 %vm397_vm2, %v594_v2 }
 0x6c0   :  { %v7316_v4 = vpop.f32.mrb[2].mxu1 }
 0x6c1   :  { %v7318_v5 = vpop.f32.mrb[3].mxu1 }
 0x6cb   :  { %v5848_v6 = vpop.f32.mrb[4].mxu1 }
 0x6cc   :  { %v679_v7 = vadd.f32 %v5848_v6, %v7298_v33  ;;  %v673_v8 = vpop.f32.mrb[5].mxu1 }
 0x6cd   :  { %v674_v9 = vadd.f32 %v673_v8, %v7295_v31 }
 0x6ce   :  { %v685_v10 = vsel %vm481_vm4, %v679_v7, -inf }
 0x6cf   :  { %686 = vmax.xlane.f32.xlu0 %v685_v10  ;;  %v682_v11 = vsel %vm481_vm4, %v674_v9, -inf }
 0x6d0   :  { %683 = vmax.xlane.f32.xlu1 %v682_v11 }
 0x6e1   :  { %6657 = vrot.lane.b32.xlu1 %v7272_v25, %s7009_s15 }
 0x6e5   :  { %791 = vrot.lane.b32.xlu1 %v7266_v24, %s7010_s16 }
 0x6e9   :  { %793 = vrot.lane.b32.xlu1 %v7264_v22, %s7010_s16 }
 0x75c   :  { %v687_v12 = vpop.xlane.xlu0 %686 }
 0x75d   :  { %v689_v13 = vsub.f32 %v679_v7, %v687_v12  ;;  %v684_v14 = vpop.xlane.xlu1 %683 }
 0x75e   :  { %v688_v15 = vsub.f32 %v674_v9, %v684_v14 }
 0x75f   :  { %v692_v16 = vmul.f32 1.442695, %v689_v13 }
 0x760   :  { %v690_v17 = vmul.f32 1.442695, %v688_v15 }
 0x761   :  { %6803 = vpow2.f32 %v692_v16  ;;  %v6658_v18 = vpop.permute.xlu1 %6657 }
 0x762   :  { %v6660_v19 = vunpack.i.h.bf16 %v6658_v18  ;;  %v6659_v20 = vunpack.i.l.bf16 %v6658_v18  ;;  %6805 = vpow2.f32 %v690_v17 }
 0x764   :  { %v6290_v21 = vpack.c.bf16 %v6660_v19, %v6659_v20 }
 0x765   :  { %v792_v42 = vpop.permute.xlu1 %791 }
 0x766   :  { %6291 = vmatprep.subr.bf16.mxu1 %v6290_v21 }
 0x767   :  { %6293 = vmatpush3.bf16.msra.mxu1 %v6290_v21 }
 0x769   :  { %v794_v44 = vpop.permute.xlu1 %793 }
 0x76b   :  { %v6804_v23 = vpop.eup %6803 }
 0x76c   :  { %v697_v26 = vsel %vm481_vm4, %v6804_v23, 0.0  ;;  %v6806_v27 = vpop.eup %6805 }
 0x76d   :  { %698 = vadd.xlane.f32.xlu0 %v697_v26  ;;  %v694_v28 = vsel %vm481_vm4, %v6806_v27, 0.0 }
 0x771   :  { %695 = vadd.xlane.f32.xlu0 %v694_v28 }
 0x787   :  { %6662 = vrot.lane.b32.xlu0 %v7272_v25, %s7011_s18 }
 0x7fa   :  { %v699_v30 = vpop.xlane.xlu0 %698 }
 0x7fb   :  { %6807 = vrcp.f32 %v699_v30 }
 0x7fe   :  { %v696_v32 = vpop.xlane.xlu0 %695 }
 0x7ff   :  { %6809 = vrcp.f32 %v696_v32 }
 0x802   :  { %v6663_v34 = vpop.permute.xlu0 %6662 }
 0x803   :  { %v6665_v35 = vunpack.i.h.bf16 %v6663_v34  ;;  %v6664_v36 = vunpack.i.l.bf16 %v6663_v34 }
 0x805   :  { %v6294_v37 = vpack.c.bf16 %v6665_v35, %v6664_v36  ;;  %v6808_v38 = vpop.eup %6807 }
 0x806   :  { %v703_v41 = vmul.f32 %v6808_v38, %v6804_v23 }
 0x807   :  { %6296 = vmatprep.subr.msk.bf16.mxu1 %vm7284_vm3, %v6294_v37 }
 0x809   :  { %v6810_v39 = vpop.eup %6809 }
 0x80a   :  { %v701_v40 = vmul.f32 %v6810_v39, %v6806_v27 }
 0x80c   :  { %5853 = vmatprep.mubr.msk.f32.mxu1 %vm481_vm4, %v701_v40 }
 0x80d   :  { %5854 = vmatmul.mubr.msk.f32.vlgmr.msra.gmra.mrb[6].mxu1 %vm481_vm4, %v703_v41 }
 0x80e   :  { %6299 = vmatpush3.bf16.xpose.msk.msra.mxu1 %vm7284_vm3, %v6294_v37  ;;  %5860 = vmatprep.mubr.msk.f32.mxu1 %vm397_vm2, %v792_v42 }
 0x815   :  { %5861 = vmatmul.mubr.msk.f32.vlgmr.msra.gmra.mrb[8].mxu1 %vm397_vm2, %v794_v44 }
 0x8e0   :  { %v7342_v45 = vpop.f32.mrb[6].mxu1 }
 0x8e1   :  { %v7344_v46 = vpop.f32.mrb[7].mxu1 }
 0x8e8   :  { %v5862_v47 = vpop.f32.mrb[8].mxu1 }
 0x8e9   :  { %v879_v49 = vadd.f32 %v5862_v47, %v7298_v33  ;;  %v873_v50 = vpop.f32.mrb[9].mxu1 }
 0x8ea   :  { %v874_v51 = vadd.f32 %v873_v50, %v7295_v31 }
 0x8eb   :  { %v885_v52 = vsel %vm481_vm4, %v879_v49, -inf }
 0x8ec   :  { %886 = vmax.xlane.f32.xlu0 %v885_v52  ;;  %v882_v53 = vsel %vm481_vm4, %v874_v51, -inf  ;;  %v1223_v52 = vld [vmem:[%s7067_s3 + $0x8] sm:$0xff] }
 0x8ed   :  { %883 = vmax.xlane.f32.xlu1 %v882_v53  ;;  %v1224_v53 = vld [vmem:[%s7067_s3 + $0x10] sm:$0xff] }
 0x8fe   :  { %6667 = vrot.lane.b32.xlu1 %v7272_v25, %s7012_s22 }
 0x902   :  { %991 = vrot.lane.b32.xlu1 %v7266_v24, %s7013_s23 }
 0x906   :  { %993 = vrot.lane.b32.xlu1 %v7264_v22, %s7013_s23 }
 0x979   :  { %v887_v54 = vpop.xlane.xlu0 %886 }
 0x97a   :  { %v889_v55 = vsub.f32 %v879_v49, %v887_v54  ;;  %v884_v56 = vpop.xlane.xlu1 %883 }
 0x97b   :  { %v888_v57 = vsub.f32 %v874_v51, %v884_v56  ;;  %v1222_v51 = vld [vmem:[%s7067_s3] sm:$0xff] }
 0x97c   :  { %v892_v58 = vmul.f32 1.442695, %v889_v55  ;;  %v6314_v54 = vpack.c.bf16 %v1223_v52, %v1222_v51  ;;  %v1225_v55 = vld [vmem:[%s7067_s3 + $0x18] sm:$0xff] }
 0x97d   :  { %v890_v59 = vmul.f32 1.442695, %v888_v57  ;;  %v6318_v56 = vpack.c.bf16 %v1225_v55, %v1224_v53  ;;  %v5440_v53 = vld [vmem:[%s7037_s9 + $0xd0] sm:$0xff]  ;;  %v5435_v55 = vld [vmem:[%s7032_s5 + $0x28] sm:$0xff] }
 0x97e   :  { %6811 = vpow2.f32 %v892_v58  ;;  %v6668_v60 = vpop.permute.xlu1 %6667 }
 0x97f   :  { %v6670_v61 = vunpack.i.h.bf16 %v6668_v60  ;;  %v6669_v62 = vunpack.i.l.bf16 %v6668_v60  ;;  %6813 = vpow2.f32 %v890_v59 }
 0x981   :  { %v6300_v63 = vpack.c.bf16 %v6670_v61, %v6669_v62 }
 0x982   :  { %v992_v15 = vpop.permute.xlu1 %991 }
 0x983   :  { %6301 = vmatprep.subr.bf16.mxu1 %v6300_v63 }
 0x984   :  { %6303 = vmatpush3.bf16.msra.mxu1 %v6300_v63 }
 0x986   :  { %v994_v16 = vpop.permute.xlu1 %993 }
 0x988   :  { %v6812_v0 = vpop.eup %6811 }
 0x989   :  { %v897_v24 = vsel %vm481_vm4, %v6812_v0, 0.0  ;;  %v6814_v1 = vpop.eup %6813 }
 0x98a   :  { %898 = vadd.xlane.f32.xlu0 %v897_v24  ;;  %v894_v22 = vsel %vm481_vm4, %v6814_v1, 0.0 }
 0x98e   :  { %895 = vadd.xlane.f32.xlu0 %v894_v22 }
 0x9a4   :  { %6672 = vrot.lane.b32.xlu0 %v7272_v25, %s7014_s26 }
 0xa17   :  { %v899_v2 = vpop.xlane.xlu0 %898 }
 0xa18   :  { %6815 = vrcp.f32 %v899_v2 }
 0xa1b   :  { %v896_v6 = vpop.xlane.xlu0 %895 }
 0xa1c   :  { %6817 = vrcp.f32 %v896_v6 }
 0xa1f   :  { %v6673_v7 = vpop.permute.xlu0 %6672 }
 0xa20   :  { %v6675_v8 = vunpack.i.h.bf16 %v6673_v7  ;;  %v6674_v9 = vunpack.i.l.bf16 %v6673_v7 }
 0xa22   :  { %v6304_v10 = vpack.c.bf16 %v6675_v8, %v6674_v9  ;;  %v6816_v11 = vpop.eup %6815 }
 0xa23   :  { %v903_v14 = vmul.f32 %v6816_v11, %v6812_v0 }
 0xa24   :  { %6306 = vmatprep.subr.msk.bf16.mxu1 %vm7284_vm3, %v6304_v10 }
 0xa26   :  { %v6818_v12 = vpop.eup %6817 }
 0xa27   :  { %v901_v13 = vmul.f32 %v6818_v12, %v6814_v1 }
 0xa29   :  { %5867 = vmatprep.mubr.msk.f32.mxu1 %vm481_vm4, %v901_v13 }
 0xa2a   :  { %5868 = vmatmul.mubr.msk.f32.vlgmr.msra.gmra.mrb[10].mxu1 %vm481_vm4, %v903_v14 }
 0xa2b   :  { %6309 = vmatpush3.bf16.xpose.msk.msra.mxu1 %vm7284_vm3, %v6304_v10  ;;  %5874 = vmatprep.mubr.msk.f32.mxu1 %vm397_vm2, %v992_v15 }
 0xa2c   :  { %6315 = vmatprep.subr.bf16.mxu1 %v6314_v54 }
 0xa32   :  { %5875 = vmatmul.mubr.msk.f32.vlgmr.msra.gmra.mrb[12].mxu1 %vm397_vm2, %v994_v16 }
 0xa33   :  { %6317 = vmatpush3.bf16.msra.mxu1 %v6314_v54  ;;  %v5441_v54 = vld [vmem:[%s7037_s9 + $0xd8] sm:$0xff] }
 0xa34   :  { %6319 = vmatprep.subr.bf16.mxu1 %v6318_v56 }
 0xa37   :  { %6321 = vmatpush3.bf16.msra.mxu1 %v6318_v56  ;;  %v6350_v56 = vpack.c.bf16 %v5441_v54, %v5440_v53 }
 0xafd   :  { %v5869_v17 = vpop.f32.mrb[10].mxu1 }
 0xafe   :  { %v982_v18 = vpop.f32.mrb[11].mxu1 }
 0xb05   :  { %v5876_v19 = vpop.f32.mrb[12].mxu1 }
 0xb06   :  { %v1079_v20 = vadd.f32 %v5876_v19, %v7298_v33  ;;  %v1073_v21 = vpop.f32.mrb[13].mxu1 }
 0xb07   :  { %v1074_v23 = vadd.f32 %v1073_v21, %v7295_v31 }
 0xb08   :  { %v1085_v26 = vsel %vm481_vm4, %v1079_v20, -inf }
 0xb09   :  { %1086 = vmax.xlane.f32.xlu0 %v1085_v26  ;;  %v1082_v27 = vsel %vm481_vm4, %v1074_v23, -inf  ;;  %v1363_v26 = vld [vmem:[%s7087_s24 + $0x8] sm:$0xff] }
 0xb0a   :  { %1083 = vmax.xlane.f32.xlu1 %v1082_v27  ;;  %v1364_v27 = vld [vmem:[%s7087_s24 + $0x10] sm:$0xff] }
 0xb1b   :  { %6677 = vrot.lane.b32.xlu1 %v7272_v25, %s7015_s28 }
 0xb1f   :  { %1195 = vrot.lane.b32.xlu1 %v7342_v45, %s7016_s1 }
 0xb23   :  { %1201 = vrot.lane.b32.xlu1 %v982_v18, %s7993_s2 }
 0xb27   :  { %1203 = vrot.lane.b32.xlu1 %v5869_v17, %s7993_s2  ;;  %s7018_s2 = smov 24  }
 0xb96   :  { %v1087_v31 = vpop.xlane.xlu0 %1086 }
 0xb97   :  { %v1089_v33 = vsub.f32 %v1079_v20, %v1087_v31  ;;  %v1084_v28 = vpop.xlane.xlu1 %1083 }
 0xb98   :  { %v1088_v30 = vsub.f32 %v1074_v23, %v1084_v28  ;;  %v1362_v23 = vld [vmem:[%s7087_s24] sm:$0xff] }
 0xb99   :  { %v1092_v32 = vmul.f32 1.442695, %v1089_v33  ;;  %v6322_v31 = vpack.c.bf16 %v1363_v26, %v1362_v23  ;;  %v1365_v33 = vld [vmem:[%s7087_s24 + $0x18] sm:$0xff]  ;;  %v5436_v26 = vld [vmem:[%s7032_s5 + $0x30] sm:$0xff] }
 0xb9a   :  { %v1090_v34 = vmul.f32 1.442695, %v1088_v30  ;;  %v6326_v28 = vpack.c.bf16 %v1365_v33, %v1364_v27  ;;  %v5437_v23 = vld [vmem:[%s7032_s5 + $0x38] sm:$0xff]  ;;  %v1508_v27 = vld [vmem:[%s7097_s6] sm:$0xff] }
 0xb9b   :  { %v6678_v35 = vpop.permute.xlu1 %6677 }
 0xb9c   :  { %6819 = vpow2.f32 %v1090_v34  ;;  %v6680_v36 = vunpack.i.h.bf16 %v6678_v35  ;;  %v6679_v37 = vunpack.i.l.bf16 %v6678_v35 }
 0xb9d   :  { %6821 = vpow2.f32 %v1092_v32 }
 0xb9e   :  { %v6310_v25 = vpack.c.bf16 %v6680_v36, %v6679_v37 }
 0xb9f   :  { %v1196_v58 = vpop.permute.xlu1 %1195 }
 0xba0   :  { %6311 = vmatprep.subr.bf16.mxu0 %v6310_v25  ;;  %v1216_v0 = vsel %vm397_vm2, %v7316_v4, %v1196_v58 }
 0xba1   :  { %6313 = vmatpush3.bf16.msra.mxu0 %v6310_v25 }
 0xba2   :  { %6323 = vmatprep.subr.bf16.mxu0 %v6322_v31 }
 0xba3   :  { %v1202_v59 = vpop.permute.xlu1 %1201 }
 0xba6   :  { %v6820_v38 = vpop.eup %6819 }
 0xba7   :  { %v1094_v39 = vsel %vm481_vm4, %v6820_v38, 0.0  ;;  %v6822_v40 = vpop.eup %6821  ;;  %v1204_v61 = vpop.permute.xlu1 %1203 }
 0xba8   :  { %1095 = vadd.xlane.f32.xlu0 %v1094_v39  ;;  %v1097_v41 = vsel %vm481_vm4, %v6822_v40, 0.0  ;;  %v1218_v22 = vsel %vm481_vm4, %v1216_v0, %v1204_v61 }
 0xbac   :  { %1098 = vadd.xlane.f32.xlu0 %v1097_v41 }
 0xbc2   :  { %1193 = vrot.lane.b32.xlu0 %v7344_v46, %s7016_s1 }
 0xc35   :  { %v1096_v42 = vpop.xlane.xlu0 %1095 }
 0xc36   :  { %6823 = vrcp.f32 %v1096_v42 }
 0xc39   :  { %v1099_v44 = vpop.xlane.xlu0 %1098 }
 0xc3a   :  { %6825 = vrcp.f32 %v1099_v44 }
 0xc3d   :  { %v1194_v60 = vpop.permute.xlu0 %1193 }
 0xc3e   :  { %v1215_v62 = vsel %vm397_vm2, %v7318_v5, %v1194_v60  ;;  %v5423_v5 = vld [vmem:[%s7072_s8] ss:$0 sm:$0xff]  ;;  %v5445_v60 = vld [vmem:[%s7037_s9 + $0xf8] sm:$0xff] }
 0xc3f   :  { %v1217_v24 = vsel %vm481_vm4, %v1215_v62, %v1202_v59  ;;  %v5444_v59 = vld [vmem:[%s7037_s9 + $0xf0] sm:$0xff]  ;;  %v5446_v62 = vld [vmem:[%s7037_s9 + $0x100] sm:$0xff] }
 0xc40   :  { %v6824_v45 = vpop.eup %6823  ;;  %v6356_v61 = vpack.c.bf16 %v5445_v60, %v5444_v59 }
 0xc41   :  { %v1101_v47 = vmul.f32 %v6824_v45, %v6820_v38  ;;  %v5424_v38 = vld [vmem:[%s7077_s14] ss:$0 sm:$0xff] }
 0xc43   :  { %5881 = vmatprep.mubr.msk.f32.mxu0 %vm481_vm4, %v1101_v47  ;;  %v5438_v47 = vld [vmem:[%s7037_s9 + $0xc0] sm:$0xff] }
 0xc44   :  { %v6826_v49 = vpop.eup %6825 }
 0xc45   :  { %v1103_v50 = vmul.f32 %v6826_v49, %v6822_v40  ;;  %v5425_v40 = vld [vmem:[%s7082_s19] ss:$0 sm:$0xff]  ;;  %v5439_v49 = vld [vmem:[%s7037_s9 + $0xc8] sm:$0xff] }
 0xc46   :  { %v6347_v51 = vpack.c.bf16 %v5439_v49, %v5438_v47 }
 0xc47   :  { %5882 = vmatmul.mubr.msk.f32.vlgmr.msra.gmra.mrb[6].mxu0 %vm481_vm4, %v1103_v50 }
 0xc48   :  { %6325 = vmatpush3.bf16.msra.mxu0 %v6322_v31  ;;  %v1509_v31 = vld [vmem:[%s7097_s6 + $0x8] sm:$0xff] }
 0xc49   :  { %6327 = vmatprep.subr.bf16.mxu0 %v6326_v28  ;;  %v6330_v33 = vpack.c.bf16 %v1509_v31, %v1508_v27 }
 0xc4b   :  { %6331 = vmatprep.subr.bf16.mxu1 %v6330_v33 }
 0xc4c   :  { %6329 = vmatpush3.bf16.msra.mxu0 %v6326_v28  ;;  %v1510_v28 = vld [vmem:[%s7097_s6 + $0x10] sm:$0xff] }
 0xc4d   :  { %6346 = vmatprep.subr.bf16.mxu0 %v7004_v3 }
 0xd1a   :  { %v5883_v46 = vpop.f32.mrb[6].mxu0 }
 0xd1b   :  { %1211 = vrot.lane.b32.xlu1 %v5883_v46, %s7018_s2  ;;  %v1182_v57 = vpop.f32.mrb[7].mxu0  ;;  %v5442_v46 = vld [vmem:[%s7037_s9 + $0xe0] sm:$0xff] }
 0xd1c   :  { %1209 = vrot.lane.b32.xlu0 %v1182_v57, %s7018_s2  ;;  %v5443_v57 = vld [vmem:[%s7037_s9 + $0xe8] sm:$0xff] }
 0xd1d   :  { %v6353_v58 = vpack.c.bf16 %v5443_v57, %v5442_v46 }
 0xd8d   :  { %v1212_v63 = vpop.permute.xlu1 %1211 }
 0xd8e   :  { %v1210_v1 = vpop.permute.xlu0 %1209  ;;  %v1221_v6 = vsel %vm1219_vm5, %v1218_v22, %v1212_v63  ;;  %v5447_v63 = vld [vmem:[%s7037_s9 + $0x108] sm:$0xff] }
 0xd8f   :  { %v1220_v2 = vsel %vm1219_vm5, %v1217_v24, %v1210_v1  ;;  %v6359_v0 = vpack.c.bf16 %v5447_v63, %v5446_v62  ;;  %v5448_v24 = vld [vmem:[%s7037_s9 + $0x110] sm:$0xff]  ;;  %v5449_v1 = vld [vmem:[%s7037_s9 + $0x118] sm:$0xff] }
 0xd90   :  { %5892 = vmatprep.mubr.msk.f32.mxu1 %vm255_vm1, %v1220_v2  ;;  %v6362_v22 = vpack.c.bf16 %v5449_v1, %v5448_v24  ;;  %v5450_v2 = vld [vmem:[%s7037_s9 + $0x120] sm:$0xff] }
 0xd91   :  { %5893 = vmatmul.mubr.msk.f32.vlgmr.msra.gmra.mrb[14].mxu1 %vm255_vm1, %v1221_v6  ;;  %v5451_v6 = vld [vmem:[%s7037_s9 + $0x128] sm:$0xff] }
 0xd92   :  { %6333 = vmatpush3.bf16.msra.mxu1 %v6330_v33 }
 0xe64   :  { %v5894_v7 = vpop.f32.mrb[14].mxu1 }
 0xe65   :  { %v1308_v8 = vadd.f32 %v5894_v7, %v7247_v48  ;;  %v1298_v9 = vpop.f32.mrb[15].mxu1  ;;  %v6365_v7 = vpack.c.bf16 %v5451_v6, %v5450_v2 }
 0xe66   :  { %v1307_v4 = vadd.f32 %v1298_v9, %v7242_v43 }
 0xe67   :  { %v7403_v10 = vadd.f32 %v5423_v5, %v1308_v8  ;;  %v5453_v8 = vld [vmem:[%s7037_s9 + $0x138] sm:$0xff] }
 0xe68   :  { %v7405_v11 = vadd.f32 %v5423_v5, %v1307_v4  ;;  %v5452_v5 = vld [vmem:[%s7037_s9 + $0x130] sm:$0xff]  ;;  %v5454_v4 = vld [vmem:[%s7037_s9 + $0x140] sm:$0xff] }
 0xe69   :  { %v1323_v12 = vsel %vm255_vm1, %v7403_v10, 0.0  ;;  %v6368_v9 = vpack.c.bf16 %v5453_v8, %v5452_v5 }
 0xe6a   :  { %1324 = vadd.xlane.f32.xlu1 %v1323_v12  ;;  %v1320_v13 = vsel %vm255_vm1, %v7405_v11, 0.0  ;;  %v5455_v12 = vld [vmem:[%s7037_s9 + $0x148] sm:$0xff] }
 0xe6b   :  { %1321 = vadd.xlane.f32.xlu0 %v1320_v13  ;;  %v6371_v13 = vpack.c.bf16 %v5455_v12, %v5454_v4 }
 0xef7   :  { %v1325_v14 = vpop.xlane.xlu1 %1324 }
 0xef8   :  { %v1327_v48 = vmul.f32 0.03125, %v1325_v14  ;;  %v1322_v15 = vpop.xlane.xlu0 %1321  ;;  %v5456_v14 = vld [vmem:[%s7037_s9 + $0x150] sm:$0xff] }
 0xef9   :  { %v1326_v43 = vmul.f32 0.03125, %v1322_v15 }
 0xefa   :  { %v1329_v16 = vsub.f32 %v7403_v10, %v1327_v48  ;;  %v5457_v48 = vld [vmem:[%s7037_s9 + $0x158] sm:$0xff] }
 0xefb   :  { %v1328_v17 = vsub.f32 %v7405_v11, %v1326_v43  ;;  %v6374_v15 = vpack.c.bf16 %v5457_v48, %v5456_v14  ;;  %v5458_v43 = vld [vmem:[%s7037_s9 + $0x160] sm:$0xff] }
 0xefc   :  { %v1331_v20 = vmul.f32 %v1329_v16, %v1329_v16 }
 0xefd   :  { %v1330_v18 = vmul.f32 %v1328_v17, %v1328_v17 }
 0xefe   :  { %v1335_v21 = vsel %vm255_vm1, %v1331_v20, 0.0 }
 0xeff   :  { %v1332_v19 = vsel %vm255_vm1, %v1330_v18, 0.0  ;;  %v5460_v18 = vld [vmem:[%s7037_s9 + $0x170] sm:$0xff] }
 0xf00   :  { %1333 = vadd.xlane.f32.xlu0 %v1332_v19  ;;  %v5461_v19 = vld [vmem:[%s7037_s9 + $0x178] sm:$0xff] }
 0xf01   :  { %v6380_v20 = vpack.c.bf16 %v5461_v19, %v5460_v18 }
 0xf04   :  { %1336 = vadd.xlane.f32.xlu0 %v1335_v21  ;;  %v5434_v21 = vld [vmem:[%s7032_s5 + $0x20] sm:$0xff]  ;;  %s8014_s5 = sld [smem:[#allocation6_spill]] }
 0xf8d   :  { %v1334_v30 = vpop.xlane.xlu0 %1333 }
 0xf8e   :  { %v1338_v32 = vmul.f32 0.03125, %v1334_v30  ;;  %v1511_v30 = vld [vmem:[%s7097_s6 + $0x18] sm:$0xff] }
 0xf90   :  { %v1340_v34 = vadd.f32 1e-06, %v1338_v32  ;;  %v6334_v32 = vpack.c.bf16 %v1511_v30, %v1510_v28  ;;  %v5462_v28 = vld [vmem:[%s7042_s13 + $0x10] sm:$0xff] }
 0xf91   :  { %v1337_v35 = vpop.xlane.xlu0 %1336 }
 0xf92   :  { %6827 = vrsqrt.f32 %v1340_v34  ;;  %v1339_v36 = vmul.f32 0.03125, %v1337_v35  ;;  %6335 = vmatprep.subr.bf16.mxu1 %v6334_v32  ;;  %v1512_v34 = vld [vmem:[%s7097_s6 + $0x20] sm:$0xff]  ;;  %v1513_v35 = vld [vmem:[%s7097_s6 + $0x28] sm:$0xff] }
 0xf93   :  { %6337 = vmatpush3.bf16.msra.mxu1 %v6334_v32 }
 0xf94   :  { %v1341_v37 = vadd.f32 1e-06, %v1339_v36  ;;  %v6338_v36 = vpack.c.bf16 %v1513_v35, %v1512_v34 }
 0xf96   :  { %6829 = vrsqrt.f32 %v1341_v37  ;;  %6339 = vmatprep.subr.bf16.mxu1 %v6338_v36  ;;  %v1514_v37 = vld [vmem:[%s7097_s6 + $0x30] sm:$0xff] }
 0xf97   :  { %6341 = vmatpush3.bf16.msra.mxu1 %v6338_v36 }
 0xf9c   :  { %v6828_v25 = vpop.eup %6827 }
 0xf9d   :  { %v1344_v39 = vmul.f32 %v6828_v25, %v1328_v17  ;;  %v1515_v25 = vld [vmem:[%s7097_s6 + $0x38] sm:$0xff] }
 0xf9f   :  { %v1352_v41 = vmul.f32 %v5424_v38, %v1344_v39 }
 0xfa0   :  { %v6830_v42 = vpop.eup %6829 }
 0xfa1   :  { %v1345_v44 = vmul.f32 %v6830_v42, %v1329_v16  ;;  %v1360_v45 = vadd.f32 %v5425_v40, %v1352_v41  ;;  %v5459_v16 = vld [vmem:[%s7037_s9 + $0x168] sm:$0xff]  ;;  %s8013_s9 = sld [smem:[#allocation5_spill]] }
 0xfa2   :  { %v6377_v17 = vpack.c.bf16 %v5459_v16, %v5458_v43 }
 0xfa3   :  { %v1353_v50 = vmul.f32 %v5424_v38, %v1345_v44  ;;  %5903 = vmatprep.mubr.msk.f32.mxu0 %vm255_vm1, %v1360_v45  ;;  %v6342_v38 = vpack.c.bf16 %v1515_v25, %v1514_v37 }
 0xfa5   :  { %v1361_v52 = vadd.f32 %v5425_v40, %v1353_v50  ;;  %6343 = vmatprep.subr.bf16.mxu1 %v6342_v38 }
 0xfa6   :  { %6345 = vmatpush3.bf16.msra.mxu1 %v6342_v38 }
 0xfa7   :  { %5904 = vmatmul.mubr.msk.f32.vlgmr.msra.gmra.mrb[8].mxu0 %vm255_vm1, %v1361_v52  ;;  %v5426_v39 = vld [vmem:[%s8013_s9] ss:$0 sm:$0xff] }
 0xfa8   :  { %6348 = vmatpush1.bf16.msra.mxu0 %v6347_v51  ;;  %5464 = vmatprep.mubr.msk.f32.mxu0 %vm171_vm0, %v5435_v55 }
 0xfa9   :  { %6349 = vmatprep.subr.bf16.mxu0 %v7004_v3 }
 0xfac   :  { %6351 = vmatpush1.bf16.msra.mxu0 %v6350_v56 }
 0xfad   :  { %6352 = vmatprep.subr.bf16.mxu0 %v7004_v3 }
 0xfb0   :  { %6354 = vmatpush1.bf16.msra.mxu0 %v6353_v58 }
 0xfb1   :  { %6355 = vmatprep.subr.bf16.mxu0 %v7004_v3 }
 0xfb4   :  { %6357 = vmatpush1.bf16.msra.mxu0 %v6356_v61 }
 0xfb5   :  { %6358 = vmatprep.subr.bf16.mxu0 %v7004_v3 }
 0xfb8   :  { %6360 = vmatpush1.bf16.msra.mxu0 %v6359_v0 }
 0xfb9   :  { %6361 = vmatprep.subr.bf16.mxu0 %v7004_v3 }
 0xfbc   :  { %6363 = vmatpush1.bf16.msra.mxu0 %v6362_v22 }
 0xfbd   :  { %6364 = vmatprep.subr.bf16.mxu0 %v7004_v3 }
 0xfc0   :  { %6366 = vmatpush1.bf16.msra.mxu0 %v6365_v7 }
 0xfc1   :  { %6367 = vmatprep.subr.bf16.mxu0 %v7004_v3 }
 0xfc4   :  { %6369 = vmatpush1.bf16.msra.mxu0 %v6368_v9 }
 0xfc5   :  { %6370 = vmatprep.subr.bf16.mxu0 %v7004_v3 }
 0xfc8   :  { %6372 = vmatpush1.bf16.msra.mxu0 %v6371_v13 }
 0xfc9   :  { %6373 = vmatprep.subr.bf16.mxu0 %v7004_v3 }
 0xfcc   :  { %6375 = vmatpush1.bf16.msra.mxu0 %v6374_v15 }
 0xfcd   :  { %6376 = vmatprep.subr.bf16.mxu0 %v7004_v3 }
 0xfd0   :  { %6378 = vmatpush1.bf16.msra.mxu0 %v6377_v17 }
 0xfd1   :  { %6379 = vmatprep.subr.bf16.mxu0 %v7004_v3 }
 0xfd4   :  { %6381 = vmatpush1.bf16.msra.mxu0 %v6380_v20  ;;  %v7019_v20 = vmov -1.0  }
 0xfd7   :  { %1756 = vmatmul.mubr.f32.vlgmr.msra.gmra.mrb[10].mxu0 %v5434_v21 }
 0xfd8   :  { %5465 = vmatprep.mubr.msk.f32.mxu0 %vm171_vm0, %v5437_v23 }
 0xfdb   :  { %1761 = vmatmul.mubr.f32.gmra.mrb[12].mxu0 %v5436_v26 }
0x107a   :  { %v5905_v40 = vpop.f32.mrb[8].mxu0 }
0x107b   :  { %v1451_v41 = vadd.f32 %v5905_v40, %v5426_v39  ;;  %v1445_v42 = vpop.f32.mrb[9].mxu0 }
0x107c   :  { %v1446_v44 = vadd.f32 %v5426_v39, %v1445_v42  ;;  %v5463_v39 = vld [vmem:[%s7042_s13 + $0x18] sm:$0xff]  ;;  %s8015_s13 = smov 16  }
0x107d   :  { %v1457_v45 = vmul.f32 0.70710677, %v1451_v41  ;;  %v1455_v34 = vmul.f32 0.5, %v1451_v41 }
0x107e   :  { %v1456_v47 = vmul.f32 0.70710677, %v1446_v44  ;;  %v1454_v30 = vmul.f32 0.5, %v1446_v44 }
0x107f   :  { %v1463_v49 = vand.u32 2147483647, %v1457_v45  ;;  %vm1459_vm6 = vcmp.ge.f32.partialorder %v1457_v45, 0.0 }
0x1080   :  { %v1462_v50 = vand.u32 2147483647, %v1456_v47  ;;  %vm1458_vm7 = vcmp.ge.f32.partialorder %v1456_v47, 0.0  ;;  %v1461_v21 = vsel %vm1459_vm6, 1.0, %v7019_v20 }
0x1081   :  { %v1465_v51 = vmul.f32 0.3275911, %v1463_v49  ;;  %v1491_v55 = vsub.f32 0.0, %v1463_v49  ;;  %v1460_v27 = vsel %vm1458_vm7, 1.0, %v7019_v20 }
0x1082   :  { %v1464_v52 = vmul.f32 0.3275911, %v1462_v50  ;;  %v1490_v56 = vsub.f32 0.0, %v1462_v50 }
0x1083   :  { %v1467_v53 = vadd.f32 1.0, %v1465_v51  ;;  %v1493_v57 = vmul.f32 %v1491_v55, %v1463_v49 }
0x1084   :  { %v1466_v54 = vadd.f32 1.0, %v1464_v52  ;;  %v1492_v60 = vmul.f32 %v1490_v56, %v1462_v50 }
0x1085   :  { %6831 = vrcp.f32 %v1467_v53  ;;  %v1496_v63 = vmul.f32 1.442695, %v1493_v57  ;;  %v5470_v57 = vld [vmem:[%s7057_s25 + $0x20] sm:$0xff] }
0x1086   :  { %6833 = vrcp.f32 %v1466_v54  ;;  %v1494_v1 = vmul.f32 1.442695, %v1492_v60 }
0x1087   :  { %6835 = vpow2.f32 %v1496_v63 }
0x1088   :  { %6837 = vpow2.f32 %v1494_v1 }
0x108f   :  { %v6832_v46 = vpop.eup %6831 }
0x1090   :  { %v6834_v58 = vpop.eup %6833  ;;  %v1473_v59 = vmul.f32 1.0614054, %v6832_v46 }
0x1091   :  { %v1472_v61 = vmul.f32 1.0614054, %v6834_v58  ;;  %v6836_v15 = vpop.eup %6835 }
0x1092   :  { %v1475_v62 = vadd.f32 -1.4531521, %v1473_v59  ;;  %v6838_v16 = vpop.eup %6837  ;;  %v5472_v59 = vld [vmem:[%s7057_s25 + $0x30] sm:$0xff] }
0x1093   :  { %v1474_v0 = vadd.f32 -1.4531521, %v1472_v61  ;;  %v5473_v61 = vld [vmem:[%s7057_s25 + $0x38] sm:$0xff] }
0x1094   :  { %v1477_v24 = vmul.f32 %v6832_v46, %v1475_v62  ;;  %v6386_v62 = vpack.c.bf16 %v5473_v61, %v5472_v59 }
0x1095   :  { %v1476_v22 = vmul.f32 %v6834_v58, %v1474_v0 }
0x1096   :  { %v1479_v2 = vadd.f32 1.4214138, %v1477_v24  ;;  %v7499_v24 = vld [vmem:[%s8014_s5] ss:$0 sm:$0xff] }
0x1097   :  { %v1478_v6 = vadd.f32 1.4214138, %v1476_v22 }
0x1098   :  { %v1481_v7 = vmul.f32 %v6832_v46, %v1479_v2 }
0x1099   :  { %v1480_v5 = vmul.f32 %v6834_v58, %v1478_v6 }
0x109a   :  { %v1483_v8 = vadd.f32 -0.28449672, %v1481_v7 }
0x109b   :  { %v1482_v9 = vadd.f32 -0.28449672, %v1480_v5 }
0x109c   :  { %v1485_v4 = vmul.f32 %v6832_v46, %v1483_v8 }
0x109d   :  { %v1484_v12 = vmul.f32 %v6834_v58, %v1482_v9 }
0x109e   :  { %v1487_v13 = vadd.f32 0.2548296, %v1485_v4 }
0x109f   :  { %v1486_v14 = vadd.f32 0.2548296, %v1484_v12  ;;  %v5468_v12 = vld [vmem:[%s7047_s17 + $0x1] ss:$0 sm:$0xff]  ;;  %s8016_s17 = sld [smem:[#allocation10_spill]] }
0x10a0   :  { %v1489_v48 = vmul.f32 %v6832_v46, %v1487_v13 }
0x10a1   :  { %v1488_v43 = vmul.f32 %v6834_v58, %v1486_v14  ;;  %v5471_v58 = vld [vmem:[%s7057_s25 + $0x28] sm:$0xff]  ;;  %v5469_v14 = vld [vmem:[%s7052_s21 + $0x1] ss:$0 sm:$0xff]  ;;  %s8017_s21 = sld [smem:[#allocation7_spill]]  ;;  %s8018_s25 = sld [smem:[#allocation8_spill]] }
0x10a2   :  { %v1499_v17 = vmul.f32 %v6836_v15, %v1489_v48  ;;  %v6382_v60 = vpack.c.bf16 %v5471_v58, %v5470_v57 }
0x10a3   :  { %v1498_v18 = vmul.f32 %v6838_v16, %v1488_v43 }
0x10a4   :  { %v1501_v19 = vsub.f32 1.0, %v1499_v17  ;;  %6383 = vmatprep.subr.bf16.mxu1 %v6382_v60 }
0x10a5   :  { %v1500_v23 = vsub.f32 1.0, %v1498_v18  ;;  %v5475_v18 = vld [vmem:[%s7062_s29 + $0x1] ss:$0 sm:$0xff]  ;;  %s8019_s29 = sld [smem:[#allocation12_spill]] }
0x10a6   :  { %v1503_v26 = vmul.f32 %v1501_v19, %v1461_v21 }
0x10a7   :  { %v1502_v31 = vmul.f32 %v1500_v23, %v1460_v27 }
0x10a8   :  { %v1505_v33 = vadd.f32 1.0, %v1503_v26 }
0x10a9   :  { %v1504_v32 = vadd.f32 1.0, %v1502_v31 }
0x10aa   :  { %v1757_v35 = vpop.f32.mrb[10].mxu0  ;;  %v1507_v38 = vmul.f32 %v1505_v33, %v1455_v34 }
0x10ab   :  { %v1506_v36 = vmul.f32 %v1504_v32, %v1454_v30  ;;  %v7477_v37 = vadd.f32 %v5462_v28, %v1757_v35  ;;  %v1759_v25 = vpop.f32.mrb[11].mxu0  ;;  %v7535_v35 = vld [vmem:[%s7117_s4] sm:$0xff] }
0x10ac   :  { %v7539_v25 = vld [vmem:[%s7117_s4 + $0x8] sm:$0xff] }
0x10ad   :  { %v1770_v40 = vsel %vm255_vm1, %v7477_v37, 0.0  ;;  %5922 = vmatprep.mubr.msk.f32.mxu1 %vm171_vm0, %v1506_v36 }
0x10ae   :  { %v1762_v42 = vpop.f32.mrb[12].mxu0  ;;  %1771 = vadd.xlane.f32.xlu0 %v1770_v40  ;;  %5923 = vmatmul.mubr.msk.f32.vlgmr.msra.gmra.mrb[16].mxu1 %vm171_vm0, %v1507_v38 }
0x10af   :  { %v7484_v45 = vadd.f32 %v5463_v39, %v1762_v42  ;;  %v1764_v41 = vpop.f32.mrb[13].mxu0  ;;  %6385 = vmatpush3.bf16.msra.mxu1 %v6382_v60 }
0x10b0   :  { %6387 = vmatprep.subr.bf16.mxu1 %v6386_v62 }
0x10b1   :  { %v1773_v44 = vsel %vm255_vm1, %v7484_v45, 0.0 }
0x10b2   :  { %1774 = vadd.xlane.f32.xlu1 %v1773_v44 }
0x10b3   :  { %6389 = vmatpush3.bf16.msra.mxu1 %v6386_v62 }
0x113b   :  { %v1772_v47 = vpop.xlane.xlu0 %1771 }
0x113c   :  { %v1776_v49 = vmul.f32 0.03125, %v1772_v47 }
0x113e   :  { %v1778_v50 = vsub.f32 %v7477_v37, %v1776_v49 }
0x113f   :  { %v1775_v51 = vpop.xlane.xlu1 %1774 }
0x1140   :  { %v1777_v52 = vmul.f32 0.03125, %v1775_v51  ;;  %v1780_v53 = vmul.f32 %v1778_v50, %v1778_v50 }
0x1142   :  { %v1779_v54 = vsub.f32 %v7484_v45, %v1777_v52  ;;  %v1782_v55 = vsel %vm255_vm1, %v1780_v53, 0.0 }
0x1143   :  { %1783 = vadd.xlane.f32.xlu0 %v1782_v55 }
0x1144   :  { %v1781_v56 = vmul.f32 %v1779_v54, %v1779_v54 }
0x1146   :  { %v1785_v46 = vsel %vm255_vm1, %v1781_v56, 0.0 }
0x1147   :  { %1786 = vadd.xlane.f32.xlu1 %v1785_v46 }
0x1181   :  { %v7496_v63 = vpop.f32.mrb[16].mxu1 }
0x1182   :  { %v1588_v0 = vpop.f32.mrb[17].mxu1 }
0x1183   :  { %v1597_v1 = vadd.f32 %v1588_v0, %v7405_v11 }
0x1185   :  { %v7503_v22 = vadd.f32 %v7499_v24, %v1597_v1 }
0x11d0   :  { %v1784_v2 = vpop.xlane.xlu0 %1783 }
0x11d1   :  { %v1788_v6 = vmul.f32 0.03125, %v1784_v2 }
0x11d3   :  { %v1790_v7 = vadd.f32 1e-06, %v1788_v6 }
0x11d4   :  { %v1787_v5 = vpop.xlane.xlu1 %1786 }
0x11d5   :  { %6839 = vrsqrt.f32 %v1790_v7  ;;  %v1789_v8 = vmul.f32 0.03125, %v1787_v5 }
0x11d7   :  { %v1791_v9 = vadd.f32 1e-06, %v1789_v8 }
0x11d9   :  { %6841 = vrsqrt.f32 %v1791_v9 }
0x11df   :  { %v6840_v4 = vpop.eup %6839 }
0x11e0   :  { %v1794_v13 = vmul.f32 %v6840_v4, %v1778_v50 }
0x11e2   :  { %v1802_v48 = vmul.f32 %v5468_v12, %v1794_v13 }
0x11e3   :  { %v6842_v15 = vpop.eup %6841 }
0x11e4   :  { %v1795_v43 = vmul.f32 %v6842_v15, %v1779_v54  ;;  %v1810_v11 = vadd.f32 %v5469_v14, %v1802_v48 }
0x11e6   :  { %v1803_v16 = vmul.f32 %v5468_v12, %v1795_v43  ;;  %5933 = vmatprep.mubr.msk.f32.mxu1 %vm255_vm1, %v1810_v11 }
0x11e8   :  { %v1811_v17 = vadd.f32 %v5469_v14, %v1803_v16 }
0x11ea   :  { %5934 = vmatmul.mubr.msk.f32.vlgmr.msra.gmra.mrb[18].mxu1 %vm255_vm1, %v1811_v17 }
0x12bd   :  { %v5935_v19 = vpop.f32.mrb[18].mxu1 }
0x12be   :  { %v7510_v21 = vadd.f32 %v5935_v19, %v5475_v18  ;;  %v1897_v23 = vpop.f32.mrb[19].mxu1 }
0x12bf   :  { %v7512_v26 = vadd.f32 %v5475_v18, %v1897_v23 }
0x12c1   :  { %5940 = vmatprep.mubr.msk.f32.mxu1 %vm397_vm2, %v7512_v26  ;;  %v7518_v27 = vpack.i.bf16 %v7510_v21, %v7512_v26 }
0x12c3   :  { %6682 = vrot.lane.b32.xlu0 %v7518_v27, %s7005_s0 }
0x12c7   :  { %6692 = vrot.lane.b32.xlu0 %v7518_v27, %s7006_s7 }
0x12cb   :  { %2104 = vrot.lane.b32.xlu0 %v7512_v26, %s7007_s10 }
0x12cf   :  { %2106 = vrot.lane.b32.xlu0 %v7510_v21, %s7007_s10 }
0x1335   :  { %v6683_v31 = vpop.permute.xlu0 %6682 }
0x1336   :  { %v6685_v33 = vunpack.i.h.bf16 %v6683_v31  ;;  %v6684_v28 = vunpack.i.l.bf16 %v6683_v31 }
0x1338   :  { %v6390_v30 = vpack.c.bf16 %v6685_v33, %v6684_v28 }
0x1339   :  { %v6693_v46 = vpop.permute.xlu0 %6692 }
0x133a   :  { %6392 = vmatprep.subr.msk.bf16.mxu1 %vm7284_vm3, %v6390_v30  ;;  %v6695_v58 = vunpack.i.h.bf16 %v6693_v46  ;;  %v6694_v59 = vunpack.i.l.bf16 %v6693_v46 }
0x133b   :  { %6395 = vmatpush3.bf16.xpose.msk.msra.mxu1 %vm7284_vm3, %v6390_v30 }
0x133c   :  { %v6400_v0 = vpack.c.bf16 %v6695_v58, %v6694_v59 }
0x133d   :  { %v2105_v5 = vpop.permute.xlu0 %2104 }
0x1341   :  { %v2107_v8 = vpop.permute.xlu0 %2106 }
0x1342   :  { %5941 = vmatmul.mubr.msk.f32.vlgmr.msra.gmra.mrb[20].mxu1 %vm397_vm2, %v7510_v21 }
0x1415   :  { %v5942_v32 = vpop.f32.mrb[20].mxu1 }
0x1416   :  { %v1986_v34 = vpop.f32.mrb[21].mxu1  ;;  %v1992_v38 = vadd.f32 %v7539_v25, %v5942_v32 }
0x1417   :  { %v1987_v36 = vadd.f32 %v7535_v35, %v1986_v34 }
0x1418   :  { %v1998_v40 = vsel %vm481_vm4, %v1992_v38, -inf }
0x1419   :  { %v1995_v39 = vsel %vm481_vm4, %v1987_v36, -inf }
0x141a   :  { %1996 = vmax.xlane.f32.xlu1 %v1995_v39 }
0x141e   :  { %1999 = vmax.xlane.f32.xlu1 %v1998_v40 }
0x14a7   :  { %v1997_v42 = vpop.xlane.xlu1 %1996 }
0x14a8   :  { %v2001_v41 = vsub.f32 %v1987_v36, %v1997_v42 }
0x14aa   :  { %v2003_v49 = vmul.f32 1.442695, %v2001_v41 }
0x14ab   :  { %v2000_v44 = vpop.xlane.xlu1 %1999 }
0x14ac   :  { %v2002_v47 = vsub.f32 %v1992_v38, %v2000_v44 }
0x14ae   :  { %v2005_v50 = vmul.f32 1.442695, %v2002_v47 }
0x14b0   :  { %6843 = vpow2.f32 %v2005_v50 }
0x14b1   :  { %6845 = vpow2.f32 %v2003_v49 }
0x14ba   :  { %v6844_v51 = vpop.eup %6843 }
0x14bb   :  { %v2010_v52 = vsel %vm481_vm4, %v6844_v51, 0.0  ;;  %v6846_v53 = vpop.eup %6845 }
0x14bc   :  { %2011 = vadd.xlane.f32.xlu1 %v2010_v52  ;;  %v2007_v54 = vsel %vm481_vm4, %v6846_v53, 0.0 }
0x14c0   :  { %2008 = vadd.xlane.f32.xlu1 %v2007_v54 }
0x14d1   :  { %6687 = vrot.lane.b32.xlu1 %v7518_v27, %s7008_s11  ;;  %s8027_s11 = sld [smem:[#allocation19_spill]] }
0x1549   :  { %v2012_v55 = vpop.xlane.xlu1 %2011 }
0x154a   :  { %6847 = vrcp.f32 %v2012_v55 }
0x154d   :  { %v2009_v56 = vpop.xlane.xlu1 %2008 }
0x154e   :  { %6849 = vrcp.f32 %v2009_v56 }
0x1551   :  { %v6688_v57 = vpop.permute.xlu1 %6687 }
0x1552   :  { %v6690_v60 = vunpack.i.h.bf16 %v6688_v57  ;;  %v6689_v61 = vunpack.i.l.bf16 %v6688_v57 }
0x1554   :  { %v6396_v62 = vpack.c.bf16 %v6690_v60, %v6689_v61  ;;  %v6848_v1 = vpop.eup %6847 }
0x1555   :  { %v2016_v7 = vmul.f32 %v6848_v1, %v6844_v51 }
0x1556   :  { %6397 = vmatprep.subr.bf16.mxu1 %v6396_v62 }
0x1557   :  { %6399 = vmatpush3.bf16.msra.mxu1 %v6396_v62 }
0x1558   :  { %v6850_v2 = vpop.eup %6849  ;;  %6402 = vmatprep.subr.msk.bf16.mxu1 %vm7284_vm3, %v6400_v0 }
0x1559   :  { %v2014_v6 = vmul.f32 %v6850_v2, %v6846_v53 }
0x155b   :  { %5947 = vmatprep.mubr.msk.f32.mxu1 %vm481_vm4, %v2014_v6 }
0x155c   :  { %5948 = vmatmul.mubr.msk.f32.vlgmr.msra.gmra.mrb[22].mxu1 %vm481_vm4, %v2016_v7 }
0x155d   :  { %5954 = vmatprep.mubr.msk.f32.mxu1 %vm397_vm2, %v2105_v5 }
0x1560   :  { %6405 = vmatpush3.bf16.xpose.msk.msra.mxu1 %vm7284_vm3, %v6400_v0 }
0x1567   :  { %5955 = vmatmul.mubr.msk.f32.vlgmr.msra.gmra.mrb[24].mxu1 %vm397_vm2, %v2107_v8 }
0x162f   :  { %v7556_v9 = vpop.f32.mrb[22].mxu1 }
0x1630   :  { %v7558_v4 = vpop.f32.mrb[23].mxu1 }
0x163a   :  { %v5956_v12 = vpop.f32.mrb[24].mxu1 }
0x163b   :  { %v2192_v13 = vadd.f32 %v7539_v25, %v5956_v12  ;;  %v2186_v14 = vpop.f32.mrb[25].mxu1 }
0x163c   :  { %v2187_v48 = vadd.f32 %v7535_v35, %v2186_v14 }
0x163d   :  { %v2198_v15 = vsel %vm481_vm4, %v2192_v13, -inf }
0x163e   :  { %2199 = vmax.xlane.f32.xlu0 %v2198_v15  ;;  %v2195_v43 = vsel %vm481_vm4, %v2187_v48, -inf }
0x163f   :  { %2196 = vmax.xlane.f32.xlu1 %v2195_v43 }
0x1650   :  { %6697 = vrot.lane.b32.xlu1 %v7518_v27, %s7009_s15  ;;  %s8028_s15 = sld [smem:[#allocation9_spill]] }
0x1654   :  { %6707 = vrot.lane.b32.xlu1 %v7518_v27, %s7014_s26 }
0x1658   :  { %2304 = vrot.lane.b32.xlu1 %v7512_v26, %s7010_s16 }
0x165c   :  { %2306 = vrot.lane.b32.xlu1 %v7510_v21, %s7010_s16 }
0x1660   :  { %2506 = vrot.lane.b32.xlu1 %v7510_v21, %s7013_s23 }
0x16cb   :  { %v2200_v11 = vpop.xlane.xlu0 %2199 }
0x16cc   :  { %v2202_v16 = vsub.f32 %v2192_v13, %v2200_v11  ;;  %v2197_v17 = vpop.xlane.xlu1 %2196 }
0x16cd   :  { %v2201_v18 = vsub.f32 %v2187_v48, %v2197_v17 }
0x16ce   :  { %v2205_v19 = vmul.f32 1.442695, %v2202_v16 }
0x16cf   :  { %v2203_v23 = vmul.f32 1.442695, %v2201_v18 }
0x16d0   :  { %6851 = vpow2.f32 %v2205_v19  ;;  %v6698_v31 = vpop.permute.xlu1 %6697 }
0x16d1   :  { %v6700_v33 = vunpack.i.h.bf16 %v6698_v31  ;;  %v6699_v28 = vunpack.i.l.bf16 %v6698_v31  ;;  %6853 = vpow2.f32 %v2203_v23 }
0x16d3   :  { %v6406_v30 = vpack.c.bf16 %v6700_v33, %v6699_v28 }
0x16d4   :  { %v6708_v47 = vpop.permute.xlu1 %6707 }
0x16d5   :  { %6407 = vmatprep.subr.bf16.mxu1 %v6406_v30  ;;  %v6710_v51 = vunpack.i.h.bf16 %v6708_v47  ;;  %v6709_v52 = vunpack.i.l.bf16 %v6708_v47 }
0x16d6   :  { %6409 = vmatpush3.bf16.msra.mxu1 %v6406_v30 }
0x16d8   :  { %v2305_v55 = vpop.permute.xlu1 %2304 }
0x16da   :  { %v6852_v32 = vpop.eup %6851 }
0x16db   :  { %v2210_v34 = vsel %vm481_vm4, %v6852_v32, 0.0  ;;  %v6854_v36 = vpop.eup %6853 }
0x16dc   :  { %2211 = vadd.xlane.f32.xlu0 %v2210_v34  ;;  %v2207_v21 = vsel %vm481_vm4, %v6854_v36, 0.0  ;;  %v2307_v56 = vpop.permute.xlu1 %2306 }
0x16e0   :  { %2208 = vadd.xlane.f32.xlu0 %v2207_v21  ;;  %v2507_v57 = vpop.permute.xlu1 %2506 }
0x16f6   :  { %6702 = vrot.lane.b32.xlu0 %v7518_v27, %s7011_s18 }
0x16fa   :  { %2504 = vrot.lane.b32.xlu0 %v7512_v26, %s7013_s23  ;;  %v6420_v26 = vpack.c.bf16 %v6710_v51, %v6709_v52 }
0x1769   :  { %v2212_v38 = vpop.xlane.xlu0 %2211 }
0x176a   :  { %6855 = vrcp.f32 %v2212_v38 }
0x176d   :  { %v2209_v39 = vpop.xlane.xlu0 %2208 }
0x176e   :  { %6857 = vrcp.f32 %v2209_v39 }
0x1771   :  { %v6703_v40 = vpop.permute.xlu0 %6702 }
0x1772   :  { %v6705_v42 = vunpack.i.h.bf16 %v6703_v40  ;;  %v6704_v41 = vunpack.i.l.bf16 %v6703_v40 }
0x1774   :  { %v6410_v44 = vpack.c.bf16 %v6705_v42, %v6704_v41  ;;  %v6856_v49 = vpop.eup %6855 }
0x1775   :  { %v2216_v54 = vmul.f32 %v6856_v49, %v6852_v32  ;;  %v2505_v46 = vpop.permute.xlu0 %2504 }
0x1776   :  { %6412 = vmatprep.subr.msk.bf16.mxu1 %vm7284_vm3, %v6410_v44 }
0x1778   :  { %v6858_v50 = vpop.eup %6857 }
0x1779   :  { %v2214_v53 = vmul.f32 %v6858_v50, %v6854_v36 }
0x177b   :  { %5961 = vmatprep.mubr.msk.f32.mxu1 %vm481_vm4, %v2214_v53 }
0x177c   :  { %5962 = vmatmul.mubr.msk.f32.vlgmr.msra.gmra.mrb[26].mxu1 %vm481_vm4, %v2216_v54 }
0x177d   :  { %6415 = vmatpush3.bf16.xpose.msk.msra.mxu1 %vm7284_vm3, %v6410_v44  ;;  %5968 = vmatprep.mubr.msk.f32.mxu1 %vm397_vm2, %v2305_v55 }
0x177e   :  { %6422 = vmatprep.subr.msk.bf16.mxu1 %vm7284_vm3, %v6420_v26 }
0x1784   :  { %5969 = vmatmul.mubr.msk.f32.vlgmr.msra.gmra.mrb[28].mxu1 %vm397_vm2, %v2307_v56 }
0x1785   :  { %6425 = vmatpush3.bf16.xpose.msk.msra.mxu1 %vm7284_vm3, %v6420_v26  ;;  %5982 = vmatprep.mubr.msk.f32.mxu1 %vm397_vm2, %v2505_v46 }
0x178c   :  { %5983 = vmatmul.mubr.msk.f32.vlgmr.msra.gmra.mrb[30].mxu1 %vm397_vm2, %v2507_v57 }
0x184f   :  { %v5963_v58 = vpop.f32.mrb[26].mxu1 }
0x1850   :  { %v2295_v59 = vpop.f32.mrb[27].mxu1 }
0x1857   :  { %v5970_v60 = vpop.f32.mrb[28].mxu1 }
0x1858   :  { %v2392_v61 = vadd.f32 %v7539_v25, %v5970_v60  ;;  %v2386_v62 = vpop.f32.mrb[29].mxu1 }
0x1859   :  { %v2387_v0 = vadd.f32 %v7535_v35, %v2386_v62  ;;  %v5503_v62 = vld [vmem:[%s7067_s3 + $0x28] sm:$0xff] }
0x185a   :  { %v2398_v1 = vsel %vm481_vm4, %v2392_v61, -inf }
0x185b   :  { %2399 = vmax.xlane.f32.xlu1 %v2398_v1  ;;  %v2395_v2 = vsel %vm481_vm4, %v2387_v0, -inf  ;;  %v5504_v1 = vld [vmem:[%s7067_s3 + $0x30] sm:$0xff] }
0x185c   :  { %2396 = vmax.xlane.f32.xlu0 %v2395_v2  ;;  %v5505_v2 = vld [vmem:[%s7067_s3 + $0x38] sm:$0xff] }
0x185f   :  { %v5984_v6 = vpop.f32.mrb[30].mxu1 }
0x1860   :  { %v2586_v7 = vpop.f32.mrb[31].mxu1  ;;  %v2592_v8 = vadd.f32 %v7539_v25, %v5984_v6  ;;  %v6434_v6 = vpack.c.bf16 %v5505_v2, %v5504_v1 }
0x1861   :  { %v2587_v5 = vadd.f32 %v7535_v35, %v2586_v7 }
0x1862   :  { %v2598_v13 = vsel %vm481_vm4, %v2592_v8, -inf }
0x1863   :  { %v2595_v12 = vsel %vm481_vm4, %v2587_v5, -inf }
0x1864   :  { %2596 = vmax.xlane.f32.xlu0 %v2595_v12 }
0x1868   :  { %2599 = vmax.xlane.f32.xlu0 %v2598_v13 }
0x18e8   :  { %v2400_v14 = vpop.xlane.xlu1 %2399 }
0x18e9   :  { %v2402_v48 = vsub.f32 %v2392_v61, %v2400_v14  ;;  %v2397_v15 = vpop.xlane.xlu0 %2396  ;;  %v5502_v61 = vld [vmem:[%s7067_s3 + $0x20] sm:$0xff]  ;;  %s8020_s3 = sld [smem:[#allocation11_spill]] }
0x18ea   :  { %v2401_v43 = vsub.f32 %v2387_v0, %v2397_v15  ;;  %v6430_v0 = vpack.c.bf16 %v5503_v62, %v5502_v61  ;;  %v5512_v61 = vld [vmem:[%s7077_s14 + $0x1] ss:$0 sm:$0xff]  ;;  %s8022_s14 = sld [smem:[#allocation16_spill]] }
0x18eb   :  { %v2405_v11 = vmul.f32 1.442695, %v2402_v48 }
0x18ec   :  { %v2403_v16 = vmul.f32 1.442695, %v2401_v43 }
0x18ed   :  { %6859 = vpow2.f32 %v2405_v11 }
0x18ee   :  { %6861 = vpow2.f32 %v2403_v16 }
0x18f1   :  { %v2597_v17 = vpop.xlane.xlu0 %2596 }
0x18f2   :  { %v2601_v18 = vsub.f32 %v2587_v5, %v2597_v17 }
0x18f4   :  { %v2603_v19 = vmul.f32 1.442695, %v2601_v18 }
0x18f5   :  { %v2600_v23 = vpop.xlane.xlu0 %2599 }
0x18f6   :  { %6863 = vpow2.f32 %v2603_v19  ;;  %v2602_v31 = vsub.f32 %v2592_v8, %v2600_v23 }
0x18f7   :  { %v6860_v33 = vpop.eup %6859 }
0x18f8   :  { %v6862_v28 = vpop.eup %6861  ;;  %v2605_v30 = vmul.f32 1.442695, %v2602_v31  ;;  %v2410_v32 = vsel %vm481_vm4, %v6860_v33, 0.0 }
0x18f9   :  { %2411 = vadd.xlane.f32.xlu1 %v2410_v32  ;;  %v2407_v34 = vsel %vm481_vm4, %v6862_v28, 0.0 }
0x18fa   :  { %6865 = vpow2.f32 %v2605_v30  ;;  %2408 = vadd.xlane.f32.xlu0 %v2407_v34 }
0x1900   :  { %v6864_v36 = vpop.eup %6863 }
0x1901   :  { %v2607_v21 = vsel %vm481_vm4, %v6864_v36, 0.0 }
0x1902   :  { %2608 = vadd.xlane.f32.xlu0 %v2607_v21 }
0x1904   :  { %v6866_v38 = vpop.eup %6865 }
0x1905   :  { %v2610_v39 = vsel %vm481_vm4, %v6866_v38, 0.0 }
0x1906   :  { %2611 = vadd.xlane.f32.xlu1 %v2610_v39 }
0x1917   :  { %6717 = vrot.lane.b32.xlu1 %v7518_v27, %s7015_s28 }
0x1918   :  { %6712 = vrot.lane.b32.xlu0 %v7518_v27, %s7012_s22 }
0x191b   :  { %2706 = vrot.lane.b32.xlu1 %v2295_v59, %s7016_s1 }
0x191f   :  { %2708 = vrot.lane.b32.xlu1 %v5963_v58, %s7016_s1 }
0x1986   :  { %v2412_v42 = vpop.xlane.xlu1 %2411 }
0x1987   :  { %v2409_v40 = vpop.xlane.xlu0 %2408 }
0x1988   :  { %6867 = vrcp.f32 %v2409_v40 }
0x1989   :  { %6869 = vrcp.f32 %v2412_v42 }
0x198f   :  { %v2609_v41 = vpop.xlane.xlu0 %2608 }
0x1990   :  { %6871 = vrcp.f32 %v2609_v41 }
0x1992   :  { %v6868_v44 = vpop.eup %6867 }
0x1993   :  { %v2612_v47 = vpop.xlane.xlu1 %2611  ;;  %v6713_v49 = vpop.permute.xlu0 %6712  ;;  %v2414_v50 = vmul.f32 %v6868_v44, %v6862_v28  ;;  %v5509_v28 = vld [vmem:[%s7072_s8 + $0x1] ss:$0 sm:$0xff]  ;;  %s8021_s8 = sld [smem:[#allocation13_spill]] }
0x1994   :  { %6873 = vrcp.f32 %v2612_v47  ;;  %v6715_v51 = vunpack.i.h.bf16 %v6713_v49  ;;  %v6714_v52 = vunpack.i.l.bf16 %v6713_v49  ;;  %v6870_v53 = vpop.eup %6869 }
0x1995   :  { %5975 = vmatprep.mubr.msk.f32.mxu0 %vm481_vm4, %v2414_v50  ;;  %v2416_v46 = vmul.f32 %v6870_v53, %v6860_v33  ;;  %v1610_v50 = vsel %vm255_vm1, %v7503_v22, 0.0  ;;  %v5516_v53 = vld [vmem:[%s7087_s24 + $0x30] sm:$0xff] }
0x1996   :  { %v6416_v27 = vpack.c.bf16 %v6715_v51, %v6714_v52  ;;  %v5514_v51 = vld [vmem:[%s7087_s24 + $0x20] sm:$0xff]  ;;  %v5515_v52 = vld [vmem:[%s7087_s24 + $0x28] sm:$0xff] }
0x1997   :  { %v6718_v54 = vpop.permute.xlu1 %6717 }
0x1998   :  { %v6720_v26 = vunpack.i.h.bf16 %v6718_v54  ;;  %v6719_v55 = vunpack.i.l.bf16 %v6718_v54  ;;  %6417 = vmatprep.subr.bf16.mxu0 %v6416_v27  ;;  %v5517_v54 = vld [vmem:[%s7087_s24 + $0x38] sm:$0xff]  ;;  %s8024_s24 = sld [smem:[#allocation14_spill]] }
0x1999   :  { %6419 = vmatpush3.bf16.msra.mxu0 %v6416_v27  ;;  %v6438_v27 = vpack.c.bf16 %v5515_v52, %v5514_v51 }
0x199a   :  { %v6872_v56 = vpop.eup %6871  ;;  %v6426_v57 = vpack.c.bf16 %v6720_v26, %v6719_v55  ;;  %v6442_v26 = vpack.c.bf16 %v5517_v54, %v5516_v53 }
0x199b   :  { %v2614_v58 = vmul.f32 %v6872_v56, %v6864_v36  ;;  %v2707_v13 = vpop.permute.xlu1 %2706  ;;  %6439 = vmatprep.subr.bf16.mxu1 %v6438_v27 }
0x199c   :  { %5976 = vmatmul.mubr.msk.f32.vlgmr.msra.gmra.mrb[14].mxu0 %vm481_vm4, %v2416_v46  ;;  %6427 = vmatprep.subr.bf16.mxu0 %v6426_v57  ;;  %v2728_v43 = vsel %vm397_vm2, %v7558_v4, %v2707_v13  ;;  %v1598_v4 = vadd.f32 %v7496_v63, %v7403_v10  ;;  %v5523_v13 = vld [vmem:[%s7097_s6 + $0x48] sm:$0xff] }
0x199d   :  { %6429 = vmatpush3.bf16.msra.mxu0 %v6426_v57  ;;  %5989 = vmatprep.mubr.msk.f32.mxu0 %vm481_vm4, %v2614_v58 }
0x199e   :  { %v6874_v59 = vpop.eup %6873  ;;  %6431 = vmatprep.subr.bf16.mxu0 %v6430_v0  ;;  %6441 = vmatpush3.bf16.msra.mxu1 %v6438_v27 }
0x199f   :  { %v2616_v60 = vmul.f32 %v6874_v59, %v6866_v38  ;;  %v2709_v14 = vpop.permute.xlu1 %2708  ;;  %v7646_v38 = vadd.f32 %v7499_v24, %v1598_v4  ;;  %6443 = vmatprep.subr.bf16.mxu1 %v6442_v26 }
0x19a0   :  { %v2729_v16 = vsel %vm397_vm2, %v7556_v9, %v2709_v14 }
0x19a1   :  { %5990 = vmatmul.mubr.msk.f32.vlgmr.msra.gmra.mrb[16].mxu0 %vm481_vm4, %v2616_v60  ;;  %v1613_v10 = vsel %vm255_vm1, %v7646_v38, 0.0 }
0x19a2   :  { %6433 = vmatpush3.bf16.msra.mxu0 %v6430_v0  ;;  %6445 = vmatpush3.bf16.msra.mxu1 %v6442_v26  ;;  %v5513_v0 = vld [vmem:[%s7082_s19 + $0x1] ss:$0 sm:$0xff]  ;;  %s8023_s19 = sld [smem:[#allocation17_spill]] }
0x19a3   :  { %6435 = vmatprep.subr.bf16.mxu0 %v6434_v6 }
0x19a6   :  { %6437 = vmatpush3.bf16.msra.mxu0 %v6434_v6 }
0x1a6f   :  { %v5977_v7 = vpop.f32.mrb[14].mxu0 }
0x1a70   :  { %2716 = vrot.lane.b32.xlu1 %v5977_v7, %s8015_s13  ;;  %v2495_v5 = vpop.f32.mrb[15].mxu0 }
0x1a71   :  { %2714 = vrot.lane.b32.xlu0 %v2495_v5, %s8015_s13 }
0x1a74   :  { %v5991_v8 = vpop.f32.mrb[16].mxu0 }
0x1a75   :  { %2724 = vrot.lane.b32.xlu1 %v5991_v8, %s7018_s2  ;;  %v2695_v12 = vpop.f32.mrb[17].mxu0 }
0x1a76   :  { %2722 = vrot.lane.b32.xlu0 %v2695_v12, %s7018_s2  ;;  %v5522_v12 = vld [vmem:[%s7097_s6 + $0x40] sm:$0xff] }
0x1a77   :  { %v6446_v14 = vpack.c.bf16 %v5523_v13, %v5522_v12 }
0x1a79   :  { %6447 = vmatprep.subr.bf16.mxu0 %v6446_v14 }
0x1ae2   :  { %v2717_v48 = vpop.permute.xlu1 %2716 }
0x1ae3   :  { %v2715_v15 = vpop.permute.xlu0 %2714  ;;  %v2731_v19 = vsel %vm481_vm4, %v2729_v16, %v2717_v48  ;;  %v5524_v48 = vld [vmem:[%s7097_s6 + $0x50] sm:$0xff]  ;;  %v5527_v16 = vld [vmem:[%s7097_s6 + $0x68] sm:$0xff] }
0x1ae4   :  { %v2730_v17 = vsel %vm481_vm4, %v2728_v43, %v2715_v15  ;;  %v5525_v15 = vld [vmem:[%s7097_s6 + $0x58] sm:$0xff] }
0x1ae5   :  { %v6450_v43 = vpack.c.bf16 %v5525_v15, %v5524_v48 }
0x1ae7   :  { %v2725_v11 = vpop.permute.xlu1 %2724 }
0x1ae8   :  { %v2723_v18 = vpop.permute.xlu0 %2722  ;;  %v2733_v31 = vsel %vm1219_vm5, %v2731_v19, %v2725_v11  ;;  %v5526_v11 = vld [vmem:[%s7097_s6 + $0x60] sm:$0xff]  ;;  %v5529_v19 = vld [vmem:[%s7097_s6 + $0x78] sm:$0xff] }
0x1ae9   :  { %v2732_v23 = vsel %vm1219_vm5, %v2730_v17, %v2723_v18  ;;  %v6454_v17 = vpack.c.bf16 %v5527_v16, %v5526_v11  ;;  %v5528_v18 = vld [vmem:[%s7097_s6 + $0x70] sm:$0xff]  ;;  %s8025_s6 = sld [smem:[#allocation18_spill]] }
0x1aea   :  { %6000 = vmatprep.mubr.msk.f32.mxu0 %vm255_vm1, %v2732_v23  ;;  %v6458_v23 = vpack.c.bf16 %v5529_v19, %v5528_v18 }
0x1aeb   :  { %6001 = vmatmul.mubr.msk.f32.vlgmr.msra.gmra.mrb[18].mxu0 %vm255_vm1, %v2733_v31  ;;  %v5519_v31 = vld [vmem:[%s8013_s9 + $0x1] ss:$0 sm:$0xff] }
0x1aec   :  { %6449 = vmatpush3.bf16.msra.mxu0 %v6446_v14 }
0x1aed   :  { %6451 = vmatprep.subr.bf16.mxu0 %v6450_v43 }
0x1af0   :  { %6453 = vmatpush3.bf16.msra.mxu0 %v6450_v43 }
0x1af1   :  { %6455 = vmatprep.subr.bf16.mxu0 %v6454_v17 }
0x1af4   :  { %6457 = vmatpush3.bf16.msra.mxu0 %v6454_v17 }
0x1af5   :  { %6459 = vmatprep.subr.bf16.mxu0 %v6458_v23 }
0x1af8   :  { %6461 = vmatpush3.bf16.msra.mxu0 %v6458_v23 }
0x1bbe   :  { %v6002_v33 = vpop.f32.mrb[18].mxu0 }
0x1bbf   :  { %v2821_v9 = vadd.f32 %v6002_v33, %v7484_v45  ;;  %v2811_v30 = vpop.f32.mrb[19].mxu0 }
0x1bc0   :  { %v2820_v32 = vadd.f32 %v2811_v30, %v7477_v37 }
0x1bc1   :  { %v7639_v34 = vadd.f32 %v5509_v28, %v2821_v9 }
0x1bc2   :  { %v7641_v36 = vadd.f32 %v5509_v28, %v2820_v32 }
0x1bc3   :  { %v2839_v21 = vsel %vm255_vm1, %v7639_v34, 0.0 }
0x1bc4   :  { %2840 = vadd.xlane.f32.xlu1 %v2839_v21  ;;  %v2836_v39 = vsel %vm255_vm1, %v7641_v36, 0.0 }
0x1bc5   :  { %2837 = vadd.xlane.f32.xlu0 %v2836_v39 }
0x1bc8   :  { %1614 = vadd.xlane.f32.xlu1 %v1613_v10 }
0x1c51   :  { %v2841_v37 = vpop.xlane.xlu1 %2840 }
0x1c52   :  { %v2843_v45 = vmul.f32 0.03125, %v2841_v37  ;;  %v2838_v63 = vpop.xlane.xlu0 %2837 }
0x1c53   :  { %v2842_v40 = vmul.f32 0.03125, %v2838_v63 }
0x1c54   :  { %v2845_v42 = vsub.f32 %v7639_v34, %v2843_v45 }
0x1c55   :  { %v2844_v24 = vsub.f32 %v7641_v36, %v2842_v40 }
0x1c56   :  { %v2847_v47 = vmul.f32 %v2845_v42, %v2845_v42 }
0x1c57   :  { %v2846_v41 = vmul.f32 %v2844_v24, %v2844_v24 }
0x1c58   :  { %v2851_v49 = vsel %vm255_vm1, %v2847_v47, 0.0 }
0x1c59   :  { %v2848_v44 = vsel %vm255_vm1, %v2846_v41, 0.0 }
0x1c5a   :  { %2849 = vadd.xlane.f32.xlu0 %v2848_v44 }
0x1c5e   :  { %2852 = vadd.xlane.f32.xlu0 %v2851_v49 }
0x1c62   :  { %1611 = vadd.xlane.f32.xlu0 %v1610_v50 }
0x1ce7   :  { %v2850_v55 = vpop.xlane.xlu0 %2849 }
0x1ce8   :  { %v2854_v56 = vmul.f32 0.03125, %v2850_v55 }
0x1cea   :  { %v2856_v46 = vadd.f32 1e-06, %v2854_v56 }
0x1ceb   :  { %v2853_v57 = vpop.xlane.xlu0 %2852 }
0x1cec   :  { %6875 = vrsqrt.f32 %v2856_v46  ;;  %v2855_v58 = vmul.f32 0.03125, %v2853_v57 }
0x1cee   :  { %v2857_v59 = vadd.f32 1e-06, %v2855_v58 }
0x1cf0   :  { %6877 = vrsqrt.f32 %v2857_v59 }
0x1cf6   :  { %v6876_v60 = vpop.eup %6875 }
0x1cf7   :  { %v2860_v62 = vmul.f32 %v6876_v60, %v2844_v24 }
0x1cf9   :  { %v2868_v1 = vmul.f32 %v5512_v61, %v2860_v62 }
0x1cfa   :  { %v6878_v2 = vpop.eup %6877 }
0x1cfb   :  { %v2861_v6 = vmul.f32 %v6878_v2, %v2845_v42  ;;  %v2876_v7 = vadd.f32 %v5513_v0, %v2868_v1 }
0x1cfd   :  { %v2869_v5 = vmul.f32 %v5512_v61, %v2861_v6  ;;  %6011 = vmatprep.mubr.msk.f32.mxu1 %vm255_vm1, %v2876_v7 }
0x1cff   :  { %v2877_v8 = vadd.f32 %v5513_v0, %v2869_v5 }
0x1d01   :  { %6012 = vmatmul.mubr.msk.f32.vlgmr.msra.gmra.mrb[32].mxu1 %vm255_vm1, %v2877_v8 }
0x1dd4   :  { %v6013_v33 = vpop.f32.mrb[32].mxu1 }
0x1dd5   :  { %v2969_v28 = vadd.f32 %v6013_v33, %v5519_v31  ;;  %v2963_v4 = vpop.f32.mrb[33].mxu1  ;;  %v1612_v33 = vpop.xlane.xlu0 %1611 }
0x1dd6   :  { %v2964_v9 = vadd.f32 %v5519_v31, %v2963_v4  ;;  %v1615_v31 = vpop.xlane.xlu1 %1614 }
0x1dd7   :  { %v2975_v30 = vmul.f32 0.70710677, %v2969_v28  ;;  %v2973_v18 = vmul.f32 0.5, %v2969_v28  ;;  %v1617_v4 = vmul.f32 0.03125, %v1615_v31 }
0x1dd8   :  { %v2974_v32 = vmul.f32 0.70710677, %v2964_v9  ;;  %v2972_v16 = vmul.f32 0.5, %v2964_v9 }
0x1dd9   :  { %v2981_v21 = vand.u32 2147483647, %v2975_v30  ;;  %vm2977_vm8 = vcmp.ge.f32.partialorder %v2975_v30, 0.0  ;;  %v1616_v30 = vmul.f32 0.03125, %v1612_v33 }
0x1dda   :  { %v2980_v39 = vand.u32 2147483647, %v2974_v32  ;;  %vm2976_vm9 = vcmp.ge.f32.partialorder %v2974_v32, 0.0  ;;  %v2979_v13 = vsel %vm2977_vm8, 1.0, %v7019_v20 }
0x1ddb   :  { %v2983_v10 = vmul.f32 0.3275911, %v2981_v21  ;;  %v3009_v40 = vsub.f32 0.0, %v2981_v21  ;;  %v2978_v15 = vsel %vm2976_vm9, 1.0, %v7019_v20  ;;  %v1618_v28 = vsub.f32 %v7503_v22, %v1616_v30  ;;  %v3174_v22 = vld [vmem:[%s8016_s17] sm:$0xff] }
0x1ddc   :  { %v2982_v37 = vmul.f32 0.3275911, %v2980_v39  ;;  %v3008_v42 = vsub.f32 0.0, %v2980_v39 }
0x1ddd   :  { %v2985_v45 = vadd.f32 1.0, %v2983_v10  ;;  %v3011_v41 = vmul.f32 %v3009_v40, %v2981_v21  ;;  %v5533_v21 = vld [vmem:[%s8014_s5 + $0x1] ss:$0 sm:$0xff] }
0x1dde   :  { %v2984_v63 = vadd.f32 1.0, %v2982_v37  ;;  %v3010_v49 = vmul.f32 %v3008_v42, %v2980_v39  ;;  %v1619_v39 = vsub.f32 %v7646_v38, %v1617_v4  ;;  %v1620_v38 = vmul.f32 %v1618_v28, %v1618_v28 }
0x1ddf   :  { %6879 = vrcp.f32 %v2985_v45  ;;  %v3014_v52 = vmul.f32 1.442695, %v3011_v41 }
0x1de0   :  { %6881 = vrcp.f32 %v2984_v63  ;;  %v3012_v54 = vmul.f32 1.442695, %v3010_v49  ;;  %v1621_v40 = vmul.f32 %v1619_v39, %v1619_v39 }
0x1de1   :  { %6883 = vpow2.f32 %v3014_v52 }
0x1de2   :  { %6885 = vpow2.f32 %v3012_v54 }
0x1de9   :  { %v6880_v24 = vpop.eup %6879 }
0x1dea   :  { %v6882_v44 = vpop.eup %6881  ;;  %v2991_v47 = vmul.f32 1.0614054, %v6880_v24 }
0x1deb   :  { %v2990_v50 = vmul.f32 1.0614054, %v6882_v44  ;;  %v6884_v2 = vpop.eup %6883 }
0x1dec   :  { %v2993_v51 = vadd.f32 -1.4531521, %v2991_v47  ;;  %v6886_v7 = vpop.eup %6885  ;;  %v3177_v47 = vld [vmem:[%s8016_s17 + $0x18] sm:$0xff] }
0x1ded   :  { %v2992_v27 = vadd.f32 -1.4531521, %v2990_v50 }
0x1dee   :  { %v2995_v53 = vmul.f32 %v6880_v24, %v2993_v51 }
0x1def   :  { %v2994_v26 = vmul.f32 %v6882_v44, %v2992_v27 }
0x1df0   :  { %v2997_v55 = vadd.f32 1.4214138, %v2995_v53 }
0x1df1   :  { %v2996_v56 = vadd.f32 1.4214138, %v2994_v26 }
0x1df2   :  { %v2999_v46 = vmul.f32 %v6880_v24, %v2997_v55 }
0x1df3   :  { %v2998_v57 = vmul.f32 %v6882_v44, %v2996_v56 }
0x1df4   :  { %v3001_v58 = vadd.f32 -0.28449672, %v2999_v46 }
0x1df5   :  { %v3000_v59 = vadd.f32 -0.28449672, %v2998_v57 }
0x1df6   :  { %v3003_v60 = vmul.f32 %v6880_v24, %v3001_v58 }
0x1df7   :  { %v3002_v61 = vmul.f32 %v6882_v44, %v3000_v59 }
0x1df8   :  { %v3005_v62 = vadd.f32 0.2548296, %v3003_v60 }
0x1df9   :  { %v3004_v0 = vadd.f32 0.2548296, %v3002_v61 }
0x1dfa   :  { %v3007_v1 = vmul.f32 %v6880_v24, %v3005_v62  ;;  %v1622_v24 = vsel %vm255_vm1, %v1620_v38, 0.0 }
0x1dfb   :  { %v3006_v6 = vmul.f32 %v6882_v44, %v3004_v0  ;;  %v3176_v44 = vld [vmem:[%s8016_s17 + $0x10] sm:$0xff] }
0x1dfc   :  { %v3017_v5 = vmul.f32 %v6884_v2, %v3007_v1  ;;  %v6466_v49 = vpack.c.bf16 %v3177_v47, %v3176_v44  ;;  %v5432_v1 = vld [vmem:[%s8017_s21] ss:$0 sm:$0xff] }
0x1dfd   :  { %v3016_v8 = vmul.f32 %v6886_v7, %v3006_v6 }
0x1dfe   :  { %v3019_v12 = vsub.f32 1.0, %v3017_v5  ;;  %v5433_v5 = vld [vmem:[%s8018_s25] ss:$0 sm:$0xff] }
0x1dff   :  { %v3018_v14 = vsub.f32 1.0, %v3016_v8 }
0x1e00   :  { %v3021_v48 = vmul.f32 %v3019_v12, %v2979_v13 }
0x1e01   :  { %v3020_v43 = vmul.f32 %v3018_v14, %v2978_v15  ;;  %v3267_v15 = vld [vmem:[%s8019_s29 + $0x8] sm:$0xff] }
0x1e02   :  { %v3023_v11 = vadd.f32 1.0, %v3021_v48  ;;  %v3266_v48 = vld [vmem:[%s8019_s29] sm:$0xff] }
0x1e03   :  { %v3022_v17 = vadd.f32 1.0, %v3020_v43  ;;  %v6470_v43 = vpack.c.bf16 %v3267_v15, %v3266_v48 }
0x1e04   :  { %v3025_v23 = vmul.f32 %v3023_v11, %v2973_v18  ;;  %v3268_v11 = vld [vmem:[%s8019_s29 + $0x10] sm:$0xff] }
0x1e05   :  { %v3024_v19 = vmul.f32 %v3022_v17, %v2972_v16  ;;  %v3269_v16 = vld [vmem:[%s8019_s29 + $0x18] sm:$0xff] }
0x1e06   :  { %v6474_v17 = vpack.c.bf16 %v3269_v16, %v3268_v11 }
0x1e07   :  { %6030 = vmatprep.mubr.msk.f32.mxu0 %vm171_vm0, %v3024_v19 }
0x1e08   :  { %6031 = vmatmul.mubr.msk.f32.vlgmr.msra.gmra.mrb[20].mxu0 %vm171_vm0, %v3025_v23 }
0x1edb   :  { %v6032_v32 = vpop.f32.mrb[20].mxu0 }
0x1edc   :  { %v3117_v20 = vadd.f32 %v6032_v32, %v7639_v34  ;;  %v3107_v9 = vpop.f32.mrb[21].mxu0  ;;  %v1625_v34 = vsel %vm255_vm1, %v1621_v40, 0.0  ;;  %v5536_v32 = vld [vmem:[%s8017_s21 + $0x1] ss:$0 sm:$0xff] }
0x1edd   :  { %v3116_v10 = vadd.f32 %v3107_v9, %v7641_v36  ;;  %v3175_v36 = vld [vmem:[%s8016_s17 + $0x8] sm:$0xff]  ;;  %v5537_v9 = vld [vmem:[%s8018_s25 + $0x1] ss:$0 sm:$0xff] }
0x1ede   :  { %v3127_v37 = vadd.f32 %v5533_v21, %v3117_v20  ;;  %v6462_v41 = vpack.c.bf16 %v3175_v36, %v3174_v22 }
0x1edf   :  { %v3126_v45 = vadd.f32 %v5533_v21, %v3116_v10 }
0x1ee0   :  { %v3135_v63 = vsel %vm255_vm1, %v3127_v37, 0.0  ;;  %6463 = vmatprep.subr.bf16.mxu1 %v6462_v41 }
0x1ee1   :  { %3136 = vadd.xlane.f32.xlu1 %v3135_v63  ;;  %v3132_v42 = vsel %vm255_vm1, %v3126_v45, 0.0  ;;  %6465 = vmatpush3.bf16.msra.mxu1 %v6462_v41  ;;  %v5538_v63 = vld [vmem:[%s8020_s3] ss:$0 sm:$0xff] }
0x1ee2   :  { %3133 = vadd.xlane.f32.xlu0 %v3132_v42  ;;  %6467 = vmatprep.subr.bf16.mxu1 %v6466_v49 }
0x1ee5   :  { %1626 = vadd.xlane.f32.xlu1 %v1625_v34  ;;  %6469 = vmatpush3.bf16.msra.mxu1 %v6466_v49 }
0x1ee6   :  { %1623 = vadd.xlane.f32.xlu0 %v1622_v24  ;;  %6471 = vmatprep.subr.bf16.mxu1 %v6470_v43  ;;  %v5541_v24 = vld [vmem:[%s8021_s8] ss:$0 sm:$0xff] }
0x1f6e   :  { %v3137_v50 = vpop.xlane.xlu1 %3136 }
0x1f6f   :  { %v3139_v51 = vmul.f32 0.03125, %v3137_v50  ;;  %v3134_v52 = vpop.xlane.xlu0 %3133 }
0x1f70   :  { %v3138_v27 = vmul.f32 0.03125, %v3134_v52 }
0x1f71   :  { %v3141_v53 = vsub.f32 %v3127_v37, %v3139_v51 }
0x1f72   :  { %v3140_v54 = vsub.f32 %v3126_v45, %v3138_v27  ;;  %v1627_v26 = vpop.xlane.xlu1 %1626 }
0x1f73   :  { %v1629_v55 = vmul.f32 0.03125, %v1627_v26  ;;  %v1624_v56 = vpop.xlane.xlu0 %1623  ;;  %v3143_v46 = vmul.f32 %v3141_v53, %v3141_v53 }
0x1f74   :  { %v1628_v57 = vmul.f32 0.03125, %v1624_v56  ;;  %v3142_v58 = vmul.f32 %v3140_v54, %v3140_v54 }
0x1f75   :  { %v1631_v59 = vadd.f32 1e-06, %v1629_v55  ;;  %v3147_v60 = vsel %vm255_vm1, %v3143_v46, 0.0 }
0x1f76   :  { %v1630_v61 = vadd.f32 1e-06, %v1628_v57  ;;  %3148 = vadd.xlane.f32.xlu1 %v3147_v60  ;;  %v3144_v62 = vsel %vm255_vm1, %v3142_v58, 0.0 }
0x1f77   :  { %6887 = vrsqrt.f32 %v1631_v59  ;;  %3145 = vadd.xlane.f32.xlu0 %v3144_v62 }
0x1f78   :  { %6889 = vrsqrt.f32 %v1630_v61 }
0x1f81   :  { %v6888_v0 = vpop.eup %6887 }
0x1f82   :  { %v6890_v2 = vpop.eup %6889  ;;  %v1635_v6 = vmul.f32 %v6888_v0, %v1619_v39 }
0x1f83   :  { %v1634_v7 = vmul.f32 %v6890_v2, %v1618_v28 }
0x1f84   :  { %v1643_v8 = vmul.f32 %v5432_v1, %v1635_v6 }
0x1f85   :  { %v1642_v12 = vmul.f32 %v5432_v1, %v1634_v7 }
0x1f86   :  { %v1651_v14 = vadd.f32 %v5433_v5, %v1643_v8 }
0x1f87   :  { %v1650_v13 = vadd.f32 %v5433_v5, %v1642_v12 }
0x1f89   :  { %6041 = vmatprep.mubr.msk.f32.mxu1 %vm255_vm1, %v1650_v13 }
0x1f8a   :  { %6042 = vmatmul.mubr.msk.f32.vlgmr.msra.gmra.mrb[34].mxu1 %vm255_vm1, %v1651_v14 }
0x1f8b   :  { %6473 = vmatpush3.bf16.msra.mxu1 %v6470_v43 }
0x1f8c   :  { %6475 = vmatprep.subr.bf16.mxu1 %v6474_v17 }
0x1f8f   :  { %6477 = vmatpush3.bf16.msra.mxu1 %v6474_v17 }
0x2003   :  { %v3149_v18 = vpop.xlane.xlu1 %3148 }
0x2004   :  { %v3151_v19 = vmul.f32 0.03125, %v3149_v18  ;;  %v3146_v23 = vpop.xlane.xlu0 %3145 }
0x2005   :  { %v3150_v31 = vmul.f32 0.03125, %v3146_v23 }
0x2006   :  { %v3153_v33 = vadd.f32 1e-06, %v3151_v19  ;;  %v7755_v19 = vld [vmem:[%s7117_s4 + $0x8] sm:$0xff] }
0x2007   :  { %v3152_v4 = vadd.f32 1e-06, %v3150_v31 }
0x2008   :  { %6891 = vrsqrt.f32 %v3153_v33  ;;  %v7759_v33 = vld [vmem:[%s7117_s4] sm:$0xff]  ;;  %s8026_s4 = sld [smem:[#allocation15_spill]] }
0x2009   :  { %6893 = vrsqrt.f32 %v3152_v4 }
0x2012   :  { %v6892_v30 = vpop.eup %6891 }
0x2013   :  { %v6894_v21 = vpop.eup %6893  ;;  %v3157_v39 = vmul.f32 %v6892_v30, %v3141_v53 }
0x2014   :  { %v3156_v20 = vmul.f32 %v6894_v21, %v3140_v54 }
0x2015   :  { %v3165_v28 = vmul.f32 %v5536_v32, %v3157_v39 }
0x2016   :  { %v3164_v10 = vmul.f32 %v5536_v32, %v3156_v20 }
0x2017   :  { %v7706_v45 = vadd.f32 %v5537_v9, %v3165_v28 }
0x2018   :  { %v7704_v37 = vadd.f32 %v5537_v9, %v3164_v10 }
0x201a   :  { %6052 = vmatprep.mubr.msk.f32.mxu1 %vm255_vm1, %v7704_v37 }
0x201b   :  { %6053 = vmatmul.mubr.msk.f32.vlgmr.msra.gmra.mrb[36].mxu1 %vm255_vm1, %v7706_v45 }
0x205d   :  { %v6043_v40 = vpop.f32.mrb[34].mxu1 }
0x205e   :  { %v7713_v42 = vadd.f32 %v6043_v40, %v5538_v63  ;;  %v3257_v38 = vpop.f32.mrb[35].mxu1 }
0x205f   :  { %v7715_v34 = vadd.f32 %v5538_v63, %v3257_v38 }
0x2061   :  { %6059 = vmatprep.mubr.msk.f32.mxu0 %vm397_vm2, %v7715_v34 }
0x20ee   :  { %v6054_v22 = vpop.f32.mrb[36].mxu1 }
0x20ef   :  { %v3355_v36 = vadd.f32 %v6054_v22, %v5541_v24  ;;  %v3349_v41 = vpop.f32.mrb[37].mxu1 }
0x20f0   :  { %v3350_v44 = vadd.f32 %v5541_v24, %v3349_v41 }
0x20f2   :  { %v6478_v47 = vpack.c.bf16 %v3355_v36, %v3350_v44  ;;  %v7720_v49 = vpack.i.bf16 %v3355_v36, %v3350_v44 }
0x20f4   :  { %6480 = vmatprep.subr.msk.bf16.mxu0 %vm7284_vm3, %v6478_v47 }
0x20f5   :  { %6483 = vmatpush3.bf16.xpose.msk.msra.mxu0 %vm7284_vm3, %v6478_v47 }
0x20fc   :  { %6060 = vmatmul.mubr.msk.f32.vlgmr.msra.gmra.mrb[22].mxu0 %vm397_vm2, %v7713_v42 }
0x21cf   :  { %v6061_v50 = vpop.f32.mrb[22].mxu0 }
0x21d0   :  { %v3442_v51 = vadd.f32 %v7539_v25, %v6061_v50  ;;  %v3436_v52 = vpop.f32.mrb[23].mxu0 }
0x21d1   :  { %v3437_v27 = vadd.f32 %v7535_v35, %v3436_v52 }
0x21d2   :  { %v3448_v53 = vsel %vm481_vm4, %v3442_v51, -inf }
0x21d3   :  { %3449 = vmax.xlane.f32.xlu1 %v3448_v53  ;;  %v3445_v54 = vsel %vm481_vm4, %v3437_v27, -inf }
0x21d4   :  { %3446 = vmax.xlane.f32.xlu0 %v3445_v54 }
0x2260   :  { %v3450_v26 = vpop.xlane.xlu1 %3449 }
0x2261   :  { %v3452_v55 = vsub.f32 %v3442_v51, %v3450_v26  ;;  %v3447_v56 = vpop.xlane.xlu0 %3446 }
0x2262   :  { %v3451_v46 = vsub.f32 %v3437_v27, %v3447_v56 }
0x2263   :  { %v3455_v57 = vmul.f32 1.442695, %v3452_v55 }
0x2264   :  { %v3453_v58 = vmul.f32 1.442695, %v3451_v46 }
0x2265   :  { %6895 = vpow2.f32 %v3455_v57 }
0x2266   :  { %6897 = vpow2.f32 %v3453_v58 }
0x226f   :  { %v6896_v59 = vpop.eup %6895 }
0x2270   :  { %v6898_v60 = vpop.eup %6897  ;;  %v3460_v25 = vsel %vm481_vm4, %v6896_v59, 0.0 }
0x2271   :  { %3461 = vadd.xlane.f32.xlu1 %v3460_v25  ;;  %v3457_v35 = vsel %vm481_vm4, %v6898_v60, 0.0 }
0x2272   :  { %3458 = vadd.xlane.f32.xlu0 %v3457_v35 }
0x2282   :  { %6727 = vrot.lane.b32.xlu1 %v7720_v49, %s7007_s10 }
0x2286   :  { %3554 = vrot.lane.b32.xlu1 %v7715_v34, %s7007_s10 }
0x2288   :  { %6722 = vrot.lane.b32.xlu0 %v7720_v49, %s7005_s0 }
0x228a   :  { %3556 = vrot.lane.b32.xlu1 %v7713_v42, %s7007_s10 }
0x22fe   :  { %v3462_v61 = vpop.xlane.xlu1 %3461 }
0x22ff   :  { %6899 = vrcp.f32 %v3462_v61  ;;  %v3459_v62 = vpop.xlane.xlu0 %3458 }
0x2300   :  { %6901 = vrcp.f32 %v3459_v62 }
0x2302   :  { %v6728_v0 = vpop.permute.xlu1 %6727 }
0x2303   :  { %v6723_v1 = vpop.permute.xlu0 %6722  ;;  %v6730_v2 = vunpack.i.h.bf16 %v6728_v0  ;;  %v6729_v6 = vunpack.i.l.bf16 %v6728_v0 }
0x2304   :  { %v6725_v7 = vunpack.i.h.bf16 %v6723_v1  ;;  %v6724_v5 = vunpack.i.l.bf16 %v6723_v1 }
0x2305   :  { %v6488_v12 = vpack.c.bf16 %v6730_v2, %v6729_v6 }
0x2306   :  { %v6484_v8 = vpack.c.bf16 %v6725_v7, %v6724_v5  ;;  %v3555_v43 = vpop.permute.xlu1 %3554 }
0x2308   :  { %6485 = vmatprep.subr.bf16.mxu1 %v6484_v8 }
0x2309   :  { %v6900_v13 = vpop.eup %6899  ;;  %6487 = vmatpush3.bf16.msra.mxu1 %v6484_v8 }
0x230a   :  { %v6902_v14 = vpop.eup %6901  ;;  %6490 = vmatprep.subr.msk.bf16.mxu1 %vm7284_vm3, %v6488_v12  ;;  %v3466_v15 = vmul.f32 %v6900_v13, %v6896_v59  ;;  %v3557_v11 = vpop.permute.xlu1 %3556 }
0x230b   :  { %v3464_v48 = vmul.f32 %v6902_v14, %v6898_v60 }
0x230d   :  { %6066 = vmatprep.mubr.msk.f32.mxu1 %vm481_vm4, %v3464_v48 }
0x230e   :  { %6067 = vmatmul.mubr.msk.f32.vlgmr.msra.gmra.mrb[38].mxu1 %vm481_vm4, %v3466_v15 }
0x230f   :  { %6073 = vmatprep.mubr.msk.f32.mxu1 %vm397_vm2, %v3555_v43 }
0x2312   :  { %6493 = vmatpush3.bf16.xpose.msk.msra.mxu1 %vm7284_vm3, %v6488_v12 }
0x2319   :  { %6074 = vmatmul.mubr.msk.f32.vlgmr.msra.gmra.mrb[40].mxu1 %vm397_vm2, %v3557_v11 }
0x23e1   :  { %v7750_v16 = vpop.f32.mrb[38].mxu1 }
0x23e2   :  { %v7752_v17 = vpop.f32.mrb[39].mxu1 }
0x23ec   :  { %v6075_v18 = vpop.f32.mrb[40].mxu1 }
0x23ed   :  { %v3642_v23 = vadd.f32 %v7755_v19, %v6075_v18  ;;  %v3636_v31 = vpop.f32.mrb[41].mxu1 }
0x23ee   :  { %v3637_v4 = vadd.f32 %v7759_v33, %v3636_v31 }
0x23ef   :  { %v3648_v30 = vsel %vm481_vm4, %v3642_v23, -inf }
0x23f0   :  { %3649 = vmax.xlane.f32.xlu1 %v3648_v30  ;;  %v3645_v32 = vsel %vm481_vm4, %v3637_v4, -inf }
0x23f1   :  { %3646 = vmax.xlane.f32.xlu0 %v3645_v32 }
0x2401   :  { %6737 = vrot.lane.b32.xlu1 %v7720_v49, %s7010_s16 }
0x2405   :  { %3754 = vrot.lane.b32.xlu1 %v7715_v34, %s7010_s16 }
0x2409   :  { %3756 = vrot.lane.b32.xlu1 %v7713_v42, %s7010_s16 }
0x247d   :  { %v3650_v21 = vpop.xlane.xlu1 %3649 }
0x247e   :  { %v3652_v39 = vsub.f32 %v3642_v23, %v3650_v21  ;;  %v3647_v20 = vpop.xlane.xlu0 %3646 }
0x247f   :  { %v3651_v9 = vsub.f32 %v3637_v4, %v3647_v20 }
0x2480   :  { %v3655_v28 = vmul.f32 1.442695, %v3652_v39 }
0x2481   :  { %v3653_v10 = vmul.f32 1.442695, %v3651_v9  ;;  %v6738_v41 = vpop.permute.xlu1 %6737  ;;  %v4276_v9 = vld [vmem:[%s8022_s14] sm:$0xff] }
0x2482   :  { %6903 = vpow2.f32 %v3655_v28  ;;  %v6740_v47 = vunpack.i.h.bf16 %v6738_v41  ;;  %v6739_v50 = vunpack.i.l.bf16 %v6738_v41  ;;  %v4277_v28 = vld [vmem:[%s8022_s14 + $0x8] sm:$0xff] }
0x2483   :  { %6905 = vpow2.f32 %v3653_v10 }
0x2484   :  { %v6498_v53 = vpack.c.bf16 %v6740_v47, %v6739_v50 }
0x2485   :  { %v3755_v46 = vpop.permute.xlu1 %3754 }
0x2489   :  { %v3757_v57 = vpop.permute.xlu1 %3756 }
0x248c   :  { %v6904_v63 = vpop.eup %6903 }
0x248d   :  { %v3660_v40 = vsel %vm481_vm4, %v6904_v63, 0.0  ;;  %v6906_v38 = vpop.eup %6905 }
0x248e   :  { %3661 = vadd.xlane.f32.xlu0 %v3660_v40  ;;  %v3657_v24 = vsel %vm481_vm4, %v6906_v38, 0.0  ;;  %v4278_v40 = vld [vmem:[%s8022_s14 + $0x10] sm:$0xff] }
0x2492   :  { %3658 = vadd.xlane.f32.xlu0 %v3657_v24 }
0x24a8   :  { %6732 = vrot.lane.b32.xlu0 %v7720_v49, %s7006_s7 }
0x251b   :  { %v3662_v22 = vpop.xlane.xlu0 %3661 }
0x251c   :  { %6907 = vrcp.f32 %v3662_v22 }
0x251f   :  { %v3659_v36 = vpop.xlane.xlu0 %3658 }
0x2520   :  { %6909 = vrcp.f32 %v3659_v36 }
0x2523   :  { %v6733_v44 = vpop.permute.xlu0 %6732 }
0x2524   :  { %v6735_v51 = vunpack.i.h.bf16 %v6733_v44  ;;  %v6734_v52 = vunpack.i.l.bf16 %v6733_v44 }
0x2526   :  { %v6494_v27 = vpack.c.bf16 %v6735_v51, %v6734_v52  ;;  %v6908_v54 = vpop.eup %6907 }
0x2527   :  { %v3666_v56 = vmul.f32 %v6908_v54, %v6904_v63  ;;  %v6526_v63 = vpack.c.bf16 %v4277_v28, %v4276_v9 }
0x2528   :  { %6495 = vmatprep.subr.bf16.mxu0 %v6494_v27 }
0x2529   :  { %6497 = vmatpush3.bf16.msra.mxu0 %v6494_v27  ;;  %v5571_v27 = vld [vmem:[%s8023_s19] ss:$0 sm:$0xff] }
0x252a   :  { %v6910_v26 = vpop.eup %6909  ;;  %6500 = vmatprep.subr.msk.bf16.mxu0 %vm7284_vm3, %v6498_v53 }
0x252b   :  { %v3664_v55 = vmul.f32 %v6910_v26, %v6906_v38  ;;  %v4279_v38 = vld [vmem:[%s8022_s14 + $0x18] sm:$0xff] }
0x252c   :  { %v6530_v24 = vpack.c.bf16 %v4279_v38, %v4278_v40 }
0x252d   :  { %6080 = vmatprep.mubr.msk.f32.mxu0 %vm481_vm4, %v3664_v55 }
0x252e   :  { %6081 = vmatmul.mubr.msk.f32.vlgmr.msra.gmra.mrb[24].mxu0 %vm481_vm4, %v3666_v56 }
0x252f   :  { %6087 = vmatprep.mubr.msk.f32.mxu0 %vm397_vm2, %v3755_v46 }
0x2532   :  { %6503 = vmatpush3.bf16.xpose.msk.msra.mxu0 %vm7284_vm3, %v6498_v53 }
0x2539   :  { %6088 = vmatmul.mubr.msk.f32.vlgmr.msra.gmra.mrb[26].mxu0 %vm397_vm2, %v3757_v57 }
0x2601   :  { %v7782_v58 = vpop.f32.mrb[24].mxu0 }
0x2602   :  { %v7784_v59 = vpop.f32.mrb[25].mxu0 }
0x260c   :  { %v6089_v60 = vpop.f32.mrb[26].mxu0 }
0x260d   :  { %v3842_v25 = vadd.f32 %v7755_v19, %v6089_v60  ;;  %v3836_v35 = vpop.f32.mrb[27].mxu0 }
0x260e   :  { %v3837_v61 = vadd.f32 %v7759_v33, %v3836_v35 }
0x260f   :  { %v3848_v62 = vsel %vm481_vm4, %v3842_v25, -inf }
0x2610   :  { %3849 = vmax.xlane.f32.xlu1 %v3848_v62  ;;  %v3845_v0 = vsel %vm481_vm4, %v3837_v61, -inf }
0x2611   :  { %3846 = vmax.xlane.f32.xlu0 %v3845_v0 }
0x2621   :  { %6747 = vrot.lane.b32.xlu1 %v7720_v49, %s7013_s23 }
0x2625   :  { %3954 = vrot.lane.b32.xlu1 %v7715_v34, %s7013_s23 }
0x2629   :  { %3956 = vrot.lane.b32.xlu1 %v7713_v42, %s7013_s23 }
0x269d   :  { %v3850_v1 = vpop.xlane.xlu1 %3849 }
0x269e   :  { %v3852_v2 = vsub.f32 %v3842_v25, %v3850_v1  ;;  %v3847_v6 = vpop.xlane.xlu0 %3846 }
0x269f   :  { %v3851_v7 = vsub.f32 %v3837_v61, %v3847_v6 }
0x26a0   :  { %v3855_v5 = vmul.f32 1.442695, %v3852_v2 }
0x26a1   :  { %v3853_v8 = vmul.f32 1.442695, %v3851_v7  ;;  %v6748_v15 = vpop.permute.xlu1 %6747 }
0x26a2   :  { %6911 = vpow2.f32 %v3855_v5  ;;  %v6750_v11 = vunpack.i.h.bf16 %v6748_v15  ;;  %v6749_v18 = vunpack.i.l.bf16 %v6748_v15 }
0x26a3   :  { %6913 = vpow2.f32 %v3853_v8 }
0x26a4   :  { %v6508_v30 = vpack.c.bf16 %v6750_v11, %v6749_v18  ;;  %v4368_v11 = vld [vmem:[%s8025_s6 + $0x8] sm:$0xff] }
0x26a5   :  { %v3955_v10 = vpop.permute.xlu1 %3954 }
0x26a9   :  { %v3957_v22 = vpop.permute.xlu1 %3956 }
0x26ac   :  { %v6912_v12 = vpop.eup %6911 }
0x26ad   :  { %v3860_v13 = vsel %vm481_vm4, %v6912_v12, 0.0  ;;  %v6914_v14 = vpop.eup %6913 }
0x26ae   :  { %3861 = vadd.xlane.f32.xlu0 %v3860_v13  ;;  %v3857_v48 = vsel %vm481_vm4, %v6914_v14, 0.0  ;;  %v4184_v13 = vld [vmem:[%s8024_s24] sm:$0xff] }
0x26b2   :  { %3858 = vadd.xlane.f32.xlu0 %v3857_v48  ;;  %v4186_v48 = vld [vmem:[%s8024_s24 + $0x10] sm:$0xff] }
0x26c8   :  { %6742 = vrot.lane.b32.xlu0 %v7720_v49, %s7011_s18 }
0x273b   :  { %v3862_v42 = vpop.xlane.xlu0 %3861 }
0x273c   :  { %6915 = vrcp.f32 %v3862_v42 }
0x273f   :  { %v3859_v34 = vpop.xlane.xlu0 %3858 }
0x2740   :  { %6917 = vrcp.f32 %v3859_v34  ;;  %v4187_v34 = vld [vmem:[%s8024_s24 + $0x18] sm:$0xff] }
0x2741   :  { %v6522_v15 = vpack.c.bf16 %v4187_v34, %v4186_v48 }
0x2743   :  { %v6743_v43 = vpop.permute.xlu0 %6742 }
0x2744   :  { %v6745_v23 = vunpack.i.h.bf16 %v6743_v43  ;;  %v6744_v31 = vunpack.i.l.bf16 %v6743_v43  ;;  %v4367_v43 = vld [vmem:[%s8025_s6] sm:$0xff] }
0x2745   :  { %v6534_v18 = vpack.c.bf16 %v4368_v11, %v4367_v43 }
0x2746   :  { %v6504_v4 = vpack.c.bf16 %v6745_v23, %v6744_v31  ;;  %v6916_v32 = vpop.eup %6915 }
0x2747   :  { %v3866_v20 = vmul.f32 %v6916_v32, %v6912_v12 }
0x2748   :  { %6505 = vmatprep.subr.bf16.mxu1 %v6504_v4 }
0x2749   :  { %6507 = vmatpush3.bf16.msra.mxu1 %v6504_v4 }
0x274a   :  { %v6918_v21 = vpop.eup %6917  ;;  %6510 = vmatprep.subr.msk.bf16.mxu1 %vm7284_vm3, %v6508_v30 }
0x274b   :  { %v3864_v39 = vmul.f32 %v6918_v21, %v6914_v14  ;;  %v4185_v14 = vld [vmem:[%s8024_s24 + $0x8] sm:$0xff] }
0x274c   :  { %v6518_v42 = vpack.c.bf16 %v4185_v14, %v4184_v13 }
0x274d   :  { %6094 = vmatprep.mubr.msk.f32.mxu1 %vm481_vm4, %v3864_v39 }
0x274e   :  { %6095 = vmatmul.mubr.msk.f32.vlgmr.msra.gmra.mrb[42].mxu1 %vm481_vm4, %v3866_v20 }
0x274f   :  { %6101 = vmatprep.mubr.msk.f32.mxu1 %vm397_vm2, %v3955_v10 }
0x2752   :  { %6513 = vmatpush3.bf16.xpose.msk.msra.mxu1 %vm7284_vm3, %v6508_v30 }
0x2753   :  { %6527 = vmatprep.subr.bf16.mxu1 %v6526_v63 }
0x2759   :  { %6102 = vmatmul.mubr.msk.f32.vlgmr.msra.gmra.mrb[44].mxu1 %vm397_vm2, %v3957_v22 }
0x275a   :  { %6529 = vmatpush3.bf16.msra.mxu1 %v6526_v63  ;;  %6130 = vmatprep.mubr.msk.f32.mxu1 %vm255_vm1, %v7704_v37 }
0x275b   :  { %6531 = vmatprep.subr.bf16.mxu1 %v6530_v24 }
0x275e   :  { %6533 = vmatpush3.bf16.msra.mxu1 %v6530_v24  ;;  %v4370_v24 = vld [vmem:[%s8025_s6 + $0x18] sm:$0xff] }
0x275f   :  { %6542 = vmatprep.subr.bf16.mxu1 %v7004_v3 }
0x2761   :  { %6131 = vmatmul.mubr.msk.f32.vlgmr.msra.gmra.mrb[46].mxu1 %vm255_vm1, %v7706_v45 }
0x2821   :  { %v6096_v36 = vpop.f32.mrb[42].mxu1 }
0x2822   :  { %v3945_v41 = vpop.f32.mrb[43].mxu1 }
0x282c   :  { %v6103_v44 = vpop.f32.mrb[44].mxu1 }
0x282d   :  { %v4042_v47 = vadd.f32 %v7755_v19, %v6103_v44  ;;  %v4036_v50 = vpop.f32.mrb[45].mxu1 }
0x282e   :  { %v4037_v51 = vadd.f32 %v7759_v33, %v4036_v50 }
0x282f   :  { %v4048_v52 = vsel %vm481_vm4, %v4042_v47, -inf }
0x2830   :  { %4049 = vmax.xlane.f32.xlu1 %v4048_v52  ;;  %v4045_v37 = vsel %vm481_vm4, %v4037_v51, -inf  ;;  %v7021_v52 = vmov 0.0  }
0x2831   :  { %4046 = vmax.xlane.f32.xlu0 %v4045_v37  ;;  %6148 = vmatprep.mubr.msk.f32.mxu1 %vm7020_vm11, %v7021_v52  ;;  %v5574_v37 = vld [vmem:[%s8027_s11] ss:$0 sm:$0xff] }
0x2834   :  { %v6132_v53 = vpop.f32.mrb[46].mxu1 }
0x2835   :  { %v4359_v54 = vadd.f32 %v6132_v53, %v5571_v27  ;;  %v4353_v26 = vpop.f32.mrb[47].mxu1 }
0x2836   :  { %v4354_v55 = vadd.f32 %v5571_v27, %v4353_v26 }
0x2837   :  { %v4363_v45 = vrot.slane %v4359_v54, 7 }
0x2839   :  { %v7823_v56 = vsel %vm4365_vm10, %v4354_v55, %v4363_v45 }
0x2841   :  { %4156 = vrot.lane.b32.xlu1 %v7784_v59, %s7016_s1 }
0x2845   :  { %4158 = vrot.lane.b32.xlu1 %v7782_v58, %s7016_s1 }
0x2849   :  { %4164 = vrot.lane.b32.xlu1 %v3945_v41, %s8015_s13 }
0x28bd   :  { %v4050_v19 = vpop.xlane.xlu1 %4049 }
0x28be   :  { %v4052_v33 = vsub.f32 %v4042_v47, %v4050_v19  ;;  %v4047_v46 = vpop.xlane.xlu0 %4046 }
0x28bf   :  { %v4051_v57 = vsub.f32 %v4037_v51, %v4047_v46 }
0x28c0   :  { %v4055_v60 = vmul.f32 1.442695, %v4052_v33 }
0x28c1   :  { %v4053_v25 = vmul.f32 1.442695, %v4051_v57  ;;  %v4157_v4 = vpop.permute.xlu1 %4156 }
0x28c2   :  { %6919 = vpow2.f32 %v4055_v60  ;;  %v4178_v39 = vsel %vm397_vm2, %v7752_v17, %v4157_v4  ;;  %v4369_v17 = vld [vmem:[%s8025_s6 + $0x10] sm:$0xff] }
0x28c3   :  { %6921 = vpow2.f32 %v4053_v25  ;;  %v6538_v22 = vpack.c.bf16 %v4370_v24, %v4369_v17  ;;  %v7889_v25 = vld [vmem:[%s8028_s15] sm:$0x3] }
0x28c5   :  { %v4159_v30 = vpop.permute.xlu1 %4158 }
0x28c6   :  { %v4179_v9 = vsel %vm397_vm2, %v7750_v16, %v4159_v30  ;;  %v5568_v16 = vld [vmem:[%s8026_s4] ss:$0 sm:$0xff] }
0x28c9   :  { %v4165_v21 = vpop.permute.xlu1 %4164 }
0x28ca   :  { %v4180_v28 = vsel %vm481_vm4, %v4178_v39, %v4165_v21 }
0x28cc   :  { %v6920_v35 = vpop.eup %6919 }
0x28cd   :  { %v4060_v61 = vsel %vm481_vm4, %v6920_v35, 0.0  ;;  %v6922_v62 = vpop.eup %6921 }
0x28ce   :  { %4061 = vadd.xlane.f32.xlu0 %v4060_v61  ;;  %v4057_v59 = vsel %vm481_vm4, %v6922_v62, 0.0 }
0x28d2   :  { %4058 = vadd.xlane.f32.xlu0 %v4057_v59 }
0x28e8   :  { %6752 = vrot.lane.b32.xlu0 %v7720_v49, %s7014_s26 }
0x28ec   :  { %4166 = vrot.lane.b32.xlu0 %v6096_v36, %s8015_s13 }
0x295b   :  { %v4062_v58 = vpop.xlane.xlu0 %4061 }
0x295c   :  { %6923 = vrcp.f32 %v4062_v58 }
0x295f   :  { %v4059_v0 = vpop.xlane.xlu0 %4058 }
0x2960   :  { %6925 = vrcp.f32 %v4059_v0 }
0x2963   :  { %v6753_v1 = vpop.permute.xlu0 %6752 }
0x2964   :  { %v6755_v2 = vunpack.i.h.bf16 %v6753_v1  ;;  %v6754_v6 = vunpack.i.l.bf16 %v6753_v1 }
0x2966   :  { %v6514_v7 = vpack.c.bf16 %v6755_v2, %v6754_v6  ;;  %v6924_v5 = vpop.eup %6923 }
0x2967   :  { %v4066_v12 = vmul.f32 %v6924_v5, %v6920_v35  ;;  %v4167_v32 = vpop.permute.xlu0 %4166 }
0x2968   :  { %6515 = vmatprep.subr.bf16.mxu0 %v6514_v7  ;;  %v4181_v63 = vsel %vm481_vm4, %v4179_v9, %v4167_v32 }
0x2969   :  { %6517 = vmatpush3.bf16.msra.mxu0 %v6514_v7 }
0x296a   :  { %v6926_v8 = vpop.eup %6925  ;;  %6519 = vmatprep.subr.bf16.mxu0 %v6518_v42 }
0x296b   :  { %v4064_v49 = vmul.f32 %v6926_v8, %v6922_v62 }
0x296d   :  { %6108 = vmatprep.mubr.msk.f32.mxu0 %vm481_vm4, %v4064_v49 }
0x296e   :  { %6109 = vmatmul.mubr.msk.f32.vlgmr.msra.gmra.mrb[28].mxu0 %vm481_vm4, %v4066_v12 }
0x296f   :  { %6521 = vmatpush3.bf16.msra.mxu0 %v6518_v42 }
0x2970   :  { %6523 = vmatprep.subr.bf16.mxu0 %v6522_v15 }
0x2973   :  { %6525 = vmatpush3.bf16.msra.mxu0 %v6522_v15 }
0x2974   :  { %6535 = vmatprep.subr.bf16.mxu0 %v6534_v18 }
0x2a41   :  { %v6110_v23 = vpop.f32.mrb[28].mxu0 }
0x2a42   :  { %4174 = vrot.lane.b32.xlu0 %v6110_v23, %s7018_s2  ;;  %v4145_v31 = vpop.f32.mrb[29].mxu0 }
0x2a43   :  { %4172 = vrot.lane.b32.xlu1 %v4145_v31, %s7018_s2 }
0x2a46   :  { %4630 = vrot.lane.b32.xlu0 %v7823_v56, %s7007_s10 }
0x2ab4   :  { %v4175_v20 = vpop.permute.xlu0 %4174 }
0x2ab5   :  { %v4173_v10 = vpop.permute.xlu1 %4172  ;;  %v4183_v38 = vsel %vm1219_vm5, %v4181_v63, %v4175_v20 }
0x2ab6   :  { %v4182_v40 = vsel %vm1219_vm5, %v4180_v28, %v4173_v10 }
0x2ab7   :  { %6119 = vmatprep.mubr.msk.f32.mxu0 %vm255_vm1, %v4182_v40 }
0x2ab8   :  { %6120 = vmatmul.mubr.msk.f32.vlgmr.msra.gmra.mrb[30].mxu0 %vm255_vm1, %v4183_v38  ;;  %v4631_v60 = vpop.permute.xlu0 %4630 }
0x2ab9   :  { %6537 = vmatpush3.bf16.msra.mxu0 %v6534_v18 }
0x2aba   :  { %6539 = vmatprep.subr.bf16.mxu0 %v6538_v22 }
0x2abd   :  { %6541 = vmatpush3.bf16.msra.mxu0 %v6538_v22 }
0x2abe   :  { %6546 = vmatprep.subr.bf16.mxu0 %v7004_v3 }
0x2b8b   :  { %v6121_v36 = vpop.f32.mrb[30].mxu0 }
0x2b8c   :  { %v4273_v41 = vadd.f32 %v6121_v36, %v5568_v16  ;;  %v4267_v44 = vpop.f32.mrb[31].mxu0 }
0x2b8d   :  { %v4268_v47 = vadd.f32 %v5568_v16, %v4267_v44 }
0x2b8e   :  { %v5245_v50 = vrot.slane %v4273_v41, 7 }
0x2b8f   :  { %6141 = vmatprep.mubr.msk.f32.mxu0 %vm255_vm1, %v4268_v47 }
0x2b90   :  { %6142 = vmatmul.mubr.msk.f32.vlgmr.msra.gmra.mrb[32].mxu0 %vm255_vm1, %v4273_v41  ;;  %v7864_v51 = vsel %vm4365_vm10, %v4268_v47, %v5245_v50 }
0x2b91   :  { %6155 = vmatprep.mubr.msk.f32.mxu0 %vm7020_vm11, %v7021_v52 }
0x2c63   :  { %v6143_v27 = vpop.f32.mrb[32].mxu0 }
0x2c64   :  { %v4456_v53 = vadd.f32 %v6143_v27, %v5574_v37  ;;  %v4450_v54 = vpop.f32.mrb[33].mxu0 }
0x2c65   :  { %v4451_v26 = vadd.f32 %v5574_v37, %v4450_v54 }
0x2c67   :  { %v7871_v55 = vpack.i.bf16 %v4456_v53, %v4451_v26  ;;  %v6543_v45 = vpack.c.bf16 %v4456_v53, %v4451_v26 }
0x2c69   :  { %6757 = vrot.lane.b32.xlu1 %v7871_v55, %s7007_s10  ;;  %6545 = vmatpush3.bf16.xpose.msk.msra.mxu1 %vm7284_vm3, %v6543_v45  ;;  %s7023_s10 = smov [#allocation2]  }
0x2c6a   :  { %6549 = vmatprep.subr.bf16.mxu1 %v7004_v3 }
0x2c70   :  { %6149 = vmatmul.mubr.msk.f32.vlgmr.msra.gmra.mrb[48].mxu1 %vm397_vm2, %v7823_v56 }
0x2c71   :  { %6162 = vmatprep.mubr.msk.f32.mxu1 %vm7020_vm11, %v7021_v52 }
0x2cdb   :  { %v6758_v19 = vpop.permute.xlu1 %6757 }
0x2cdc   :  { %v6760_v33 = vunpack.i.h.bf16 %v6758_v19  ;;  %v6759_v46 = vunpack.i.l.bf16 %v6758_v19 }
0x2cde   :  { %v6550_v57 = vpack.c.bf16 %v6760_v33, %v6759_v46 }
0x2ce0   :  { %6552 = vmatpush3.bf16.xpose.msk.msra.mxu1 %vm7284_vm3, %v6550_v57 }
0x2ce1   :  { %6560 = vmatprep.subr.bf16.mxu1 %v7004_v3 }
0x2ce7   :  { %6163 = vmatmul.mubr.msk.f32.vlgmr.msra.gmra.mrb[50].mxu1 %vm397_vm2, %v4631_v60 }
0x2ce8   :  { %6183 = vmatprep.mubr.msk.f32.mxu1 %vm7020_vm11, %v7021_v52 }
0x2d43   :  { %v4535_v35 = vpop.f32.mrb[48].mxu1 }
0x2d44   :  { %v4536_v61 = vadd.f32 %v4535_v35, %v7889_v25  ;;  %v6150_v62 = vpop.f32.mrb[49].mxu1 }
0x2d46   :  { %v4540_v59 = vsel %vm4539_vm12, %v4536_v61, -inf }
0x2d47   :  { %4541 = vmax.xlane.f32.xlu1 %v4540_v59 }
0x2d58   :  { %6762 = vrot.lane.b32.xlu1 %v7871_v55, %s7005_s0  ;;  %s8029_s0 = sld [smem:[#allocation20_spill]] }
0x2d5c   :  { %6772 = vrot.lane.b32.xlu1 %v7871_v55, %s7010_s16 }
0x2d60   :  { %4802 = vrot.lane.b32.xlu1 %v7823_v56, %s7010_s16 }
0x2dba   :  { %v4708_v58 = vpop.f32.mrb[50].mxu1 }
0x2dbb   :  { %v4709_v0 = vadd.f32 %v4708_v58, %v7889_v25  ;;  %v6164_v1 = vpop.f32.mrb[51].mxu1 }
0x2dbd   :  { %v4712_v2 = vsel %vm4539_vm12, %v4709_v0, -inf }
0x2dbe   :  { %4713 = vmax.xlane.f32.xlu0 %v4712_v2 }
0x2dd4   :  { %v4542_v6 = vpop.xlane.xlu1 %4541 }
0x2dd5   :  { %v4543_v7 = vsub.f32 %v4536_v61, %v4542_v6 }
0x2dd7   :  { %v4544_v5 = vmul.f32 1.442695, %v4543_v7 }
0x2dd8   :  { %v6763_v8 = vpop.permute.xlu1 %6762 }
0x2dd9   :  { %6927 = vpow2.f32 %v4544_v5  ;;  %v6765_v49 = vunpack.i.h.bf16 %v6763_v8  ;;  %v6764_v12 = vunpack.i.l.bf16 %v6763_v8 }
0x2ddb   :  { %v6547_v13 = vpack.c.bf16 %v6765_v49, %v6764_v12 }
0x2ddc   :  { %v6773_v20 = vpop.permute.xlu1 %6772 }
0x2ddd   :  { %6548 = vmatpush3.bf16.msra.mxu0 %v6547_v13  ;;  %v6775_v28 = vunpack.i.h.bf16 %v6773_v20  ;;  %v6774_v10 = vunpack.i.l.bf16 %v6773_v20 }
0x2dde   :  { %6553 = vmatprep.subr.bf16.mxu0 %v7004_v3 }
0x2ddf   :  { %v6557_v40 = vpack.c.bf16 %v6775_v28, %v6774_v10  ;;  %v5253_v28 = vld [vmem:[%s7187_s20] sm:$0xff]  ;;  %v5254_v10 = vld [vmem:[%s7187_s20 + $0x8] sm:$0xff] }
0x2de0   :  { %v4803_v38 = vpop.permute.xlu1 %4802 }
0x2de3   :  { %v6928_v14 = vpop.eup %6927 }
0x2de4   :  { %v4546_v48 = vsel %vm4539_vm12, %v6928_v14, 0.0 }
0x2de5   :  { %4547 = vadd.xlane.f32.xlu0 %v4546_v48 }
0x2e4b   :  { %v4714_v42 = vpop.xlane.xlu0 %4713 }
0x2e4c   :  { %v4715_v34 = vsub.f32 %v4709_v0, %v4714_v42 }
0x2e4e   :  { %v4716_v15 = vmul.f32 1.442695, %v4715_v34 }
0x2e50   :  { %6929 = vpow2.f32 %v4716_v15  ;;  %v5161_v15 = vld [vmem:[%s8029_s0] sm:$0xff] }
0x2e5a   :  { %v6930_v43 = vpop.eup %6929 }
0x2e5b   :  { %v4718_v11 = vsel %vm4539_vm12, %v6930_v43, 0.0 }
0x2e5c   :  { %4719 = vadd.xlane.f32.xlu0 %v4718_v11  ;;  %v5163_v11 = vld [vmem:[%s8029_s0 + $0x10] sm:$0xff] }
0x2e72   :  { %6767 = vrot.lane.b32.xlu0 %v7871_v55, %s7006_s7  ;;  %v4548_v18 = vpop.xlane.xlu0 %4547  ;;  %s7022_s7 = smov 32  }
0x2e73   :  { %6931 = vrcp.f32 %v4548_v18 }
0x2e7d   :  { %v6932_v23 = vpop.eup %6931 }
0x2e7e   :  { %v4550_v31 = vmul.f32 %v6932_v23, %v6928_v14  ;;  %v5164_v23 = vld [vmem:[%s8029_s0 + $0x18] sm:$0xff] }
0x2e80   :  { %6156 = vmatmul.mubr.msk.f32.vlgmr.msra.gmra.mrb[34].mxu0 %vm481_vm4, %v4550_v31  ;;  %v6574_v31 = vpack.c.bf16 %v5164_v23, %v5163_v11 }
0x2e81   :  { %6169 = vmatprep.mubr.msk.f32.mxu0 %vm7020_vm11, %v7021_v52 }
0x2ee9   :  { %v4720_v4 = vpop.xlane.xlu0 %4719 }
0x2eea   :  { %6933 = vrcp.f32 %v4720_v4 }
0x2eed   :  { %v6768_v30 = vpop.permute.xlu0 %6767 }
0x2eee   :  { %v6770_v32 = vunpack.i.h.bf16 %v6768_v30  ;;  %v6769_v21 = vunpack.i.l.bf16 %v6768_v30 }
0x2ef0   :  { %v6554_v39 = vpack.c.bf16 %v6770_v32, %v6769_v21 }
0x2ef2   :  { %6555 = vmatpush3.bf16.msra.mxu0 %v6554_v39 }
0x2ef3   :  { %6556 = vmatprep.subr.bf16.mxu0 %v7004_v3 }
0x2ef4   :  { %v6934_v9 = vpop.eup %6933 }
0x2ef5   :  { %v4722_v63 = vmul.f32 %v6934_v9, %v6930_v43  ;;  %v5162_v43 = vld [vmem:[%s8029_s0 + $0x8] sm:$0xff] }
0x2ef6   :  { %v6571_v18 = vpack.c.bf16 %v5162_v43, %v5161_v15 }
0x2ef7   :  { %6170 = vmatmul.mubr.msk.f32.vlgmr.msra.gmra.mrb[36].mxu0 %vm481_vm4, %v4722_v63  ;;  %v5255_v63 = vld [vmem:[%s7187_s20 + $0x10] sm:$0xff] }
0x2ef8   :  { %6176 = vmatprep.mubr.msk.f32.mxu0 %vm7020_vm11, %v7021_v52 }
0x2efb   :  { %6559 = vmatpush3.bf16.xpose.msk.msra.mxu0 %vm7284_vm3, %v6557_v40  ;;  %v6577_v40 = vpack.c.bf16 %v5254_v10, %v5253_v28 }
0x2efc   :  { %6567 = vmatprep.subr.bf16.mxu0 %v7004_v3 }
0x2f02   :  { %6177 = vmatmul.mubr.msk.f32.vlgmr.msra.gmra.mrb[38].mxu0 %vm397_vm2, %v4803_v38  ;;  %v5256_v38 = vld [vmem:[%s7187_s20 + $0x18] sm:$0xff] }
0x2f03   :  { %6197 = vmatprep.mubr.msk.f32.mxu0 %vm7020_vm11, %v7021_v52 }
0x2f53   :  { %v7919_v17 = vpop.f32.mrb[34].mxu0 }
0x2f54   :  { %v6157_v24 = vpop.f32.mrb[35].mxu0 }
0x2f55   :  { %v6580_v24 = vpack.c.bf16 %v5256_v38, %v5255_v63 }
0x2fca   :  { %v4798_v22 = vpop.f32.mrb[36].mxu0 }
0x2fcb   :  { %v6171_v16 = vpop.f32.mrb[37].mxu0 }
0x2fd5   :  { %v4880_v36 = vpop.f32.mrb[38].mxu0 }
0x2fd6   :  { %v4881_v41 = vadd.f32 %v4880_v36, %v7889_v25  ;;  %v6178_v44 = vpop.f32.mrb[39].mxu0  ;;  %v5259_v36 = vld [vmem:[%s7187_s20 + $0x30] sm:$0xff] }
0x2fd8   :  { %v4884_v47 = vsel %vm4539_vm12, %v4881_v41, -inf }
0x2fd9   :  { %4885 = vmax.xlane.f32.xlu1 %v4884_v47  ;;  %v5593_v47 = vld [vmem:[%s7182_s12] ss:$0 sm:$0xff] }
0x2fea   :  { %6782 = vrot.lane.b32.xlu1 %v7871_v55, %s7013_s23 }
0x2fee   :  { %4974 = vrot.lane.b32.xlu1 %v7823_v56, %s7013_s23 }
0x3066   :  { %v4886_v50 = vpop.xlane.xlu1 %4885 }
0x3067   :  { %v4887_v37 = vsub.f32 %v4881_v41, %v4886_v50  ;;  %v5260_v41 = vld [vmem:[%s7187_s20 + $0x38] sm:$0xff] }
0x3068   :  { %v6586_v44 = vpack.c.bf16 %v5260_v41, %v5259_v36 }
0x3069   :  { %v4888_v27 = vmul.f32 1.442695, %v4887_v37 }
0x306a   :  { %v6783_v57 = vpop.permute.xlu1 %6782 }
0x306b   :  { %6935 = vpow2.f32 %v4888_v27  ;;  %v6785_v60 = vunpack.i.h.bf16 %v6783_v57  ;;  %v6784_v35 = vunpack.i.l.bf16 %v6783_v57 }
0x306d   :  { %v6564_v62 = vpack.c.bf16 %v6785_v60, %v6784_v35 }
0x306e   :  { %v4975_v59 = vpop.permute.xlu1 %4974 }
0x3075   :  { %v6936_v53 = vpop.eup %6935 }
0x3076   :  { %v4890_v54 = vsel %vm4539_vm12, %v6936_v53, 0.0 }
0x3077   :  { %4891 = vadd.xlane.f32.xlu0 %v4890_v54 }
0x308d   :  { %6777 = vrot.lane.b32.xlu0 %v7871_v55, %s7011_s18 }
0x3104   :  { %v4892_v26 = vpop.xlane.xlu0 %4891 }
0x3105   :  { %6937 = vrcp.f32 %v4892_v26  ;;  %v5595_v26 = vld [vmem:[%s7192_s27] ss:$0 sm:$0xff] }
0x3108   :  { %v6778_v45 = vpop.permute.xlu0 %6777 }
0x3109   :  { %v6780_v19 = vunpack.i.h.bf16 %v6778_v45  ;;  %v6779_v33 = vunpack.i.l.bf16 %v6778_v45 }
0x310b   :  { %v6561_v46 = vpack.c.bf16 %v6780_v19, %v6779_v33 }
0x310d   :  { %6562 = vmatpush3.bf16.msra.mxu1 %v6561_v46 }
0x310e   :  { %6563 = vmatprep.subr.bf16.mxu1 %v7004_v3 }
0x310f   :  { %v6938_v56 = vpop.eup %6937 }
0x3110   :  { %v4894_v61 = vmul.f32 %v6938_v56, %v6936_v53 }
0x3112   :  { %6184 = vmatmul.mubr.msk.f32.vlgmr.msra.gmra.mrb[52].mxu1 %vm481_vm4, %v4894_v61 }
0x3113   :  { %6190 = vmatprep.mubr.msk.f32.mxu1 %vm7020_vm11, %v7021_v52 }
0x3116   :  { %6566 = vmatpush3.bf16.xpose.msk.msra.mxu1 %vm7284_vm3, %v6564_v62 }
0x3117   :  { %6576 = vmatprep.subr.bf16.mxu1 %v7004_v3 }
0x311d   :  { %6191 = vmatmul.mubr.msk.f32.vlgmr.msra.gmra.mrb[54].mxu1 %vm397_vm2, %v4975_v59 }
0x311e   :  { %6227 = vmatprep.mubr.msk.f32.mxu1 %vm7020_vm11, %v7021_v52  ;;  %6578 = vmatpush3.bf16.msra.mxu1 %v6577_v40 }
0x311f   :  { %6579 = vmatprep.subr.bf16.mxu1 %v7004_v3 }
0x3122   :  { %6581 = vmatpush3.bf16.msra.mxu1 %v6580_v24 }
0x3123   :  { %6582 = vmatprep.subr.bf16.mxu1 %v7004_v3 }
0x31e5   :  { %v4970_v58 = vpop.f32.mrb[52].mxu1 }
0x31e6   :  { %v6185_v0 = vpop.f32.mrb[53].mxu1 }
0x31f0   :  { %v5052_v1 = vpop.f32.mrb[54].mxu1 }
0x31f1   :  { %v5053_v2 = vadd.f32 %v5052_v1, %v7889_v25  ;;  %v6192_v6 = vpop.f32.mrb[55].mxu1 }
0x31f3   :  { %v5056_v7 = vsel %vm4539_vm12, %v5053_v2, -inf }
0x31f4   :  { %5057 = vmax.xlane.f32.xlu0 %v5056_v7 }
0x320a   :  { %6787 = vrot.lane.b32.xlu0 %v7871_v55, %s7014_s26 }
0x320e   :  { %5151 = vrot.lane.b32.xlu0 %v4970_v58, %s8015_s13 }
0x3281   :  { %v5058_v29 = vpop.xlane.xlu0 %5057 }
0x3282   :  { %v5059_v5 = vsub.f32 %v5053_v2, %v5058_v29 }
0x3284   :  { %v5060_v8 = vmul.f32 1.442695, %v5059_v5 }
0x3285   :  { %v6788_v49 = vpop.permute.xlu0 %6787 }
0x3286   :  { %6939 = vpow2.f32 %v5060_v8  ;;  %v6790_v12 = vunpack.i.h.bf16 %v6788_v49  ;;  %v6789_v13 = vunpack.i.l.bf16 %v6788_v49 }
0x3288   :  { %v6568_v25 = vpack.c.bf16 %v6790_v12, %v6789_v13 }
0x3289   :  { %v5152_v21 = vpop.permute.xlu0 %5151 }
0x328a   :  { %6569 = vmatpush3.bf16.msra.mxu0 %v6568_v25 }
0x328b   :  { %6570 = vmatprep.subr.bf16.mxu0 %v7004_v3 }
0x3290   :  { %v6940_v14 = vpop.eup %6939 }
0x3291   :  { %v5062_v55 = vsel %vm4539_vm12, %v6940_v14, 0.0 }
0x3292   :  { %5063 = vadd.xlane.f32.xlu1 %v5062_v55 }
0x32a3   :  { %5147 = vrot.lane.b32.xlu1 %v4798_v22, %s7016_s1  ;;  %v5258_v22 = vld [vmem:[%s7187_s20 + $0x28] sm:$0xff] }
0x331f   :  { %v5064_v48 = vpop.xlane.xlu1 %5063 }
0x3320   :  { %6941 = vrcp.f32 %v5064_v48 }
0x332a   :  { %v6942_v42 = vpop.eup %6941 }
0x332b   :  { %v5066_v34 = vmul.f32 %v6942_v42, %v6940_v14 }
0x332d   :  { %6198 = vmatmul.mubr.msk.f32.vlgmr.msra.gmra.mrb[40].mxu0 %vm481_vm4, %v5066_v34 }
0x332e   :  { %6208 = vmatprep.mubr.msk.f32.mxu0 %vm7020_vm11, %v7021_v52  ;;  %6572 = vmatpush3.bf16.msra.mxu0 %v6571_v18  ;;  %v5148_v52 = vpop.permute.xlu1 %5147 }
0x332f   :  { %6573 = vmatprep.subr.bf16.mxu0 %v7004_v3  ;;  %v5158_v32 = vsel %vm397_vm2, %v7919_v17, %v5148_v52  ;;  %v5257_v17 = vld [vmem:[%s7187_s20 + $0x20] sm:$0xff]  ;;  %s5349_s20 = sshll.u32 %s7023_s10, 4  ;;  %s5350_s20 = int_to_ptr.vmem [resolvable:$true] %s5349_s20 }
0x3330   :  { %v5159_v39 = vsel %vm481_vm4, %v5158_v32, %v5152_v21  ;;  %v6583_v16 = vpack.c.bf16 %v5258_v22, %v5257_v17  ;;  %s6947_s12 = scalar_lea.vmem %s5350_s20, 32  ;;  %p6952_p1 = scmp.lt.s32.totalorder %s5350_s20, %s5350_s20 }
0x3331   :  { %p6948_p0 = scmp.ne.s32.totalorder %s5350_s20, %s6947_s12  ;;  %p6953_p2 = scmp.lt.s32.totalorder %s6947_s12, %s6947_s12 }
0x3332   :  { %6575 = vmatpush3.bf16.msra.mxu0 %v6574_v31  ;;  %6584 = vmatpush3.bf16.msra.mxu1 %v6583_v16 }
0x3333   :  { %6585 = vmatprep.subr.bf16.mxu1 %v7004_v3  ;;  %p6954_p3 = por %p6953_p2, %p6952_p1 }
0x3335   :  { %p6955_p4 = pnand %p6954_p3, %p6948_p0 }
0x3336   :  { %6587 = vmatpush3.bf16.msra.mxu1 %v6586_v44 }
0x3400   :  { %v5142_v4 = vpop.f32.mrb[40].mxu0 }
0x3401   :  { %5155 = vrot.lane.b32.xlu1 %v5142_v4, %s7018_s2  ;;  %v6199_v30 = vpop.f32.mrb[41].mxu0 }
0x3473   :  { %v5156_v20 = vpop.permute.xlu1 %5155 }
0x3474   :  { %v5160_v9 = vsel %vm1219_vm5, %v5159_v39, %v5156_v20 }
0x3475   :  { %6209 = vmatmul.mubr.msk.f32.vlgmr.msra.gmra.mrb[42].mxu0 %vm255_vm1, %v5160_v9 }
0x3548   :  { %v5241_v50 = vpop.f32.mrb[42].mxu0 }
0x3549   :  { %v5242_v37 = vadd.f32 %v5593_v47, %v5241_v50  ;;  %v6210_v27 = vpop.f32.mrb[43].mxu0 }
0x354b   :  { %5249 = vrot.lane.b32.xlu0 %v5242_v37, %s7022_s7 }
0x35bd   :  { %v5250_v53 = vpop.permute.xlu0 %5249 }
0x35be   :  { %v5252_v54 = vsel %vm255_vm1, %v7864_v51, %v5250_v53 }
0x35bf   :  { %6228 = vmatmul.mubr.msk.f32.vlgmr.msra.gmra.mrb[56].mxu1 %vm171_vm0, %v5252_v54 }
0x3692   :  { %v5337_v45 = vpop.f32.mrb[56].mxu1 }
0x3693   :  { %v5338_v19 = vadd.f32 %v5595_v26, %v5337_v45  ;;  %v6229_v3 = vpop.f32.mrb[57].mxu1 }
0x3695   :  { %5342 = vst.msk [vmem:[#allocation2] sm:$0x3] %vm5341_vm13, %v5338_v19 }
0x3696   :  { %6958 = shalt.err (!%p6955_p4)
}
0x3697   :  { %s6959_s16 = scalar_lea.hbm %s7197_s30, 32 }
0x3698   :  { %p6960_p5 = scmp.ne.s32.totalorder %s7197_s30, %s6959_s16  ;;  %p6963_p6 = scmp.lt.u32.totalorder %s6959_s16, %s7197_s30 }
0x369a   :  { %p6965_p7 = pnand %p6963_p6, %p6960_p5 }
0x369c   :  { %6968 = shalt.err (!%p6965_p7)
}
0x369d   :  { %5352 = dma.vmem_to_hbm [thread:$0]  %s5350_s20, 32, %s7197_s30, [#allocation3]  }
0x369e   :  { %6969 = dma.done.wait [#allocation3], 32  }
0x369f   :  { %6970 = vsyncadd [#allocation3], 4294967264 }
0x36a0   :  { %5356 = vsyncpa [#allocation3], 1 }

</bundles_post_ra>
